<compile_context>
chip_gen: v6e
topology: v6e:2x2x1
jax: 0.10.0
libtpu: 0.0.40
codegen_flags: <defaults>
</compile_context>

<pallas_src>
import math

import jax
import jax.numpy as jnp
from jax.experimental import pallas as pl
from jax.experimental.pallas import tpu as pltpu


def _make_attn_kernel(inv_sqrt_dk):
    def kernel(q_ref, k_ref, v_ref, wt_ref, b_ref, mask_ref, o_ref):
        # blocks: q/k (bt, S, Dk); v (bt, S, Dv); wt (Dv, DP); b (1, DP);
        #         mask (1, S, S) broadcasts over the bt axis; o (bt, S, DP).
        q = q_ref[...] * inv_sqrt_dk                        # scale the small (S,Dk) tile
        s = jnp.einsum("bqd,bkd->bqk", q, k_ref[...],
                       preferred_element_type=jnp.float32)  # no k.T copy (contract last dims)
        s = s + mask_ref[...]

        # numerically stable softmax with deferred normalization
        m = jnp.max(s, axis=-1, keepdims=True)
        e = jnp.exp(s - m)
        denom = jnp.sum(e, axis=-1, keepdims=True)

        # fold the output projection: vp = v @ W^T  (W^T pre-transposed & zero-padded
        # to 128 lanes in the wrapper -> lane-dense MXU output and unmasked stores)
        vp = jnp.einsum("bkd,do->bko", v_ref[...], wt_ref[...],
                        preferred_element_type=jnp.float32)  # (bt, S, DP)
        av = jnp.einsum("bqk,bko->bqo", e, vp,
                        preferred_element_type=jnp.float32)  # (bt, S, DP)

        # EUP approx reciprocal (free slot) + one Newton step to restore f32 accuracy
        r = pl.reciprocal(denom, approx=True)
        r = r * (2.0 - denom * r)

        out = av * r + b_ref[...]                            # bias after normalization (exact)
        o_ref[...] = out.astype(o_ref.dtype)

    return kernel


def _num_tensorcores_per_chip():
    """Best-effort detection: 2 TCs/chip only on v7x-class chips, else 1."""
    try:
        d = jax.devices()[0]
        kind = str(getattr(d, "device_kind", "")).lower()
        if "v7" in kind:
            return 2
        return max(1, int(getattr(d, "num_cores", 1)))
    except Exception:
        return 1


def _pick_block_b(B):
    """Single grid step on 1-TC chips; split the batch across 2 TCs when present."""
    n_cores = _num_tensorcores_per_chip()
    if n_cores >= 2 and B % 2 == 0:
        return B // 2
    return B


def attention_linear_out(query, key6, value3, mask, d_k, w_out, b_out):
    """query/key6: (B, S, Dk); value3: (B, S, Dv); mask: (1, S, S);
    w_out: (Do, Dv) (PyTorch Linear layout); b_out: (Do,). Returns (B, S, Do)."""
    B, S, Dk = query.shape
    Dv = value3.shape[-1]
    Do = w_out.shape[0]
    DP = ((Do + 127) // 128) * 128  # lane-dense padded projection width (>=128)

    # Pre-transpose + zero-pad the projection so the kernel's MXU output and HBM
    # stores are fully lane-dense (no masked vst.msk).
    wt = jnp.zeros((Dv, DP), query.dtype).at[:, :Do].set(w_out.T.astype(query.dtype))
    bp = jnp.zeros((1, DP), query.dtype).at[:, :Do].set(b_out.astype(query.dtype))

    inv_sqrt_dk = 1.0 / math.sqrt(d_k)
    bt = _pick_block_b(B)
    grid = (B // bt,)

    flops = 2 * B * S * S * Dk + 2 * B * S * Dv * DP + 2 * B * S * S * DP
    transcendentals = B * S * S
    bytes_accessed = 4 * (query.size + key6.size + value3.size
                          + wt.size + bp.size + mask.size + B * S * DP)

    grid_spec = pltpu.PrefetchScalarGridSpec(
        num_scalar_prefetch=0,
        grid=grid,
        in_specs=[
            pl.BlockSpec((bt, S, Dk), lambda i: (i, 0, 0)),   # q
            pl.BlockSpec((bt, S, Dk), lambda i: (i, 0, 0)),   # k
            pl.BlockSpec((bt, S, Dv), lambda i: (i, 0, 0)),   # v
            pl.BlockSpec((Dv, DP), lambda i: (0, 0)),         # W^T (resident, padded)
            pl.BlockSpec((1, DP), lambda i: (0, 0)),          # bias (resident, padded)
            pl.BlockSpec((1, S, S), lambda i: (0, 0, 0)),     # mask (resident, broadcast over B)
        ],
        out_specs=pl.BlockSpec((bt, S, DP), lambda i: (i, 0, 0)),
    )

    out_pad = pl.pallas_call(
        _make_attn_kernel(inv_sqrt_dk),
        out_shape=jax.ShapeDtypeStruct((B, S, DP), query.dtype),
        grid_spec=grid_spec,
        compiler_params=pltpu.CompilerParams(
            dimension_semantics=("parallel",)
        ),
        cost_estimate=pl.CostEstimate(
            flops=flops,
            transcendentals=transcendentals,
            bytes_accessed=bytes_accessed,
        ),
    )(query, key6, value3, wt, bp, mask)

    return out_pad[..., :Do]


def _reference(query, key6, value3, mask, d_k, w_out, b_out):
    qk = jnp.einsum("bqd,bkd->bqk", query, key6) / math.sqrt(d_k)
    qk = qk + mask
    p = jax.nn.softmax(qk, axis=-1)
    av = jnp.einsum("bqk,bkd->bqd", p, value3)
    return av @ w_out.T + b_out


if __name__ == "__main__":
    # S = 56 matches the module's (1, 56, 56) mask; small feature dims.
    B, S, DK, DV, DO = 8, 56, 32, 32, 32
    d_k = DK

    key = jax.random.PRNGKey(0)
    kq, kk, kv, km, kw, kb = jax.random.split(key, 6)

    query = jax.random.normal(kq, (B, S, DK), dtype=jnp.float32)
    key6 = jax.random.normal(kk, (B, S, DK), dtype=jnp.float32)
    value3 = jax.random.normal(kv, (B, S, DV), dtype=jnp.float32)

    # additive mask: some positions set to -1e9 (as intended by the reference)
    mask_bool = jax.random.uniform(km, (1, S, S)) > 0.7
    mask = jnp.where(mask_bool, -1.0e9, 0.0).astype(jnp.float32)

    # deterministic "linear_out" parameters (nn.Linear(DV, DO) layout: (out, in))
    w_out = (jax.random.normal(kw, (DO, DV), dtype=jnp.float32)
             * (1.0 / math.sqrt(DV)))
    b_out = jax.random.normal(kb, (DO,), dtype=jnp.float32) * 0.01

    out = attention_linear_out(query, key6, value3, mask, d_k, w_out, b_out)
    out = jax.block_until_ready(out)

    ref = _reference(query, key6, value3, mask, d_k, w_out, b_out)
    assert out.shape == (B, S, DO)
    assert jnp.allclose(out, ref, atol=2e-4, rtol=2e-4), "mismatch vs reference"

    print("KERNEL_OK")
</pallas_src>

<mosaic_0001>
module attributes {stable_mosaic.version = 11 : i64} {
  func.func @kernel(%arg0: i32, %arg1: memref<8x56x32xf32, #tpu.memory_space<vmem>>, %arg2: memref<8x56x32xf32, #tpu.memory_space<vmem>>, %arg3: memref<8x56x32xf32, #tpu.memory_space<vmem>>, %arg4: memref<32x128xf32, #tpu.memory_space<vmem>>, %arg5: memref<1x128xf32, #tpu.memory_space<vmem>>, %arg6: memref<1x56x56xf32, #tpu.memory_space<vmem>>, %arg7: memref<8x56x128xf32, #tpu.memory_space<vmem>>) attributes {dimension_semantics = [#tpu.dimension_semantics<parallel>], iteration_bounds = array<i64: 1>, scalar_prefetch = 0 : i64, scratch_operands = 0 : i64, tpu.core_type = #tpu.core_type<tc>, window_params = [{transform_indices = @transform_0, window_bounds = array<i64: 8, 56, 32>}, {transform_indices = @transform_1, window_bounds = array<i64: 8, 56, 32>}, {transform_indices = @transform_2, window_bounds = array<i64: 8, 56, 32>}, {pipeline_mode = #tpu.pipeline_mode<synchronous>, transform_indices = @transform_3, window_bounds = array<i64: 32, 128>}, {pipeline_mode = #tpu.pipeline_mode<synchronous>, transform_indices = @transform_4, window_bounds = array<i64: 1, 128>}, {pipeline_mode = #tpu.pipeline_mode<synchronous>, transform_indices = @transform_5, window_bounds = array<i64: 1, 56, 56>}, {transform_indices = @transform_6, window_bounds = array<i64: 8, 56, 128>}]} {
    %c0 = arith.constant 0 : index
    %c0_0 = arith.constant 0 : index
    %c0_1 = arith.constant 0 : index
    %0 = vector.load %arg1[%c0, %c0_0, %c0_1] : memref<8x56x32xf32, #tpu.memory_space<vmem>>, vector<8x56x32xf32>
    %cst = arith.constant 0.176776692 : f32
    %1 = vector.broadcast %cst : f32 to vector<8x56x32xf32>
    %2 = arith.mulf %0, %1 : vector<8x56x32xf32>
    %c0_2 = arith.constant 0 : index
    %c0_3 = arith.constant 0 : index
    %c0_4 = arith.constant 0 : index
    %3 = vector.load %arg2[%c0_2, %c0_3, %c0_4] : memref<8x56x32xf32, #tpu.memory_space<vmem>>, vector<8x56x32xf32>
    "tpu.trace_start"() <{level = 10 : i32, message = "bqd,bkd->bqk"}> : () -> ()
    %cst_5 = arith.constant dense<0.000000e+00> : vector<8x56x56xf32>
    %4 = tpu.matmul %2, %3, %cst_5 {dimension_numbers = #tpu.dot_dimension_numbers<[2], [2], [1], [1], [0, 0, 0, 1, 1, 1], [0], [0]>} : vector<8x56x32xf32>, vector<8x56x32xf32>, vector<8x56x56xf32> -> vector<8x56x56xf32>
    "tpu.trace_stop"() : () -> ()
    %c0_6 = arith.constant 0 : index
    %c0_7 = arith.constant 0 : index
    %c0_8 = arith.constant 0 : index
    %5 = vector.load %arg6[%c0_6, %c0_7, %c0_8] : memref<1x56x56xf32, #tpu.memory_space<vmem>>, vector<1x56x56xf32>
    %6 = vector.broadcast %5 : vector<1x56x56xf32> to vector<8x56x56xf32>
    %7 = arith.addf %4, %6 : vector<8x56x56xf32>
    %cst_9 = arith.constant dense<0xFF800000> : vector<8x56xf32>
    %8 = vector.multi_reduction <maximumf>, %7, %cst_9 [2] : vector<8x56x56xf32> to vector<8x56xf32>
    %9 = vector.shape_cast %8 : vector<8x56xf32> to vector<8x56x1xf32>
    %10 = vector.broadcast %9 : vector<8x56x1xf32> to vector<8x56x56xf32>
    %11 = arith.subf %7, %10 : vector<8x56x56xf32>
    %12 = math.exp %11 : vector<8x56x56xf32>
    %cst_10 = arith.constant dense<0.000000e+00> : vector<8x56xf32>
    %13 = vector.multi_reduction <add>, %12, %cst_10 [2] : vector<8x56x56xf32> to vector<8x56xf32>
    %14 = vector.shape_cast %13 : vector<8x56xf32> to vector<8x56x1xf32>
    %c0_11 = arith.constant 0 : index
    %c0_12 = arith.constant 0 : index
    %c0_13 = arith.constant 0 : index
    %15 = vector.load %arg3[%c0_11, %c0_12, %c0_13] : memref<8x56x32xf32, #tpu.memory_space<vmem>>, vector<8x56x32xf32>
    %c0_14 = arith.constant 0 : index
    %c0_15 = arith.constant 0 : index
    %16 = vector.load %arg4[%c0_14, %c0_15] : memref<32x128xf32, #tpu.memory_space<vmem>>, vector<32x128xf32>
    "tpu.trace_start"() <{level = 10 : i32, message = "bkd,do->bko"}> : () -> ()
    %cst_16 = arith.constant dense<0.000000e+00> : vector<8x56x128xf32>
    %17 = tpu.matmul %15, %16, %cst_16 {dimension_numbers = #tpu.dot_dimension_numbers<[2], [0], [0, 1], [1], [0, 0, 0, 1, 1, 1], [], []>} : vector<8x56x32xf32>, vector<32x128xf32>, vector<8x56x128xf32> -> vector<8x56x128xf32>
    "tpu.trace_stop"() : () -> ()
    "tpu.trace_start"() <{level = 10 : i32, message = "bqk,bko->bqo"}> : () -> ()
    %cst_17 = arith.constant dense<0.000000e+00> : vector<8x56x128xf32>
    %18 = tpu.matmul %12, %17, %cst_17 {dimension_numbers = #tpu.dot_dimension_numbers<[2], [1], [1], [2], [0, 0, 0, 1, 1, 2], [0], [0]>} : vector<8x56x56xf32>, vector<8x56x128xf32>, vector<8x56x128xf32> -> vector<8x56x128xf32>
    "tpu.trace_stop"() : () -> ()
    %19 = tpu.reciprocal %14 {approx = true} : vector<8x56x1xf32> -> vector<8x56x1xf32>
    %20 = arith.mulf %14, %19 : vector<8x56x1xf32>
    %cst_18 = arith.constant 2.000000e+00 : f32
    %21 = vector.broadcast %cst_18 : f32 to vector<8x56x1xf32>
    %22 = arith.subf %21, %20 : vector<8x56x1xf32>
    %23 = arith.mulf %19, %22 : vector<8x56x1xf32>
    %24 = vector.broadcast %23 : vector<8x56x1xf32> to vector<8x56x128xf32>
    %25 = arith.mulf %18, %24 : vector<8x56x128xf32>
    %c0_19 = arith.constant 0 : index
    %c0_20 = arith.constant 0 : index
    %26 = vector.load %arg5[%c0_19, %c0_20] : memref<1x128xf32, #tpu.memory_space<vmem>>, vector<1x128xf32>
    %27 = vector.shape_cast %26 : vector<1x128xf32> to vector<1x1x128xf32>
    %28 = vector.broadcast %27 : vector<1x1x128xf32> to vector<8x56x128xf32>
    %29 = arith.addf %25, %28 : vector<8x56x128xf32>
    %c0_21 = arith.constant 0 : index
    %c0_22 = arith.constant 0 : index
    %c0_23 = arith.constant 0 : index
    %30 = vector.load %arg7[%c0_21, %c0_22, %c0_23] : memref<8x56x128xf32, #tpu.memory_space<vmem>>, vector<8x56x128xf32>
    tpu.vector_store %arg7[%c0_21, %c0_22, %c0_23], %29 {strides = array<i32>} : memref<8x56x128xf32, #tpu.memory_space<vmem>>, vector<8x56x128xf32>,
    return
  }
  func.func @transform_0(%arg0: i32) -> (i32, i32, i32) {
    %c0_i32 = arith.constant 0 : i32
    %c0_i32_0 = arith.constant 0 : i32
    %c0_i32_1 = arith.constant 0 : i32
    return %arg0, %c0_i32, %c0_i32_0 : i32, i32, i32
  }
  func.func @transform_1(%arg0: i32) -> (i32, i32, i32) {
    %c0_i32 = arith.constant 0 : i32
    %c0_i32_0 = arith.constant 0 : i32
    %c0_i32_1 = arith.constant 0 : i32
    return %arg0, %c0_i32, %c0_i32_0 : i32, i32, i32
  }
  func.func @transform_2(%arg0: i32) -> (i32, i32, i32) {
    %c0_i32 = arith.constant 0 : i32
    %c0_i32_0 = arith.constant 0 : i32
    %c0_i32_1 = arith.constant 0 : i32
    return %arg0, %c0_i32, %c0_i32_0 : i32, i32, i32
  }
  func.func @transform_3(%arg0: i32) -> (i32, i32) {
    %c0_i32 = arith.constant 0 : i32
    %c0_i32_0 = arith.constant 0 : i32
    %c0_i32_1 = arith.constant 0 : i32
    return %c0_i32, %c0_i32_0 : i32, i32
  }
  func.func @transform_4(%arg0: i32) -> (i32, i32) {
    %c0_i32 = arith.constant 0 : i32
    %c0_i32_0 = arith.constant 0 : i32
    %c0_i32_1 = arith.constant 0 : i32
    return %c0_i32, %c0_i32_0 : i32, i32
  }
  func.func @transform_5(%arg0: i32) -> (i32, i32, i32) {
    %c0_i32 = arith.constant 0 : i32
    %c0_i32_0 = arith.constant 0 : i32
    %c0_i32_1 = arith.constant 0 : i32
    %c0_i32_2 = arith.constant 0 : i32
    return %c0_i32, %c0_i32_0, %c0_i32_1 : i32, i32, i32
  }
  func.func @transform_6(%arg0: i32) -> (i32, i32, i32) {
    %c0_i32 = arith.constant 0 : i32
    %c0_i32_0 = arith.constant 0 : i32
    %c0_i32_1 = arith.constant 0 : i32
    return %arg0, %c0_i32, %c0_i32_0 : i32, i32, i32
  }
}

</mosaic_0001>

<bundles_post_ra>
// kernel: tpu_custom_call.1
= control target key start
LH: loop header
LB: loop body
LE: loop exit
PB: predicated region body
PF: predicated region fallthrough
CT: control target
= control target key end

     0   :  { %vm199_vm0 = vcmask 261120   ;;  %v7317_v1 = vmov 0.0   ;;  %vm5211_vm1 = vmmov 0   ;;  %s7310_s0 = inlined_call_operand.vmem [shape: f32[8,56,32], index: 0, kind: input, shape index: {}]   ;;  %s7311_s1 = inlined_call_operand.vmem [shape: f32[8,56,32], index: 1, kind: input, shape index: {}]   ;;  %s7312_s2 = inlined_call_operand.vmem [shape: f32[8,56,32], index: 2, kind: input, shape index: {}]   ;;  %s7313_s3 = inlined_call_operand.vmem [shape: f32[32,128], index: 3, kind: input, shape index: {}]   ;;  %s7314_s4 = inlined_call_operand.vmem [shape: f32[1,128], index: 4, kind: input, shape index: {}]   ;;  %s7315_s5 = inlined_call_operand.vmem [shape: f32[1,56,56], index: 5, kind: input, shape index: {}]   ;;  %s7316_s6 = inlined_call_operand.hbm [shape: f32[8,56,128], index: 6, kind: output, shape index: {}]  }
   0x1   :  { %v142_v0 = vld [vmem:[%s7311_s1 + $0x30] sm:$0xff]  ;;  %4306 = vmatprep.subr.mxu0 %v7317_v1  ;;  %4341 = vmatprep.subr.mxu1 %v7317_v1  ;;  %v149_v2 = vld [vmem:[%s7311_s1 + $0x68] sm:$0xff]  ;;  %v148_v4 = vld [vmem:[%s7311_s1 + $0x60] sm:$0xff] }
   0x2   :  { %4307 = vmatpush3.xpose.msk.msra.mxu0 %vm199_vm0, %v142_v0  ;;  %4342 = vmatpush3.xpose.msk.msra.mxu1 %vm199_vm0, %v149_v2  ;;  %v141_v3 = vld [vmem:[%s7311_s1 + $0x28] sm:$0xff]  ;;  %v140_v5 = vld [vmem:[%s7311_s1 + $0x20] sm:$0xff]  ;;  %v147_v6 = vld [vmem:[%s7311_s1 + $0x58] sm:$0xff] }
   0x3   :  { %4308 = vmatprep.subr.mxu0 %v7317_v1  ;;  %4343 = vmatprep.subr.mxu1 %v7317_v1  ;;  %v139_v7 = vld [vmem:[%s7311_s1 + $0x18] sm:$0xff]  ;;  %v146_v8 = vld [vmem:[%s7311_s1 + $0x50] sm:$0xff]  ;;  %v145_v10 = vld [vmem:[%s7311_s1 + $0x48] sm:$0xff] }
   0x4   :  { %4320 = vmatprep.mubr.msk.f32.mxu0 %vm5211_vm1, %v7317_v1  ;;  %4355 = vmatprep.mubr.msk.f32.mxu1 %vm5211_vm1, %v7317_v1  ;;  %v138_v9 = vld [vmem:[%s7311_s1 + $0x10] sm:$0xff]  ;;  %v137_v11 = vld [vmem:[%s7311_s1 + $0x8] sm:$0xff]  ;;  %v144_v12 = vld [vmem:[%s7311_s1 + $0x40] sm:$0xff] }
   0x5   :  { %v24_v13 = vld [vmem:[%s7310_s0] sm:$0xff]  ;;  %v31_v14 = vld [vmem:[%s7310_s0 + $0x38] sm:$0xff]  ;;  %v25_v19 = vld [vmem:[%s7310_s0 + $0x8] sm:$0xff] }
   0x6   :  { %4309 = vmatpush3.xpose.msk.msra.mxu0 %vm199_vm0, %v141_v3  ;;  %4344 = vmatpush3.xpose.msk.msra.mxu1 %vm199_vm0, %v148_v4  ;;  %v136_v15 = vld [vmem:[%s7311_s1] sm:$0xff]  ;;  %v143_v16 = vld [vmem:[%s7311_s1 + $0x38] sm:$0xff]  ;;  %v80_v17 = vmul.f32 0.17677669, %v24_v13  ;;  %v87_v18 = vmul.f32 0.17677669, %v31_v14 }
   0x7   :  { %4310 = vmatprep.subr.mxu0 %v7317_v1  ;;  %4345 = vmatprep.subr.mxu1 %v7317_v1  ;;  %v32_v20 = vld [vmem:[%s7310_s0 + $0x40] sm:$0xff]  ;;  %v163_v22 = vld [vmem:[%s7311_s1 + $0xd8] sm:$0xff]  ;;  %v81_v23 = vmul.f32 0.17677669, %v25_v19  ;;  %v26_v25 = vld [vmem:[%s7310_s0 + $0x10] sm:$0xff] }
   0x8   :  { %v156_v21 = vld [vmem:[%s7311_s1 + $0xa0] sm:$0xff]  ;;  %v88_v24 = vmul.f32 0.17677669, %v32_v20  ;;  %v33_v26 = vld [vmem:[%s7310_s0 + $0x48] sm:$0xff]  ;;  %v155_v27 = vld [vmem:[%s7311_s1 + $0x98] sm:$0xff] }
   0x9   :  { %v162_v28 = vld [vmem:[%s7311_s1 + $0xd0] sm:$0xff]  ;;  %v82_v29 = vmul.f32 0.17677669, %v26_v25  ;;  %v89_v30 = vmul.f32 0.17677669, %v33_v26  ;;  %v27_v31 = vld [vmem:[%s7310_s0 + $0x18] sm:$0xff] }
   0xa   :  { %4311 = vmatpush3.xpose.msk.msra.mxu0 %vm199_vm0, %v140_v5  ;;  %4346 = vmatpush3.xpose.msk.msra.mxu1 %vm199_vm0, %v147_v6  ;;  %v34_v32 = vld [vmem:[%s7310_s0 + $0x50] sm:$0xff]  ;;  %v161_v34 = vld [vmem:[%s7311_s1 + $0xc8] sm:$0xff]  ;;  %v83_v35 = vmul.f32 0.17677669, %v27_v31  ;;  %v28_v37 = vld [vmem:[%s7310_s0 + $0x20] sm:$0xff] }
   0xb   :  { %4312 = vmatprep.subr.mxu0 %v7317_v1  ;;  %4347 = vmatprep.subr.mxu1 %v7317_v1  ;;  %v154_v33 = vld [vmem:[%s7311_s1 + $0x90] sm:$0xff]  ;;  %v90_v36 = vmul.f32 0.17677669, %v34_v32  ;;  %v35_v38 = vld [vmem:[%s7310_s0 + $0x58] sm:$0xff]  ;;  %v153_v39 = vld [vmem:[%s7311_s1 + $0x88] sm:$0xff] }
   0xc   :  { %v160_v40 = vld [vmem:[%s7311_s1 + $0xc0] sm:$0xff]  ;;  %v84_v41 = vmul.f32 0.17677669, %v28_v37  ;;  %v91_v42 = vmul.f32 0.17677669, %v35_v38  ;;  %v29_v43 = vld [vmem:[%s7310_s0 + $0x28] sm:$0xff] }
   0xd   :  { %v36_v44 = vld [vmem:[%s7310_s0 + $0x60] sm:$0xff]  ;;  %v159_v46 = vld [vmem:[%s7311_s1 + $0xb8] sm:$0xff]  ;;  %v85_v47 = vmul.f32 0.17677669, %v29_v43  ;;  %v30_v49 = vld [vmem:[%s7310_s0 + $0x30] sm:$0xff] }
   0xe   :  { %4313 = vmatpush3.xpose.msk.msra.mxu0 %vm199_vm0, %v139_v7  ;;  %4348 = vmatpush3.xpose.msk.msra.mxu1 %vm199_vm0, %v146_v8  ;;  %v152_v45 = vld [vmem:[%s7311_s1 + $0x80] sm:$0xff]  ;;  %v92_v48 = vmul.f32 0.17677669, %v36_v44  ;;  %v37_v50 = vld [vmem:[%s7310_s0 + $0x68] sm:$0xff]  ;;  %v151_v51 = vld [vmem:[%s7311_s1 + $0x78] sm:$0xff] }
   0xf   :  { %4314 = vmatprep.subr.mxu0 %v7317_v1  ;;  %4349 = vmatprep.subr.mxu1 %v7317_v1  ;;  %v158_v52 = vld [vmem:[%s7311_s1 + $0xb0] sm:$0xff]  ;;  %v86_v53 = vmul.f32 0.17677669, %v30_v49  ;;  %v93_v54 = vmul.f32 0.17677669, %v37_v50 }
  0x10   :  { %v38_v55 = vld [vmem:[%s7310_s0 + $0x70] sm:$0xff] }
  0x11   :  { %v150_v56 = vld [vmem:[%s7311_s1 + $0x70] sm:$0xff] }
  0x12   :  { %4315 = vmatpush3.xpose.msk.msra.mxu0 %vm199_vm0, %v138_v9  ;;  %4350 = vmatpush3.xpose.msk.msra.mxu1 %vm199_vm0, %v145_v10 }
  0x13   :  { %4316 = vmatprep.subr.mxu0 %v7317_v1  ;;  %4351 = vmatprep.subr.mxu1 %v7317_v1 }
  0x16   :  { %4317 = vmatpush3.xpose.msk.msra.mxu0 %vm199_vm0, %v137_v11  ;;  %4352 = vmatpush3.xpose.msk.msra.mxu1 %vm199_vm0, %v144_v12 }
  0x17   :  { %4318 = vmatprep.subr.mxu0 %v7317_v1  ;;  %4353 = vmatprep.subr.mxu1 %v7317_v1 }
  0x1a   :  { %4319 = vmatpush3.xpose.msk.msra.mxu0 %vm199_vm0, %v136_v15  ;;  %4354 = vmatpush3.xpose.msk.msra.mxu1 %vm199_vm0, %v143_v16 }
  0x1b   :  { %4376 = vmatprep.subr.mxu0 %v7317_v1  ;;  %4411 = vmatprep.subr.mxu1 %v7317_v1 }
  0x1d   :  { %4321 = vmatmul.mubr.msk.f32.vlgmr.msra.gmra.mxu0 %vm199_vm0, %v80_v17  ;;  %4356 = vmatmul.mubr.msk.f32.vlgmr.msra.gmra.mxu1 %vm199_vm0, %v87_v18 }
  0x1e   :  { %4377 = vmatpush3.xpose.msk.msra.mxu0 %vm199_vm0, %v156_v21  ;;  %4323 = vmatprep.mubr.msk.f32.mxu0 %vm5211_vm1, %v7317_v1 }
  0x1f   :  { %4378 = vmatprep.subr.mxu0 %v7317_v1  ;;  %4412 = vmatpush3.xpose.msk.msra.mxu1 %vm199_vm0, %v163_v22 }
  0x20   :  { %4358 = vmatprep.mubr.msk.f32.mxu1 %vm5211_vm1, %v7317_v1  ;;  %4413 = vmatprep.subr.mxu1 %v7317_v1 }
  0x21   :  { %4324 = vmatmul.mubr.msk.f32.gmra.mxu0 %vm199_vm0, %v81_v23  ;;  %4359 = vmatmul.mubr.msk.f32.gmra.mxu1 %vm199_vm0, %v88_v24 }
  0x22   :  { %4379 = vmatpush3.xpose.msk.msra.mxu0 %vm199_vm0, %v155_v27  ;;  %4326 = vmatprep.mubr.msk.f32.mxu0 %vm5211_vm1, %v7317_v1 }
  0x23   :  { %4380 = vmatprep.subr.mxu0 %v7317_v1  ;;  %4414 = vmatpush3.xpose.msk.msra.mxu1 %vm199_vm0, %v162_v28 }
  0x24   :  { %4361 = vmatprep.mubr.msk.f32.mxu1 %vm5211_vm1, %v7317_v1  ;;  %4415 = vmatprep.subr.mxu1 %v7317_v1 }
  0x25   :  { %4327 = vmatmul.mubr.msk.f32.gmra.mxu0 %vm199_vm0, %v82_v29  ;;  %4362 = vmatmul.mubr.msk.f32.gmra.mxu1 %vm199_vm0, %v89_v30 }
  0x26   :  { %4381 = vmatpush3.xpose.msk.msra.mxu0 %vm199_vm0, %v154_v33  ;;  %4329 = vmatprep.mubr.msk.f32.mxu0 %vm5211_vm1, %v7317_v1 }
  0x27   :  { %4382 = vmatprep.subr.mxu0 %v7317_v1  ;;  %4416 = vmatpush3.xpose.msk.msra.mxu1 %vm199_vm0, %v161_v34 }
  0x28   :  { %4364 = vmatprep.mubr.msk.f32.mxu1 %vm5211_vm1, %v7317_v1  ;;  %4417 = vmatprep.subr.mxu1 %v7317_v1 }
  0x29   :  { %4330 = vmatmul.mubr.msk.f32.gmra.mxu0 %vm199_vm0, %v83_v35  ;;  %4365 = vmatmul.mubr.msk.f32.gmra.mxu1 %vm199_vm0, %v90_v36 }
  0x2a   :  { %4383 = vmatpush3.xpose.msk.msra.mxu0 %vm199_vm0, %v153_v39  ;;  %4332 = vmatprep.mubr.msk.f32.mxu0 %vm5211_vm1, %v7317_v1 }
  0x2b   :  { %4384 = vmatprep.subr.mxu0 %v7317_v1  ;;  %4418 = vmatpush3.xpose.msk.msra.mxu1 %vm199_vm0, %v160_v40 }
  0x2c   :  { %4367 = vmatprep.mubr.msk.f32.mxu1 %vm5211_vm1, %v7317_v1  ;;  %4419 = vmatprep.subr.mxu1 %v7317_v1 }
  0x2d   :  { %4333 = vmatmul.mubr.msk.f32.gmra.mxu0 %vm199_vm0, %v84_v41  ;;  %4368 = vmatmul.mubr.msk.f32.gmra.mxu1 %vm199_vm0, %v91_v42 }
  0x2e   :  { %4385 = vmatpush3.xpose.msk.msra.mxu0 %vm199_vm0, %v152_v45  ;;  %4335 = vmatprep.mubr.msk.f32.mxu0 %vm5211_vm1, %v7317_v1 }
  0x2f   :  { %4386 = vmatprep.subr.mxu0 %v7317_v1  ;;  %4420 = vmatpush3.xpose.msk.msra.mxu1 %vm199_vm0, %v159_v46 }
  0x30   :  { %4370 = vmatprep.mubr.msk.f32.mxu1 %vm5211_vm1, %v7317_v1  ;;  %4421 = vmatprep.subr.mxu1 %v7317_v1 }
  0x31   :  { %4336 = vmatmul.mubr.msk.f32.gmra.mxu0 %vm199_vm0, %v85_v47  ;;  %4371 = vmatmul.mubr.msk.f32.gmra.mxu1 %vm199_vm0, %v92_v48 }
  0x32   :  { %4387 = vmatpush3.xpose.msk.msra.mxu0 %vm199_vm0, %v151_v51  ;;  %4338 = vmatprep.mubr.msk.f32.mxu0 %vm5211_vm1, %v7317_v1 }
  0x33   :  { %4388 = vmatprep.subr.mxu0 %v7317_v1  ;;  %4422 = vmatpush3.xpose.msk.msra.mxu1 %vm199_vm0, %v158_v52 }
  0x34   :  { %11 = vsyncpa [#allocation3], 0  ;;  %4373 = vmatprep.mubr.msk.f32.mxu1 %vm5211_vm1, %v7317_v1  ;;  %4423 = vmatprep.subr.mxu1 %v7317_v1  ;;  %v157_v57 = vld [vmem:[%s7311_s1 + $0xa8] sm:$0xff]  ;;  %v94_v59 = vmul.f32 0.17677669, %v38_v55  ;;  %v39_v60 = vld [vmem:[%s7310_s0 + $0x78] sm:$0xff] }
  0x35   :  { %v45_v58 = vld [vmem:[%s7310_s0 + $0xa8] sm:$0xff]  ;;  %4339 = vmatmul.mubr.msk.f32.gmra.mxu0 %vm199_vm0, %v86_v53  ;;  %4374 = vmatmul.mubr.msk.f32.gmra.mxu1 %vm199_vm0, %v93_v54  ;;  %v170_v61 = vld [vmem:[%s7311_s1 + $0x110] sm:$0xff]  ;;  %v95_v0 = vmul.f32 0.17677669, %v39_v60  ;;  %v40_v3 = vld [vmem:[%s7310_s0 + $0x80] sm:$0xff]  ;;  %vm1336_vm2 = vcmask 457728  }
  0x36   :  { %4389 = vmatpush3.xpose.msk.msra.mxu0 %vm199_vm0, %v150_v56  ;;  %4390 = vmatprep.mubr.msk.f32.mxu0 %vm5211_vm1, %v7317_v1  ;;  %v101_v62 = vmul.f32 0.17677669, %v45_v58  ;;  %v46_v63 = vld [vmem:[%s7310_s0 + $0xb0] sm:$0xff]  ;;  %v177_v2 = vld [vmem:[%s7311_s1 + $0x148] sm:$0xff]  ;;  %v47_v6 = vld [vmem:[%s7310_s0 + $0xb8] sm:$0xff] }
  0x37   :  { %4446 = vmatprep.subr.mxu0 %v7317_v1  ;;  %4424 = vmatpush3.xpose.msk.msra.mxu1 %vm199_vm0, %v157_v57  ;;  %v169_v4 = vld [vmem:[%s7311_s1 + $0x108] sm:$0xff]  ;;  %v102_v5 = vmul.f32 0.17677669, %v46_v63  ;;  %v96_v7 = vmul.f32 0.17677669, %v40_v3  ;;  %v176_v8 = vld [vmem:[%s7311_s1 + $0x140] sm:$0xff] }
  0x38   :  { %4425 = vmatprep.mubr.msk.f32.mxu1 %vm5211_vm1, %v7317_v1  ;;  %4481 = vmatprep.subr.mxu1 %v7317_v1  ;;  %v41_v9 = vld [vmem:[%s7310_s0 + $0x88] sm:$0xff]  ;;  %v168_v10 = vld [vmem:[%s7311_s1 + $0x100] sm:$0xff]  ;;  %v103_v11 = vmul.f32 0.17677669, %v47_v6  ;;  %v175_v14 = vld [vmem:[%s7311_s1 + $0x138] sm:$0xff] }
  0x39   :  { %4391 = vmatmul.mubr.msk.f32.vlgmr.msra.gmra.mxu0 %vm199_vm0, %v94_v59  ;;  %v48_v12 = vld [vmem:[%s7310_s0 + $0xc0] sm:$0xff]  ;;  %v97_v13 = vmul.f32 0.17677669, %v41_v9  ;;  %v42_v15 = vld [vmem:[%s7310_s0 + $0x90] sm:$0xff]  ;;  %v167_v16 = vld [vmem:[%s7311_s1 + $0xf8] sm:$0xff] }
  0x3a   :  { %4447 = vmatpush3.xpose.msk.msra.mxu0 %vm199_vm0, %v170_v61  ;;  %4393 = vmatprep.mubr.msk.f32.mxu0 %vm5211_vm1, %v7317_v1  ;;  %v104_v17 = vmul.f32 0.17677669, %v48_v12  ;;  %v49_v18 = vld [vmem:[%s7310_s0 + $0xc8] sm:$0xff]  ;;  %v98_v19 = vmul.f32 0.17677669, %v42_v15  ;;  %v174_v20 = vld [vmem:[%s7311_s1 + $0x130] sm:$0xff] }
  0x3b   :  { %4448 = vmatprep.subr.mxu0 %v7317_v1  ;;  %4426 = vmatmul.mubr.msk.f32.vlgmr.msra.gmra.mxu1 %vm199_vm0, %v101_v62  ;;  %v43_v21 = vld [vmem:[%s7310_s0 + $0x98] sm:$0xff]  ;;  %v166_v22 = vld [vmem:[%s7311_s1 + $0xf0] sm:$0xff]  ;;  %v105_v23 = vmul.f32 0.17677669, %v49_v18  ;;  %v173_v26 = vld [vmem:[%s7311_s1 + $0x128] sm:$0xff] }
  0x3c   :  { %4482 = vmatpush3.xpose.msk.msra.mxu1 %vm199_vm0, %v177_v2  ;;  %4428 = vmatprep.mubr.msk.f32.mxu1 %vm5211_vm1, %v7317_v1  ;;  %v50_v24 = vld [vmem:[%s7310_s0 + $0xd0] sm:$0xff]  ;;  %v99_v25 = vmul.f32 0.17677669, %v43_v21  ;;  %v44_v27 = vld [vmem:[%s7310_s0 + $0xa0] sm:$0xff]  ;;  %v165_v28 = vld [vmem:[%s7311_s1 + $0xe8] sm:$0xff] }
  0x3d   :  { %4394 = vmatmul.mubr.msk.f32.gmra.mxu0 %vm199_vm0, %v95_v0  ;;  %4483 = vmatprep.subr.mxu1 %v7317_v1  ;;  %v106_v29 = vmul.f32 0.17677669, %v50_v24  ;;  %v51_v30 = vld [vmem:[%s7310_s0 + $0xd8] sm:$0xff]  ;;  %v100_v31 = vmul.f32 0.17677669, %v44_v27  ;;  %v172_v32 = vld [vmem:[%s7311_s1 + $0x120] sm:$0xff] }
  0x3e   :  { %4449 = vmatpush3.xpose.msk.msra.mxu0 %vm199_vm0, %v169_v4  ;;  %4396 = vmatprep.mubr.msk.f32.mxu0 %vm5211_vm1, %v7317_v1  ;;  %v52_v33 = vld [vmem:[%s7310_s0 + $0xe0] sm:$0xff]  ;;  %v107_v35 = vmul.f32 0.17677669, %v51_v30  ;;  %v59_v36 = vld [vmem:[%s7310_s0 + $0x118] sm:$0xff]  ;;  %v53_v39 = vld [vmem:[%s7310_s0 + $0xe8] sm:$0xff] }
  0x3f   :  { %4450 = vmatprep.subr.mxu0 %v7317_v1  ;;  %4429 = vmatmul.mubr.msk.f32.gmra.mxu1 %vm199_vm0, %v102_v5  ;;  %v164_v34 = vld [vmem:[%s7311_s1 + $0xe0] sm:$0xff]  ;;  %v108_v37 = vmul.f32 0.17677669, %v52_v33  ;;  %v171_v38 = vld [vmem:[%s7311_s1 + $0x118] sm:$0xff]  ;;  %v115_v41 = vmul.f32 0.17677669, %v59_v36 }
  0x40   :  { %4484 = vmatpush3.xpose.msk.msra.mxu1 %vm199_vm0, %v176_v8  ;;  %4431 = vmatprep.mubr.msk.f32.mxu1 %vm5211_vm1, %v7317_v1  ;;  %v184_v40 = vld [vmem:[%s7311_s1 + $0x180] sm:$0xff]  ;;  %v109_v43 = vmul.f32 0.17677669, %v53_v39  ;;  %v191_v44 = vld [vmem:[%s7311_s1 + $0x1b8] sm:$0xff]  ;;  %v54_v45 = vld [vmem:[%s7310_s0 + $0xf0] sm:$0xff] }
  0x41   :  { %4397 = vmatmul.mubr.msk.f32.gmra.mxu0 %vm199_vm0, %v96_v7  ;;  %4485 = vmatprep.subr.mxu1 %v7317_v1  ;;  %v60_v42 = vld [vmem:[%s7310_s0 + $0x120] sm:$0xff]  ;;  %v183_v46 = vld [vmem:[%s7311_s1 + $0x178] sm:$0xff]  ;;  %v61_v48 = vld [vmem:[%s7310_s0 + $0x128] sm:$0xff]  ;;  %v110_v49 = vmul.f32 0.17677669, %v54_v45 }
  0x42   :  { %4451 = vmatpush3.xpose.msk.msra.mxu0 %vm199_vm0, %v168_v10  ;;  %4399 = vmatprep.mubr.msk.f32.mxu0 %vm5211_vm1, %v7317_v1  ;;  %v116_v47 = vmul.f32 0.17677669, %v60_v42  ;;  %v190_v50 = vld [vmem:[%s7311_s1 + $0x1b0] sm:$0xff]  ;;  %v55_v51 = vld [vmem:[%s7310_s0 + $0xf8] sm:$0xff]  ;;  %v117_v53 = vmul.f32 0.17677669, %v61_v48 }
  0x43   :  { %4452 = vmatprep.subr.mxu0 %v7317_v1  ;;  %4432 = vmatmul.mubr.msk.f32.gmra.mxu1 %vm199_vm0, %v103_v11  ;;  %v182_v52 = vld [vmem:[%s7311_s1 + $0x170] sm:$0xff]  ;;  %v111_v55 = vmul.f32 0.17677669, %v55_v51  ;;  %v189_v56 = vld [vmem:[%s7311_s1 + $0x1a8] sm:$0xff]  ;;  %v56_v57 = vld [vmem:[%s7310_s0 + $0x100] sm:$0xff] }
  0x44   :  { %4486 = vmatpush3.xpose.msk.msra.mxu1 %vm199_vm0, %v175_v14  ;;  %4434 = vmatprep.mubr.msk.f32.mxu1 %vm5211_vm1, %v7317_v1  ;;  %v62_v54 = vld [vmem:[%s7310_s0 + $0x130] sm:$0xff]  ;;  %v181_v58 = vld [vmem:[%s7311_s1 + $0x168] sm:$0xff]  ;;  %v63_v60 = vld [vmem:[%s7310_s0 + $0x138] sm:$0xff]  ;;  %v112_v61 = vmul.f32 0.17677669, %v56_v57 }
  0x45   :  { %4400 = vmatmul.mubr.msk.f32.gmra.mxu0 %vm199_vm0, %v97_v13  ;;  %4487 = vmatprep.subr.mxu1 %v7317_v1  ;;  %v118_v59 = vmul.f32 0.17677669, %v62_v54  ;;  %v188_v62 = vld [vmem:[%s7311_s1 + $0x1a0] sm:$0xff]  ;;  %v57_v63 = vld [vmem:[%s7310_s0 + $0x108] sm:$0xff]  ;;  %v119_v2 = vmul.f32 0.17677669, %v63_v60 }
  0x46   :  { %4453 = vmatpush3.xpose.msk.msra.mxu0 %vm199_vm0, %v167_v16  ;;  %4402 = vmatprep.mubr.msk.f32.mxu0 %vm5211_vm1, %v7317_v1  ;;  %v180_v0 = vld [vmem:[%s7311_s1 + $0x160] sm:$0xff]  ;;  %v113_v4 = vmul.f32 0.17677669, %v57_v63  ;;  %v187_v5 = vld [vmem:[%s7311_s1 + $0x198] sm:$0xff]  ;;  %v58_v6 = vld [vmem:[%s7310_s0 + $0x110] sm:$0xff] }
  0x47   :  { %4454 = vmatprep.subr.mxu0 %v7317_v1  ;;  %4435 = vmatmul.mubr.msk.f32.gmra.mxu1 %vm199_vm0, %v104_v17  ;;  %v64_v3 = vld [vmem:[%s7310_s0 + $0x140] sm:$0xff]  ;;  %v179_v7 = vld [vmem:[%s7311_s1 + $0x158] sm:$0xff]  ;;  %v65_v9 = vld [vmem:[%s7310_s0 + $0x148] sm:$0xff]  ;;  %v114_v10 = vmul.f32 0.17677669, %v58_v6 }
  0x48   :  { %4488 = vmatpush3.xpose.msk.msra.mxu1 %vm199_vm0, %v174_v20  ;;  %4437 = vmatprep.mubr.msk.f32.mxu1 %vm5211_vm1, %v7317_v1  ;;  %v120_v8 = vmul.f32 0.17677669, %v64_v3  ;;  %v186_v11 = vld [vmem:[%s7311_s1 + $0x190] sm:$0xff]  ;;  %v121_v14 = vmul.f32 0.17677669, %v65_v9  ;;  %v73_v15 = vld [vmem:[%s7310_s0 + $0x188] sm:$0xff] }
  0x49   :  { %4403 = vmatmul.mubr.msk.f32.gmra.mxu0 %vm199_vm0, %v98_v19  ;;  %4489 = vmatprep.subr.mxu1 %v7317_v1  ;;  %v66_v12 = vld [vmem:[%s7310_s0 + $0x150] sm:$0xff]  ;;  %v1900_v16 = vld [vmem:[%s7313_s3 + $0x18] sm:$0xff]  ;;  %v185_v18 = vld [vmem:[%s7311_s1 + $0x188] sm:$0xff]  ;;  %v129_v20 = vmul.f32 0.17677669, %v73_v15 }
  0x4a   :  { %4455 = vmatpush3.xpose.msk.msra.mxu0 %vm199_vm0, %v166_v22  ;;  %4405 = vmatprep.mubr.msk.f32.mxu0 %vm5211_vm1, %v7317_v1  ;;  %v178_v13 = vld [vmem:[%s7311_s1 + $0x150] sm:$0xff]  ;;  %v122_v17 = vmul.f32 0.17677669, %v66_v12  ;;  %v67_v19 = vld [vmem:[%s7310_s0 + $0x158] sm:$0xff]  ;;  %v68_v24 = vld [vmem:[%s7310_s0 + $0x160] sm:$0xff] }
  0x4b   :  { %4456 = vmatprep.subr.mxu0 %v7317_v1  ;;  %4438 = vmatmul.mubr.msk.f32.gmra.mxu1 %vm199_vm0, %v105_v23  ;;  %v74_v21 = vld [vmem:[%s7310_s0 + $0x190] sm:$0xff]  ;;  %v123_v23 = vmul.f32 0.17677669, %v67_v19  ;;  %v75_v27 = vld [vmem:[%s7310_s0 + $0x198] sm:$0xff]  ;;  %v69_v30 = vld [vmem:[%s7310_s0 + $0x168] sm:$0xff] }
  0x4c   :  { %4490 = vmatpush3.xpose.msk.msra.mxu1 %vm199_vm0, %v173_v26  ;;  %4440 = vmatprep.mubr.msk.f32.mxu1 %vm5211_vm1, %v7317_v1  ;;  %v1899_v22 = vld [vmem:[%s7313_s3 + $0x10] sm:$0xff]  ;;  %v130_v26 = vmul.f32 0.17677669, %v74_v21  ;;  %v125_v33 = vmul.f32 0.17677669, %v69_v30  ;;  %v77_v36 = vld [vmem:[%s7310_s0 + $0x1a8] sm:$0xff] }
  0x4d   :  { %4406 = vmatmul.mubr.msk.f32.gmra.mxu0 %vm199_vm0, %v99_v25  ;;  %4491 = vmatprep.subr.mxu1 %v7317_v1  ;;  %v1898_v25 = vld [vmem:[%s7313_s3 + $0x8] sm:$0xff]  ;;  %v133_v39 = vmul.f32 0.17677669, %v77_v36  ;;  %v72_v42 = vld [vmem:[%s7310_s0 + $0x180] sm:$0xff]  ;;  %v1848_v54 = vld [vmem:[%s7312_s2 + $0x38] sm:$0xff] }
  0x4e   :  { %4457 = vmatpush3.xpose.msk.msra.mxu0 %vm199_vm0, %v165_v28  ;;  %4408 = vmatprep.mubr.msk.f32.mxu0 %vm5211_vm1, %v7317_v1  ;;  %v1897_v28 = vld [vmem:[%s7313_s3] sm:$0xff]  ;;  %v128_v45 = vmul.f32 0.17677669, %v72_v42  ;;  %v1842_v48 = vld [vmem:[%s7312_s2 + $0x8] sm:$0xff]  ;;  %v1851_v57 = vld [vmem:[%s7312_s2 + $0x50] sm:$0xff] }
  0x4f   :  { %4458 = vmatprep.subr.mxu0 %v7317_v1  ;;  %4441 = vmatmul.mubr.msk.f32.gmra.mxu1 %vm199_vm0, %v106_v29  ;;  %v124_v29 = vmul.f32 0.17677669, %v68_v24  ;;  %v1845_v51 = vld [vmem:[%s7312_s2 + $0x20] sm:$0xff]  ;;  %v1854_v60 = vld [vmem:[%s7312_s2 + $0x68] sm:$0xff]  ;;  %v1860_v3 = vld [vmem:[%s7312_s2 + $0x98] sm:$0xff] }
  0x50   :  { %4492 = vmatpush3.xpose.msk.msra.mxu1 %vm199_vm0, %v172_v32  ;;  %4443 = vmatprep.mubr.msk.f32.mxu1 %vm5211_vm1, %v7317_v1  ;;  %v76_v32 = vld [vmem:[%s7310_s0 + $0x1a0] sm:$0xff]  ;;  %v1863_v6 = vld [vmem:[%s7312_s2 + $0xb0] sm:$0xff]  ;;  %v1866_v9 = vld [vmem:[%s7312_s2 + $0xc8] sm:$0xff] }
  0x51   :  { %4409 = vmatmul.mubr.msk.f32.gmra.mxu0 %vm199_vm0, %v100_v31  ;;  %4493 = vmatprep.subr.mxu1 %v7317_v1  ;;  %v131_v31 = vmul.f32 0.17677669, %v75_v27  ;;  %v1857_v63 = vld [vmem:[%s7312_s2 + $0x80] sm:$0xff]  ;;  %v1872_v15 = vld [vmem:[%s7312_s2 + $0xf8] sm:$0xff]  ;;  %v1878_v21 = vld [vmem:[%s7312_s2 + $0x128] sm:$0xff] }
  0x52   :  { %4459 = vmatpush3.xpose.msk.msra.mxu0 %vm199_vm0, %v164_v34  ;;  %4460 = vmatprep.mubr.msk.f32.mxu0 %vm5211_vm1, %v7317_v1  ;;  %v70_v34 = vld [vmem:[%s7310_s0 + $0x170] sm:$0xff]  ;;  %v1869_v12 = vld [vmem:[%s7312_s2 + $0xe0] sm:$0xff]  ;;  %v1876_v19 = vld [vmem:[%s7312_s2 + $0x118] sm:$0xff] }
  0x53   :  { %4516 = vmatprep.subr.mxu0 %v7317_v1  ;;  %4444 = vmatmul.mubr.msk.f32.gmra.mxu1 %vm199_vm0, %v107_v35  ;;  %v132_v35 = vmul.f32 0.17677669, %v76_v32  ;;  %v1881_v24 = vld [vmem:[%s7312_s2 + $0x140] sm:$0xff]  ;;  %v1883_v27 = vld [vmem:[%s7312_s2 + $0x150] sm:$0xff] }
  0x54   :  { %4494 = vmatpush3.xpose.msk.msra.mxu1 %vm199_vm0, %v171_v38  ;;  %4495 = vmatprep.mubr.msk.f32.mxu1 %vm5211_vm1, %v7317_v1  ;;  %v71_v38 = vld [vmem:[%s7310_s0 + $0x178] sm:$0xff]  ;;  %v6088_v42 = vld [vmem:[%s7315_s5 + $0x10] sm:$0xff] }
  0x55   :  { %4461 = vmatmul.mubr.msk.f32.vlgmr.msra.gmra.mxu0 %vm199_vm0, %v108_v37  ;;  %4551 = vmatprep.subr.mxu1 %v7317_v1  ;;  %v126_v37 = vmul.f32 0.17677669, %v70_v34 }
  0x56   :  { %4517 = vmatpush3.xpose.msk.msra.mxu0 %vm199_vm0, %v184_v40  ;;  %4463 = vmatprep.mubr.msk.f32.mxu0 %vm5211_vm1, %v7317_v1  ;;  %v78_v40 = vld [vmem:[%s7310_s0 + $0x1b0] sm:$0xff] }
  0x57   :  { %4518 = vmatprep.subr.mxu0 %v7317_v1  ;;  %4496 = vmatmul.mubr.msk.f32.vlgmr.msra.gmra.mxu1 %vm199_vm0, %v115_v41  ;;  %v127_v41 = vmul.f32 0.17677669, %v71_v38 }
  0x58   :  { %4552 = vmatpush3.xpose.msk.msra.mxu1 %vm199_vm0, %v191_v44  ;;  %4498 = vmatprep.mubr.msk.f32.mxu1 %vm5211_vm1, %v7317_v1  ;;  %v79_v44 = vld [vmem:[%s7310_s0 + $0x1b8] sm:$0xff] }
  0x59   :  { %4464 = vmatmul.mubr.msk.f32.gmra.mxu0 %vm199_vm0, %v109_v43  ;;  %4553 = vmatprep.subr.mxu1 %v7317_v1  ;;  %v134_v43 = vmul.f32 0.17677669, %v78_v40  ;;  %v1886_v40 = vld [vmem:[%s7312_s2 + $0x168] sm:$0xff] }
  0x5a   :  { %4519 = vmatpush3.xpose.msk.msra.mxu0 %vm199_vm0, %v183_v46  ;;  %4466 = vmatprep.mubr.msk.f32.mxu0 %vm5211_vm1, %v7317_v1  ;;  %v1841_v46 = vld [vmem:[%s7312_s2] sm:$0xff] }
  0x5b   :  { %4520 = vmatprep.subr.mxu0 %v7317_v1  ;;  %4499 = vmatmul.mubr.msk.f32.gmra.mxu1 %vm199_vm0, %v116_v47  ;;  %v135_v47 = vmul.f32 0.17677669, %v79_v44  ;;  %v1887_v44 = vld [vmem:[%s7312_s2 + $0x170] sm:$0xff] }
  0x5c   :  { %4554 = vmatpush3.xpose.msk.msra.mxu1 %vm199_vm0, %v190_v50  ;;  %4501 = vmatprep.mubr.msk.f32.mxu1 %vm5211_vm1, %v7317_v1  ;;  %v1844_v50 = vld [vmem:[%s7312_s2 + $0x18] sm:$0xff] }
  0x5d   :  { %4467 = vmatmul.mubr.msk.f32.gmra.mxu0 %vm199_vm0, %v110_v49  ;;  %4555 = vmatprep.subr.mxu1 %v7317_v1  ;;  %v1843_v49 = vld [vmem:[%s7312_s2 + $0x10] sm:$0xff] }
  0x5e   :  { %4521 = vmatpush3.xpose.msk.msra.mxu0 %vm199_vm0, %v182_v52  ;;  %4469 = vmatprep.mubr.msk.f32.mxu0 %vm5211_vm1, %v7317_v1  ;;  %v1846_v52 = vld [vmem:[%s7312_s2 + $0x28] sm:$0xff] }
  0x5f   :  { %4522 = vmatprep.subr.mxu0 %v7317_v1  ;;  %4502 = vmatmul.mubr.msk.f32.gmra.mxu1 %vm199_vm0, %v117_v53  ;;  %v1847_v53 = vld [vmem:[%s7312_s2 + $0x30] sm:$0xff] }
  0x60   :  { %4556 = vmatpush3.xpose.msk.msra.mxu1 %vm199_vm0, %v189_v56  ;;  %4504 = vmatprep.mubr.msk.f32.mxu1 %vm5211_vm1, %v7317_v1  ;;  %v1850_v56 = vld [vmem:[%s7312_s2 + $0x48] sm:$0xff] }
  0x61   :  { %4470 = vmatmul.mubr.msk.f32.gmra.mxu0 %vm199_vm0, %v111_v55  ;;  %4557 = vmatprep.subr.mxu1 %v7317_v1  ;;  %v1849_v55 = vld [vmem:[%s7312_s2 + $0x40] sm:$0xff] }
  0x62   :  { %4523 = vmatpush3.xpose.msk.msra.mxu0 %vm199_vm0, %v181_v58  ;;  %4472 = vmatprep.mubr.msk.f32.mxu0 %vm5211_vm1, %v7317_v1  ;;  %v1852_v58 = vld [vmem:[%s7312_s2 + $0x58] sm:$0xff] }
  0x63   :  { %4524 = vmatprep.subr.mxu0 %v7317_v1  ;;  %4505 = vmatmul.mubr.msk.f32.gmra.mxu1 %vm199_vm0, %v118_v59  ;;  %v1853_v59 = vld [vmem:[%s7312_s2 + $0x60] sm:$0xff] }
  0x64   :  { %4558 = vmatpush3.xpose.msk.msra.mxu1 %vm199_vm0, %v188_v62  ;;  %4507 = vmatprep.mubr.msk.f32.mxu1 %vm5211_vm1, %v7317_v1  ;;  %v1856_v62 = vld [vmem:[%s7312_s2 + $0x78] sm:$0xff] }
  0x65   :  { %4473 = vmatmul.mubr.msk.f32.gmra.mxu0 %vm199_vm0, %v112_v61  ;;  %4559 = vmatprep.subr.mxu1 %v7317_v1  ;;  %v1855_v61 = vld [vmem:[%s7312_s2 + $0x70] sm:$0xff] }
  0x66   :  { %4525 = vmatpush3.xpose.msk.msra.mxu0 %vm199_vm0, %v180_v0  ;;  %4475 = vmatprep.mubr.msk.f32.mxu0 %vm5211_vm1, %v7317_v1  ;;  %v1858_v0 = vld [vmem:[%s7312_s2 + $0x88] sm:$0xff] }
  0x67   :  { %4526 = vmatprep.subr.mxu0 %v7317_v1  ;;  %4508 = vmatmul.mubr.msk.f32.gmra.mxu1 %vm199_vm0, %v119_v2  ;;  %v1859_v2 = vld [vmem:[%s7312_s2 + $0x90] sm:$0xff] }
  0x68   :  { %4560 = vmatpush3.xpose.msk.msra.mxu1 %vm199_vm0, %v187_v5  ;;  %4510 = vmatprep.mubr.msk.f32.mxu1 %vm5211_vm1, %v7317_v1  ;;  %v1862_v5 = vld [vmem:[%s7312_s2 + $0xa8] sm:$0xff] }
  0x69   :  { %4476 = vmatmul.mubr.msk.f32.gmra.mxu0 %vm199_vm0, %v113_v4  ;;  %4561 = vmatprep.subr.mxu1 %v7317_v1  ;;  %v1861_v4 = vld [vmem:[%s7312_s2 + $0xa0] sm:$0xff] }
  0x6a   :  { %4527 = vmatpush3.xpose.msk.msra.mxu0 %vm199_vm0, %v179_v7  ;;  %4478 = vmatprep.mubr.msk.f32.mxu0 %vm5211_vm1, %v7317_v1  ;;  %v1864_v7 = vld [vmem:[%s7312_s2 + $0xb8] sm:$0xff] }
  0x6b   :  { %4528 = vmatprep.subr.mxu0 %v7317_v1  ;;  %4511 = vmatmul.mubr.msk.f32.gmra.mxu1 %vm199_vm0, %v120_v8  ;;  %v1865_v8 = vld [vmem:[%s7312_s2 + $0xc0] sm:$0xff] }
  0x6c   :  { %4562 = vmatpush3.xpose.msk.msra.mxu1 %vm199_vm0, %v186_v11  ;;  %4513 = vmatprep.mubr.msk.f32.mxu1 %vm5211_vm1, %v7317_v1  ;;  %v1868_v11 = vld [vmem:[%s7312_s2 + $0xd8] sm:$0xff] }
  0x6d   :  { %4479 = vmatmul.mubr.msk.f32.gmra.mxu0 %vm199_vm0, %v114_v10  ;;  %4563 = vmatprep.subr.mxu1 %v7317_v1  ;;  %v1867_v10 = vld [vmem:[%s7312_s2 + $0xd0] sm:$0xff] }
  0x6e   :  { %4529 = vmatpush3.xpose.msk.msra.mxu0 %vm199_vm0, %v178_v13  ;;  %4530 = vmatprep.mubr.msk.f32.mxu0 %vm5211_vm1, %v7317_v1  ;;  %v1870_v13 = vld [vmem:[%s7312_s2 + $0xe8] sm:$0xff] }
  0x6f   :  { %4514 = vmatmul.mubr.msk.f32.gmra.mxu1 %vm199_vm0, %v121_v14  ;;  %4586 = vmatprep.subr.mxu0 %v1900_v16  ;;  %v1871_v14 = vld [vmem:[%s7312_s2 + $0xf0] sm:$0xff] }
  0x70   :  { %4564 = vmatpush3.xpose.msk.msra.mxu1 %vm199_vm0, %v185_v18  ;;  %4565 = vmatprep.mubr.msk.f32.mxu1 %vm5211_vm1, %v7317_v1  ;;  %v1875_v18 = vld [vmem:[%s7312_s2 + $0x110] sm:$0xff] }
  0x71   :  { %4531 = vmatmul.mubr.msk.f32.vlgmr.msra.gmra.mxu0 %vm199_vm0, %v122_v17  ;;  %4678 = vmatprep.subr.mxu1 %v7317_v1  ;;  %v1874_v17 = vld [vmem:[%s7312_s2 + $0x108] sm:$0xff] }
  0x72   :  { %4533 = vmatprep.mubr.msk.f32.mxu0 %vm5211_vm1, %v7317_v1  ;;  %4587 = vmatpush3.msra.mxu0 %v1900_v16  ;;  %v1873_v16 = vld [vmem:[%s7312_s2 + $0x100] sm:$0xff] }
  0x73   :  { %4566 = vmatmul.mubr.msk.f32.vlgmr.msra.gmra.mxu1 %vm199_vm0, %v129_v20  ;;  %4588 = vmatprep.subr.mxu0 %v1899_v22  ;;  %v1877_v20 = vld [vmem:[%s7312_s2 + $0x120] sm:$0xff] }
  0x74   :  { %4568 = vmatprep.mubr.msk.f32.mxu1 %vm5211_vm1, %v7317_v1  ;;  %4589 = vmatpush3.msra.mxu0 %v1899_v22  ;;  %v1879_v22 = vld [vmem:[%s7312_s2 + $0x130] sm:$0xff] }
  0x75   :  { %4534 = vmatmul.mubr.msk.f32.gmra.mxu0 %vm199_vm0, %v123_v23  ;;  %4590 = vmatprep.subr.mxu0 %v1898_v25  ;;  %v1880_v23 = vld [vmem:[%s7312_s2 + $0x138] sm:$0xff] }
  0x76   :  { %4536 = vmatprep.mubr.msk.f32.mxu0 %vm5211_vm1, %v7317_v1  ;;  %4591 = vmatpush3.msra.mxu0 %v1898_v25  ;;  %v1882_v25 = vld [vmem:[%s7312_s2 + $0x148] sm:$0xff] }
  0x77   :  { %4569 = vmatmul.mubr.msk.f32.gmra.mxu1 %vm199_vm0, %v130_v26  ;;  %4592 = vmatprep.subr.mxu0 %v1897_v28  ;;  %v6052_v26 = vld [vmem:[%s7315_s5] sm:$0xff] }
  0x78   :  { %4571 = vmatprep.mubr.msk.f32.mxu1 %vm5211_vm1, %v7317_v1  ;;  %4593 = vmatpush3.msra.mxu0 %v1897_v28 }
  0x79   :  { %4537 = vmatmul.mubr.msk.f32.gmra.mxu0 %vm199_vm0, %v124_v29  ;;  %4818 = vmatprep.subr.mxu0 %v7317_v1 }
  0x7a   :  { %4539 = vmatprep.mubr.msk.f32.mxu0 %vm5211_vm1, %v7317_v1 }
  0x7b   :  { %4572 = vmatmul.mubr.msk.f32.gmra.mxu1 %vm199_vm0, %v131_v31  ;;  %v1884_v31 = vld [vmem:[%s7312_s2 + $0x158] sm:$0xff] }
  0x7c   :  { %4574 = vmatprep.mubr.msk.f32.mxu1 %vm5211_vm1, %v7317_v1 }
  0x7d   :  { %4540 = vmatmul.mubr.msk.f32.gmra.mxu0 %vm199_vm0, %v125_v33  ;;  %v6068_v33 = vld [vmem:[%s7315_s5 + $0x8] sm:$0xff] }
  0x7e   :  { %4542 = vmatprep.mubr.msk.f32.mxu0 %vm5211_vm1, %v7317_v1 }
  0x7f   :  { %4575 = vmatmul.mubr.msk.f32.gmra.mxu1 %vm199_vm0, %v132_v35  ;;  %v1885_v35 = vld [vmem:[%s7312_s2 + $0x160] sm:$0xff] }
  0x80   :  { %4577 = vmatprep.mubr.msk.f32.mxu1 %vm5211_vm1, %v7317_v1 }
  0x81   :  { %4543 = vmatmul.mubr.msk.f32.gmra.mxu0 %vm199_vm0, %v126_v37 }
  0x82   :  { %4545 = vmatprep.mubr.msk.f32.mxu0 %vm5211_vm1, %v7317_v1 }
  0x83   :  { %4578 = vmatmul.mubr.msk.f32.gmra.mxu1 %vm199_vm0, %v133_v39 }
  0x84   :  { %4580 = vmatprep.mubr.msk.f32.mxu1 %vm5211_vm1, %v7317_v1 }
  0x85   :  { %4546 = vmatmul.mubr.msk.f32.gmra.mxu0 %vm199_vm0, %v127_v41 }
  0x86   :  { %4548 = vmatprep.mubr.msk.f32.mxu0 %vm5211_vm1, %v7317_v1 }
  0x87   :  { %4581 = vmatmul.mubr.msk.f32.gmra.mxu1 %vm199_vm0, %v134_v43 }
  0x88   :  { %4583 = vmatprep.mubr.msk.f32.mxu1 %vm5211_vm1, %v7317_v1 }
  0x89   :  { %4549 = vmatmul.mubr.msk.f32.gmra.mxu0 %vm199_vm0, %v128_v45 }
  0x8a   :  { %4594 = vmatprep.mubr.msk.f32.mxu0 %vm199_vm0, %v1841_v46 }
  0x8b   :  { %4584 = vmatmul.mubr.msk.f32.gmra.mxu1 %vm199_vm0, %v135_v47 }
  0x8c   :  { %4692 = vmatprep.mubr.msk.f32.mxu1 %vm5211_vm1, %v7317_v1 }
  0x8d   :  { %4595 = vmatmul.mubr.msk.f32.vlgmr.msra.gmra.mxu0 %vm199_vm0, %v1842_v48 }
  0x8e   :  { %4597 = vmatprep.mubr.msk.f32.mxu0 %vm199_vm0, %v1843_v49  ;;  %v1888_v49 = vld [vmem:[%s7312_s2 + $0x178] sm:$0xff] }
  0x91   :  { %4598 = vmatmul.mubr.msk.f32.gmra.mxu0 %vm199_vm0, %v1844_v50 }
  0x92   :  { %4600 = vmatprep.mubr.msk.f32.mxu0 %vm199_vm0, %v1845_v51  ;;  %v6106_v51 = vld [vmem:[%s7315_s5 + $0x18] sm:$0xff] }
  0x95   :  { %4601 = vmatmul.mubr.msk.f32.gmra.mxu0 %vm199_vm0, %v1846_v52 }
  0x96   :  { %4603 = vmatprep.mubr.msk.f32.mxu0 %vm199_vm0, %v1847_v53  ;;  %v1889_v53 = vld [vmem:[%s7312_s2 + $0x180] sm:$0xff] }
  0x99   :  { %4604 = vmatmul.mubr.msk.f32.gmra.mxu0 %vm199_vm0, %v1848_v54 }
  0x9a   :  { %4606 = vmatprep.mubr.msk.f32.mxu0 %vm199_vm0, %v1849_v55 }
  0x9d   :  { %4607 = vmatmul.mubr.msk.f32.gmra.mxu0 %vm199_vm0, %v1850_v56 }
  0x9e   :  { %4609 = vmatprep.mubr.msk.f32.mxu0 %vm199_vm0, %v1851_v57 }
  0xa1   :  { %4610 = vmatmul.mubr.msk.f32.gmra.mxu0 %vm199_vm0, %v1852_v58  ;;  %v1890_v58 = vld [vmem:[%s7312_s2 + $0x188] sm:$0xff] }
  0xa2   :  { %4612 = vmatprep.mubr.msk.f32.mxu0 %vm199_vm0, %v1853_v59 }
  0xa5   :  { %4613 = vmatmul.mubr.msk.f32.gmra.mxu0 %vm199_vm0, %v1854_v60  ;;  %v6124_v60 = vld [vmem:[%s7315_s5 + $0x20] sm:$0xff] }
  0xa6   :  { %4615 = vmatprep.mubr.msk.f32.mxu0 %vm199_vm0, %v1855_v61 }
  0xa9   :  { %4616 = vmatmul.mubr.msk.f32.gmra.mxu0 %vm199_vm0, %v1856_v62  ;;  %v1891_v62 = vld [vmem:[%s7312_s2 + $0x190] sm:$0xff] }
  0xaa   :  { %4618 = vmatprep.mubr.msk.f32.mxu0 %vm199_vm0, %v1857_v63 }
  0xad   :  { %4619 = vmatmul.mubr.msk.f32.gmra.mxu0 %vm199_vm0, %v1858_v0 }
  0xae   :  { %4621 = vmatprep.mubr.msk.f32.mxu0 %vm199_vm0, %v1859_v2 }
  0xb1   :  { %4622 = vmatmul.mubr.msk.f32.gmra.mxu0 %vm199_vm0, %v1860_v3 }
  0xb2   :  { %4624 = vmatprep.mubr.msk.f32.mxu0 %vm199_vm0, %v1861_v4  ;;  %v1892_v4 = vld [vmem:[%s7312_s2 + $0x198] sm:$0xff] }
  0xb5   :  { %4625 = vmatmul.mubr.msk.f32.gmra.mxu0 %vm199_vm0, %v1862_v5 }
  0xb6   :  { %4627 = vmatprep.mubr.msk.f32.mxu0 %vm199_vm0, %v1863_v6  ;;  %v6142_v6 = vld [vmem:[%s7315_s5 + $0x28] sm:$0xff] }
  0xb9   :  { %4628 = vmatmul.mubr.msk.f32.gmra.mxu0 %vm199_vm0, %v1864_v7 }
  0xba   :  { %4630 = vmatprep.mubr.msk.f32.mxu0 %vm199_vm0, %v1865_v8  ;;  %v1893_v8 = vld [vmem:[%s7312_s2 + $0x1a0] sm:$0xff] }
  0xbd   :  { %4631 = vmatmul.mubr.msk.f32.gmra.mxu0 %vm199_vm0, %v1866_v9 }
  0xbe   :  { %4633 = vmatprep.mubr.msk.f32.mxu0 %vm199_vm0, %v1867_v10 }
  0xc1   :  { %4634 = vmatmul.mubr.msk.f32.gmra.mxu0 %vm199_vm0, %v1868_v11 }
  0xc2   :  { %4636 = vmatprep.mubr.msk.f32.mxu0 %vm199_vm0, %v1869_v12 }
  0xc5   :  { %4637 = vmatmul.mubr.msk.f32.gmra.mxu0 %vm199_vm0, %v1870_v13 }
  0xc6   :  { %4639 = vmatprep.mubr.msk.f32.mxu0 %vm199_vm0, %v1871_v14  ;;  %v1894_v14 = vld [vmem:[%s7312_s2 + $0x1a8] sm:$0xff] }
  0xc9   :  { %4640 = vmatmul.mubr.msk.f32.gmra.mxu0 %vm199_vm0, %v1872_v15 }
  0xca   :  { %4642 = vmatprep.mubr.msk.f32.mxu0 %vm199_vm0, %v1873_v16  ;;  %v6163_v16 = vld [vmem:[%s7315_s5 + $0x30] sm:$0xff] }
  0xcd   :  { %4643 = vmatmul.mubr.msk.f32.gmra.mxu0 %vm199_vm0, %v1874_v17 }
  0xce   :  { %4645 = vmatprep.mubr.msk.f32.mxu0 %vm199_vm0, %v1875_v18  ;;  %v1895_v18 = vld [vmem:[%s7312_s2 + $0x1b0] sm:$0xff] }
  0xd1   :  { %4646 = vmatmul.mubr.msk.f32.gmra.mxu0 %vm199_vm0, %v1876_v19 }
  0xd2   :  { %4648 = vmatprep.mubr.msk.f32.mxu0 %vm199_vm0, %v1877_v20 }
  0xd5   :  { %4649 = vmatmul.mubr.msk.f32.gmra.mxu0 %vm199_vm0, %v1878_v21 }
  0xd6   :  { %4651 = vmatprep.mubr.msk.f32.mxu0 %vm199_vm0, %v1879_v22 }
  0xd9   :  { %4652 = vmatmul.mubr.msk.f32.gmra.mxu0 %vm199_vm0, %v1880_v23 }
  0xda   :  { %4654 = vmatprep.mubr.msk.f32.mxu0 %vm199_vm0, %v1881_v24 }
  0xdd   :  { %v308_v28 = vpop.f32.mrf.mxu0  ;;  %v450_v29 = vpop.f32.mrf.mxu1  ;;  %4655 = vmatmul.mubr.msk.f32.gmra.mxu0 %vm199_vm0, %v1882_v25 }
  0xde   :  { %v6059_v30 = vadd.f32 %v308_v28, %v6052_v26  ;;  %4657 = vmatprep.mubr.msk.f32.mxu0 %vm199_vm0, %v1883_v27  ;;  %v6151_v12 = vadd.f32 %v450_v29, %v6052_v26  ;;  %v1896_v29 = vld [vmem:[%s7312_s2 + $0x1b8] sm:$0xff] }
  0xdf   :  { %v4322_v32 = vpop.f32.mrf.mxu0  ;;  %v4357_v34 = vpop.f32.mrf.mxu1 }
  0xe0   :  { %v1337_v36 = vsel %vm1336_vm2, %v6059_v30, -inf  ;;  %v1358_v25 = vsel %vm1336_vm2, %v6151_v12, -inf }
  0xe1   :  { %1338 = vmax.xlane.f32.xlu0 %v1337_v36  ;;  %v313_v37 = vpop.f32.mrf.mxu0  ;;  %v6075_v38 = vpop.f32.mrf.mxu1  ;;  %4658 = vmatmul.mubr.msk.f32.gmra.mxu0 %vm199_vm0, %v1884_v31 }
  0xe2   :  { %v6079_v39 = vadd.f32 %v313_v37, %v6068_v33  ;;  %4660 = vmatprep.mubr.msk.f32.mxu0 %vm199_vm0, %v1885_v35  ;;  %v6173_v22 = vadd.f32 %v6075_v38, %v6068_v33 }
  0xe3   :  { %v4325_v41 = vpop.f32.mrf.mxu0  ;;  %v4360_v43 = vpop.f32.mrf.mxu1 }
  0xe4   :  { %v1340_v45 = vsel %vm1336_vm2, %v6079_v39, -inf  ;;  %v1361_v37 = vsel %vm1336_vm2, %v6173_v22, -inf }
  0xe5   :  { %1341 = vmax.xlane.f32.xlu0 %v1340_v45  ;;  %v318_v46 = vpop.f32.mrf.mxu0  ;;  %v460_v47 = vpop.f32.mrf.mxu1  ;;  %4661 = vmatmul.mubr.msk.f32.gmra.mxu0 %vm199_vm0, %v1886_v40 }
  0xe6   :  { %v6097_v48 = vadd.f32 %v318_v46, %v6088_v42  ;;  %4663 = vmatprep.mubr.msk.f32.mxu0 %vm199_vm0, %v1887_v44  ;;  %v6176_v23 = vadd.f32 %v460_v47, %v6088_v42 }
  0xe7   :  { %v4328_v50 = vpop.f32.mrf.mxu0  ;;  %v4363_v52 = vpop.f32.mrf.mxu1 }
  0xe8   :  { %v1343_v54 = vsel %vm1336_vm2, %v6097_v48, -inf  ;;  %v1364_v36 = vsel %vm1336_vm2, %v6176_v23, -inf }
  0xe9   :  { %1344 = vmax.xlane.f32.xlu1 %v1343_v54  ;;  %v323_v55 = vpop.f32.mrf.mxu0  ;;  %v465_v56 = vpop.f32.mrf.mxu1  ;;  %4664 = vmatmul.mubr.msk.f32.gmra.mxu0 %vm199_vm0, %v1888_v49 }
  0xea   :  { %v6115_v57 = vadd.f32 %v323_v55, %v6106_v51  ;;  %4666 = vmatprep.mubr.msk.f32.mxu0 %vm199_vm0, %v1889_v53  ;;  %v6190_v34 = vadd.f32 %v465_v56, %v6106_v51 }
  0xeb   :  { %v4331_v59 = vpop.f32.mrf.mxu0  ;;  %v4366_v61 = vpop.f32.mrf.mxu1 }
  0xec   :  { %v1346_v63 = vsel %vm1336_vm2, %v6115_v57, -inf  ;;  %v1367_v47 = vsel %vm1336_vm2, %v6190_v34, -inf }
  0xed   :  { %1347 = vmax.xlane.f32.xlu1 %v1346_v63  ;;  %v328_v0 = vpop.f32.mrf.mxu0  ;;  %v470_v2 = vpop.f32.mrf.mxu1  ;;  %4667 = vmatmul.mubr.msk.f32.gmra.mxu0 %vm199_vm0, %v1890_v58 }
  0xee   :  { %v6133_v3 = vadd.f32 %v328_v0, %v6124_v60  ;;  %4669 = vmatprep.mubr.msk.f32.mxu0 %vm199_vm0, %v1891_v62  ;;  %v6193_v35 = vadd.f32 %v470_v2, %v6124_v60 }
  0xef   :  { %v4334_v5 = vpop.f32.mrf.mxu0  ;;  %v4369_v7 = vpop.f32.mrf.mxu1 }
  0xf0   :  { %v1349_v9 = vsel %vm1336_vm2, %v6133_v3, -inf  ;;  %v1370_v46 = vsel %vm1336_vm2, %v6193_v35, -inf }
  0xf1   :  { %1350 = vmax.xlane.f32.xlu0 %v1349_v9  ;;  %v333_v10 = vpop.f32.mrf.mxu0  ;;  %v475_v11 = vpop.f32.mrf.mxu1  ;;  %4670 = vmatmul.mubr.msk.f32.gmra.mxu0 %vm199_vm0, %v1892_v4 }
  0xf2   :  { %v6154_v13 = vadd.f32 %v333_v10, %v6142_v6  ;;  %4672 = vmatprep.mubr.msk.f32.mxu0 %vm199_vm0, %v1893_v8  ;;  %v6203_v44 = vadd.f32 %v475_v11, %v6142_v6 }
  0xf3   :  { %v4337_v15 = vpop.f32.mrf.mxu0  ;;  %v4372_v17 = vpop.f32.mrf.mxu1 }
  0xf4   :  { %v1352_v19 = vsel %vm1336_vm2, %v6154_v13, -inf  ;;  %v1373_v58 = vsel %vm1336_vm2, %v6203_v44, -inf }
  0xf5   :  { %1353 = vmax.xlane.f32.xlu1 %v1352_v19  ;;  %v338_v20 = vpop.f32.mrf.mxu0  ;;  %v480_v21 = vpop.f32.mrf.mxu1  ;;  %4673 = vmatmul.mubr.msk.f32.gmra.mxu0 %vm199_vm0, %v1894_v14 }
  0xf6   :  { %v6179_v24 = vadd.f32 %v338_v20, %v6163_v16  ;;  %4675 = vmatprep.mubr.msk.f32.mxu0 %vm199_vm0, %v1895_v18  ;;  %v6206_v45 = vadd.f32 %v480_v21, %v6163_v16 }
  0xf7   :  { %v4340_v27 = vpop.f32.mrf.mxu0  ;;  %v4375_v28 = vpop.f32.mrf.mxu1 }
  0xf8   :  { %v1355_v31 = vsel %vm1336_vm2, %v6179_v24, -inf  ;;  %v1376_v56 = vsel %vm1336_vm2, %v6206_v45, -inf }
  0xf9   :  { %1359 = vmax.xlane.f32.xlu1 %v1358_v25  ;;  %1356 = vmax.xlane.f32.xlu0 %v1355_v31  ;;  %v592_v32 = vpop.f32.mrf.mxu0 }
  0xfa   :  { %4676 = vmatmul.mubr.msk.f32.gmra.mxu0 %vm199_vm0, %v1896_v29  ;;  %v6213_v54 = vadd.f32 %v592_v32, %v6052_v26 }
  0xfb   :  { %v4392_v38 = vpop.f32.mrf.mxu0  ;;  %v734_v40 = vpop.f32.mrf.mxu1  ;;  %4832 = vmatprep.mubr.msk.f32.mxu0 %vm5211_vm1, %v7317_v1 }
  0xfc   :  { %v1379_v4 = vsel %vm1336_vm2, %v6213_v54, -inf  ;;  %v6240_v21 = vadd.f32 %v734_v40, %v6052_v26 }
  0xfd   :  { %1365 = vmax.xlane.f32.xlu1 %v1364_v36  ;;  %1362 = vmax.xlane.f32.xlu0 %v1361_v37  ;;  %v597_v41 = vpop.f32.mrf.mxu0  ;;  %v4427_v43 = vpop.f32.mrf.mxu1 }
  0xfe   :  { %v6216_v55 = vadd.f32 %v597_v41, %v6068_v33  ;;  %v1400_v41 = vsel %vm1336_vm2, %v6240_v21, -inf }
  0xff   :  { %v4395_v49 = vpop.f32.mrf.mxu0  ;;  %v739_v50 = vpop.f32.mrf.mxu1 }
 0x100   :  { %v1382_v5 = vsel %vm1336_vm2, %v6216_v55, -inf  ;;  %v6250_v37 = vadd.f32 %v739_v50, %v6068_v33 }
 0x101   :  { %1371 = vmax.xlane.f32.xlu1 %v1370_v46  ;;  %1368 = vmax.xlane.f32.xlu0 %v1367_v47  ;;  %v602_v52 = vpop.f32.mrf.mxu0  ;;  %v4430_v53 = vpop.f32.mrf.mxu1 }
 0x102   :  { %v6223_v0 = vadd.f32 %v602_v52, %v6088_v42 }
 0x103   :  { %v4398_v59 = vpop.f32.mrf.mxu0  ;;  %v744_v61 = vpop.f32.mrf.mxu1 }
 0x104   :  { %v1385_v14 = vsel %vm1336_vm2, %v6223_v0, -inf  ;;  %v6253_v38 = vadd.f32 %v744_v61, %v6088_v42 }
 0x105   :  { %1377 = vmax.xlane.f32.xlu1 %v1376_v56  ;;  %1374 = vmax.xlane.f32.xlu0 %v1373_v58  ;;  %v607_v62 = vpop.f32.mrf.mxu0  ;;  %v4433_v63 = vpop.f32.mrf.mxu1  ;;  %v1403_v58 = vsel %vm1336_vm2, %v6250_v37, -inf }
 0x106   :  { %v6226_v2 = vadd.f32 %v607_v62, %v6106_v51  ;;  %v1406_v56 = vsel %vm1336_vm2, %v6253_v38, -inf }
 0x107   :  { %v4401_v7 = vpop.f32.mrf.mxu0  ;;  %v749_v8 = vpop.f32.mrf.mxu1 }
 0x108   :  { %v1388_v15 = vsel %vm1336_vm2, %v6226_v2, -inf  ;;  %v6263_v50 = vadd.f32 %v749_v8, %v6106_v51 }
 0x109   :  { %1380 = vmax.xlane.f32.xlu0 %v1379_v4  ;;  %1383 = vmax.xlane.f32.xlu1 %v1382_v5  ;;  %v612_v9 = vpop.f32.mrf.mxu0  ;;  %v4436_v10 = vpop.f32.mrf.mxu1 }
 0x10a   :  { %v6233_v11 = vadd.f32 %v612_v9, %v6124_v60  ;;  %v1409_v8 = vsel %vm1336_vm2, %v6263_v50, -inf }
 0x10b   :  { %v4404_v17 = vpop.f32.mrf.mxu0  ;;  %v754_v18 = vpop.f32.mrf.mxu1 }
 0x10c   :  { %v1391_v27 = vsel %vm1336_vm2, %v6233_v11, -inf  ;;  %v6266_v53 = vadd.f32 %v754_v18, %v6124_v60 }
 0x10d   :  { %1386 = vmax.xlane.f32.xlu0 %v1385_v14  ;;  %1389 = vmax.xlane.f32.xlu1 %v1388_v15  ;;  %v617_v19 = vpop.f32.mrf.mxu0  ;;  %v4439_v20 = vpop.f32.mrf.mxu1 }
 0x10e   :  { %v6243_v25 = vadd.f32 %v617_v19, %v6142_v6  ;;  %v1412_v7 = vsel %vm1336_vm2, %v6266_v53, -inf }
 0x10f   :  { %v4407_v28 = vpop.f32.mrf.mxu0  ;;  %v759_v29 = vpop.f32.mrf.mxu1 }
 0x110   :  { %v1394_v31 = vsel %vm1336_vm2, %v6243_v25, -inf  ;;  %v6273_v4 = vadd.f32 %v759_v29, %v6142_v6 }
 0x111   :  { %1392 = vmax.xlane.f32.xlu0 %v1391_v27  ;;  %1395 = vmax.xlane.f32.xlu1 %v1394_v31  ;;  %v622_v32 = vpop.f32.mrf.mxu0  ;;  %v4442_v36 = vpop.f32.mrf.mxu1 }
 0x112   :  { %v6256_v40 = vadd.f32 %v622_v32, %v6163_v16  ;;  %v1415_v20 = vsel %vm1336_vm2, %v6273_v4, -inf }
 0x113   :  { %v4410_v43 = vpop.f32.mrf.mxu0  ;;  %v764_v46 = vpop.f32.mrf.mxu1 }
 0x114   :  { %v1397_v47 = vsel %vm1336_vm2, %v6256_v40, -inf  ;;  %v6276_v5 = vadd.f32 %v764_v46, %v6163_v16 }
 0x115   :  { %1401 = vmax.xlane.f32.xlu1 %v1400_v41  ;;  %1398 = vmax.xlane.f32.xlu0 %v1397_v47  ;;  %v876_v49 = vpop.f32.mrf.mxu0  ;;  %v4445_v52 = vpop.f32.mrf.mxu1 }
 0x116   :  { %v6283_v17 = vadd.f32 %v876_v49, %v6052_v26  ;;  %v1418_v19 = vsel %vm1336_vm2, %v6276_v5, -inf }
 0x117   :  { %v4462_v59 = vpop.f32.mrf.mxu0  ;;  %v1018_v61 = vpop.f32.mrf.mxu1 }
 0x118   :  { %v6286_v18 = vadd.f32 %v1018_v61, %v6052_v26  ;;  %v1421_v43 = vsel %vm1336_vm2, %v6283_v17, -inf }
 0x119   :  { %1407 = vmax.xlane.f32.xlu1 %v1406_v56  ;;  %1404 = vmax.xlane.f32.xlu0 %v1403_v58  ;;  %v881_v62 = vpop.f32.mrf.mxu0  ;;  %v4497_v63 = vpop.f32.mrf.mxu1 }
 0x11a   :  { %v6293_v32 = vadd.f32 %v881_v62, %v6068_v33  ;;  %v1442_v41 = vsel %vm1336_vm2, %v6286_v18, -inf }
 0x11b   :  { %v4465_v9 = vpop.f32.mrf.mxu0  ;;  %v1023_v10 = vpop.f32.mrf.mxu1 }
 0x11c   :  { %v6296_v36 = vadd.f32 %v1023_v10, %v6068_v33  ;;  %v1424_v61 = vsel %vm1336_vm2, %v6293_v32, -inf }
 0x11d   :  { %1413 = vmax.xlane.f32.xlu1 %v1412_v7  ;;  %1410 = vmax.xlane.f32.xlu0 %v1409_v8  ;;  %v886_v14 = vpop.f32.mrf.mxu0  ;;  %v4500_v15 = vpop.f32.mrf.mxu1 }
 0x11e   :  { %v6303_v56 = vadd.f32 %v886_v14, %v6088_v42  ;;  %v1445_v59 = vsel %vm1336_vm2, %v6296_v36, -inf }
 0x11f   :  { %v4468_v27 = vpop.f32.mrf.mxu0  ;;  %v1028_v28 = vpop.f32.mrf.mxu1 }
 0x120   :  { %v6306_v58 = vadd.f32 %v1028_v28, %v6088_v42  ;;  %v1427_v15 = vsel %vm1336_vm2, %v6303_v56, -inf }
 0x121   :  { %1419 = vmax.xlane.f32.xlu1 %v1418_v19  ;;  %1416 = vmax.xlane.f32.xlu0 %v1415_v20  ;;  %v891_v29 = vpop.f32.mrf.mxu0  ;;  %v4503_v31 = vpop.f32.mrf.mxu1 }
 0x122   :  { %v6313_v9 = vadd.f32 %v891_v29, %v6106_v51  ;;  %v1448_v14 = vsel %vm1336_vm2, %v6306_v58, -inf }
 0x123   :  { %v4471_v46 = vpop.f32.mrf.mxu0  ;;  %v1033_v47 = vpop.f32.mrf.mxu1 }
 0x124   :  { %v6316_v10 = vadd.f32 %v1033_v47, %v6106_v51 }
 0x125   :  { %1443 = vmax.xlane.f32.xlu1 %v1442_v41  ;;  %1422 = vmax.xlane.f32.xlu0 %v1421_v43  ;;  %v896_v49 = vpop.f32.mrf.mxu0  ;;  %v4506_v52 = vpop.f32.mrf.mxu1  ;;  %v1430_v43 = vsel %vm1336_vm2, %v6313_v9, -inf }
 0x126   :  { %7338 = vst [vmem:[#allocation5_spill] sm:$0xff] %v6316_v10  ;;  %v6323_v31 = vadd.f32 %v896_v49, %v6124_v60  ;;  %v1451_v41 = vsel %vm1336_vm2, %v6316_v10, -inf }
 0x127   :  { %v4474_v62 = vpop.f32.mrf.mxu0  ;;  %v1038_v63 = vpop.f32.mrf.mxu1 }
 0x128   :  { %v6326_v29 = vadd.f32 %v1038_v63, %v6124_v60  ;;  %v1433_v63 = vsel %vm1336_vm2, %v6323_v31, -inf }
 0x129   :  { %1446 = vmax.xlane.f32.xlu1 %v1445_v59  ;;  %1425 = vmax.xlane.f32.xlu0 %v1424_v61  ;;  %v901_v7 = vpop.f32.mrf.mxu0  ;;  %v4509_v8 = vpop.f32.mrf.mxu1 }
 0x12a   :  { %7339 = vst [vmem:[#allocation6_spill] sm:$0xff] %v6326_v29  ;;  %v6333_v61 = vadd.f32 %v901_v7, %v6142_v6  ;;  %v1454_v62 = vsel %vm1336_vm2, %v6326_v29, -inf }
 0x12b   :  { %v4477_v19 = vpop.f32.mrf.mxu0  ;;  %v1043_v20 = vpop.f32.mrf.mxu1 }
 0x12c   :  { %v6336_v49 = vadd.f32 %v1043_v20, %v6142_v6 }
 0x12d   :  { %1449 = vmax.xlane.f32.xlu1 %v1448_v14  ;;  %1428 = vmax.xlane.f32.xlu0 %v1427_v15  ;;  %v906_v27 = vpop.f32.mrf.mxu0  ;;  %v4512_v28 = vpop.f32.mrf.mxu1 }
 0x12e   :  { %7340 = vst [vmem:[#allocation7_spill] sm:$0xff] %v6336_v49  ;;  %v6343_v28 = vadd.f32 %v906_v27, %v6163_v16  ;;  %v1457_v20 = vsel %vm1336_vm2, %v6336_v49, -inf }
 0x12f   :  { %v4480_v46 = vpop.f32.mrf.mxu0  ;;  %v1048_v47 = vpop.f32.mrf.mxu1 }
 0x130   :  { %7341 = vst [vmem:[#allocation8_spill] sm:$0xff] %v6343_v28  ;;  %v6346_v7 = vadd.f32 %v1048_v47, %v6163_v16 }
 0x131   :  { %1452 = vmax.xlane.f32.xlu1 %v1451_v41  ;;  %1431 = vmax.xlane.f32.xlu0 %v1430_v43  ;;  %v1160_v52 = vpop.f32.mrf.mxu0  ;;  %v4515_v59 = vpop.f32.mrf.mxu1  ;;  %v1436_v41 = vsel %vm1336_vm2, %v6333_v61, -inf }
 0x132   :  { %7342 = vst [vmem:[#allocation9_spill] sm:$0xff] %v6346_v7  ;;  %v1460_v47 = vsel %vm1336_vm2, %v6346_v7, -inf }
 0x133   :  { %v4532_v8 = vpop.f32.mrf.mxu0  ;;  %v1302_v14 = vpop.f32.mrf.mxu1 }
 0x134   :  { %v6356_v27 = vadd.f32 %v1302_v14, %v6052_v26  ;;  %v1439_v8 = vsel %vm1336_vm2, %v6343_v28, -inf }
 0x135   :  { %1455 = vmax.xlane.f32.xlu1 %v1454_v62  ;;  %1434 = vmax.xlane.f32.xlu0 %v1433_v63  ;;  %v1165_v15 = vpop.f32.mrf.mxu0  ;;  %v4567_v19 = vpop.f32.mrf.mxu1  ;;  %v6353_v63 = vadd.f32 %v1160_v52, %v6052_v26 }
 0x136   :  { %7344 = vst [vmem:[#allocation11_spill] sm:$0xff] %v6356_v27  ;;  %v1484_v26 = vsel %vm1336_vm2, %v6356_v27, -inf }
 0x137   :  { %v4535_v43 = vpop.f32.mrf.mxu0  ;;  %v1307_v46 = vpop.f32.mrf.mxu1  ;;  %7343 = vst [vmem:[#allocation10_spill] sm:$0xff] %v6353_v63  ;;  %v1463_v14 = vsel %vm1336_vm2, %v6353_v63, -inf }
 0x138   :  { %v6363_v43 = vadd.f32 %v1165_v15, %v6068_v33  ;;  %v6366_v52 = vadd.f32 %v1307_v46, %v6068_v33 }
 0x139   :  { %1458 = vmax.xlane.f32.xlu1 %v1457_v20  ;;  %1437 = vmax.xlane.f32.xlu0 %v1436_v41  ;;  %v1170_v59 = vpop.f32.mrf.mxu0  ;;  %v4570_v62 = vpop.f32.mrf.mxu1 }
 0x13a   :  { %7345 = vst [vmem:[#allocation12_spill] sm:$0xff] %v6363_v43  ;;  %7346 = vst [vmem:[#allocation13_spill] sm:$0xff] %v6366_v52  ;;  %v1487_v33 = vsel %vm1336_vm2, %v6366_v52, -inf  ;;  %v1466_v46 = vsel %vm1336_vm2, %v6363_v43, -inf }
 0x13b   :  { %v4538_v19 = vpop.f32.mrf.mxu0  ;;  %v1312_v1 = vpop.f32.mrf.mxu1 }
 0x13c   :  { %v6373_v19 = vadd.f32 %v1170_v59, %v6088_v42  ;;  %v6376_v15 = vadd.f32 %v1312_v1, %v6088_v42 }
 0x13d   :  { %1461 = vmax.xlane.f32.xlu1 %v1460_v47  ;;  %1440 = vmax.xlane.f32.xlu0 %v1439_v8  ;;  %v1175_v20 = vpop.f32.mrf.mxu0  ;;  %v4573_v41 = vpop.f32.mrf.mxu1 }
 0x13e   :  { %7347 = vst [vmem:[#allocation14_spill] sm:$0xff] %v6373_v19  ;;  %7348 = vst [vmem:[#allocation15_spill] sm:$0xff] %v6376_v15  ;;  %v1490_v1 = vsel %vm1336_vm2, %v6376_v15, -inf  ;;  %v1469_v42 = vsel %vm1336_vm2, %v6373_v19, -inf }
 0x13f   :  { %v4541_v62 = vpop.f32.mrf.mxu0  ;;  %v1317_v7 = vpop.f32.mrf.mxu1 }
 0x140   :  { %v6383_v62 = vadd.f32 %v1175_v20, %v6106_v51  ;;  %v6386_v59 = vadd.f32 %v1317_v7, %v6106_v51 }
 0x141   :  { %1485 = vmax.xlane.f32.xlu1 %v1484_v26  ;;  %1464 = vmax.xlane.f32.xlu0 %v1463_v14  ;;  %v1180_v47 = vpop.f32.mrf.mxu0  ;;  %v4576_v8 = vpop.f32.mrf.mxu1 }
 0x142   :  { %7349 = vst [vmem:[#allocation16_spill] sm:$0xff] %v6383_v62  ;;  %7350 = vst [vmem:[#allocation17_spill] sm:$0xff] %v6386_v59  ;;  %v1493_v51 = vsel %vm1336_vm2, %v6386_v59, -inf  ;;  %v1472_v7 = vsel %vm1336_vm2, %v6383_v62, -inf }
 0x143   :  { %v4544_v41 = vpop.f32.mrf.mxu0  ;;  %v1322_v27 = vpop.f32.mrf.mxu1 }
 0x144   :  { %v6393_v41 = vadd.f32 %v1180_v47, %v6124_v60  ;;  %v6396_v20 = vadd.f32 %v1322_v27, %v6124_v60 }
 0x145   :  { %1488 = vmax.xlane.f32.xlu1 %v1487_v33  ;;  %1467 = vmax.xlane.f32.xlu0 %v1466_v46  ;;  %v1185_v26 = vpop.f32.mrf.mxu0  ;;  %v4579_v14 = vpop.f32.mrf.mxu1 }
 0x146   :  { %7351 = vst [vmem:[#allocation18_spill] sm:$0xff] %v6393_v41  ;;  %7352 = vst [vmem:[#allocation19_spill] sm:$0xff] %v6396_v20  ;;  %v1496_v60 = vsel %vm1336_vm2, %v6396_v20, -inf  ;;  %v1475_v27 = vsel %vm1336_vm2, %v6393_v41, -inf  ;;  %v7357_v20 = vmov 0.0  }
 0x147   :  { %v4547_v8 = vpop.f32.mrf.mxu0  ;;  %v1327_v52 = vpop.f32.mrf.mxu1 }
 0x148   :  { %v6403_v8 = vadd.f32 %v1185_v26, %v6142_v6  ;;  %v6406_v47 = vadd.f32 %v1327_v52, %v6142_v6 }
 0x149   :  { %1491 = vmax.xlane.f32.xlu1 %v1490_v1  ;;  %1470 = vmax.xlane.f32.xlu0 %v1469_v42  ;;  %v1190_v33 = vpop.f32.mrf.mxu0  ;;  %v4582_v46 = vpop.f32.mrf.mxu1 }
 0x14a   :  { %7353 = vst [vmem:[#allocation20_spill] sm:$0xff] %v6403_v8  ;;  %7354 = vst [vmem:[#allocation21_spill] sm:$0xff] %v6406_v47  ;;  %v1499_v6 = vsel %vm1336_vm2, %v6406_v47, -inf  ;;  %v1478_v52 = vsel %vm1336_vm2, %v6403_v8, -inf }
 0x14b   :  { %v4550_v14 = vpop.f32.mrf.mxu0  ;;  %v1332_v15 = vpop.f32.mrf.mxu1 }
 0x14d   :  { %1494 = vmax.xlane.f32.xlu1 %v1493_v51  ;;  %1473 = vmax.xlane.f32.xlu0 %v1472_v7  ;;  %v4596_v1 = vpop.f32.mrf.mxu0  ;;  %v4585_v42 = vpop.f32.mrf.mxu1  ;;  %v6413_v51 = vadd.f32 %v1190_v33, %v6163_v16  ;;  %v6416_v7 = vadd.f32 %v1332_v15, %v6163_v16 }
 0x14f   :  { %v2135_v46 = vpop.f32.mrf.mxu0  ;;  %7355 = vst [vmem:[#allocation22_spill] sm:$0xff] %v6413_v51  ;;  %7356 = vst [vmem:[#allocation23_spill] sm:$0xff] %v6416_v7  ;;  %v1481_v33 = vsel %vm1336_vm2, %v6413_v51, -inf }
 0x151   :  { %1497 = vmax.xlane.f32.xlu1 %v1496_v60  ;;  %1476 = vmax.xlane.f32.xlu0 %v1475_v27  ;;  %v4599_v14 = vpop.f32.mrf.mxu0  ;;  %v1502_v60 = vsel %vm1336_vm2, %v6416_v7, -inf }
 0x153   :  { %v2145_v26 = vpop.f32.mrf.mxu0 }
 0x155   :  { %1500 = vmax.xlane.f32.xlu1 %v1499_v6  ;;  %1479 = vmax.xlane.f32.xlu0 %v1478_v52  ;;  %v4602_v42 = vpop.f32.mrf.mxu0 }
 0x157   :  { %v2155_v27 = vpop.f32.mrf.mxu0 }
 0x159   :  { %1503 = vmax.xlane.f32.xlu1 %v1502_v60  ;;  %1482 = vmax.xlane.f32.xlu0 %v1481_v33  ;;  %v6426_v16 = vpop.f32.mrf.mxu0 }
 0x15b   :  { %v2165_v15 = vpop.f32.mrf.mxu0 }
 0x15c   :  { %4679 = vmatpush3.msra.mxu1 %v2165_v15 }
 0x15d   :  { %v6428_v47 = vpop.f32.mrf.mxu0  ;;  %4680 = vmatprep.subr.mxu1 %v7357_v20 }
 0x15e   :  { %4681 = vmatpush3.msra.mxu1 %v4602_v42 }
 0x15f   :  { %v6431_v6 = vpop.f32.mrf.mxu0  ;;  %4682 = vmatprep.subr.mxu1 %v7357_v20 }
 0x160   :  { %4683 = vmatpush3.msra.mxu1 %v2155_v27 }
 0x161   :  { %v4611_v52 = vpop.f32.mrf.mxu0  ;;  %4684 = vmatprep.subr.mxu1 %v7357_v20 }
 0x162   :  { %4685 = vmatpush3.msra.mxu1 %v4599_v14 }
 0x163   :  { %v6435_v60 = vpop.f32.mrf.mxu0  ;;  %4686 = vmatprep.subr.mxu1 %v7357_v20 }
 0x164   :  { %4687 = vmatpush3.msra.mxu1 %v2145_v26 }
 0x165   :  { %v4614_v33 = vpop.f32.mrf.mxu0  ;;  %4688 = vmatprep.subr.mxu1 %v7357_v20 }
 0x166   :  { %4689 = vmatpush3.msra.mxu1 %v4596_v1 }
 0x167   :  { %v2195_v15 = vpop.f32.mrf.mxu0  ;;  %4690 = vmatprep.subr.mxu1 %v7357_v20 }
 0x168   :  { %4691 = vmatpush3.msra.mxu1 %v2135_v46 }
 0x169   :  { %v6440_v42 = vpop.f32.mrf.mxu0  ;;  %4713 = vmatprep.subr.mxu1 %v7357_v20 }
 0x16a   :  { %v1339_v27 = vpop.xlane.xlu0 %1338 }
 0x16b   :  { %v1505_v14 = vsub.f32 %v6059_v30, %v1339_v27  ;;  %v6444_v7 = vpop.f32.mrf.mxu0 }
 0x16d   :  { %v1561_v59 = vmul.f32 1.442695, %v1505_v14  ;;  %v6446_v51 = vpop.f32.mrf.mxu0 }
 0x16e   :  { %v1342_v26 = vpop.xlane.xlu0 %1341 }
 0x16f   :  { %4963 = vpow2.f32 %v1561_v59  ;;  %v1506_v1 = vsub.f32 %v6079_v39, %v1342_v26  ;;  %v6449_v8 = vpop.f32.mrf.mxu0 }
 0x171   :  { %v1563_v41 = vmul.f32 1.442695, %v1506_v1  ;;  %v6451_v46 = vpop.f32.mrf.mxu0 }
 0x172   :  { %v1345_v62 = vpop.xlane.xlu1 %1344 }
 0x173   :  { %4965 = vpow2.f32 %v1563_v41  ;;  %v1507_v19 = vsub.f32 %v6097_v48, %v1345_v62  ;;  %v6454_v49 = vpop.f32.mrf.mxu0 }
 0x175   :  { %v1565_v30 = vmul.f32 1.442695, %v1507_v19  ;;  %v6456_v27 = vpop.f32.mrf.mxu0 }
 0x176   :  { %7358 = vst [vmem:[#allocation24_spill] sm:$0xff] %v6456_v27  ;;  %v1348_v14 = vpop.xlane.xlu1 %1347 }
 0x177   :  { %4967 = vpow2.f32 %v1565_v30  ;;  %v1508_v59 = vsub.f32 %v6115_v57, %v1348_v14  ;;  %v6459_v43 = vpop.f32.mrf.mxu0 }
 0x179   :  { %v1567_v39 = vmul.f32 1.442695, %v1508_v59  ;;  %v6461_v26 = vpop.f32.mrf.mxu0 }
 0x17a   :  { %v1351_v1 = vpop.xlane.xlu0 %1350 }
 0x17b   :  { %4969 = vpow2.f32 %v1567_v39  ;;  %v1509_v41 = vsub.f32 %v6133_v3, %v1351_v1  ;;  %v6464_v63 = vpop.f32.mrf.mxu0 }
 0x17c   :  { %7359 = vst [vmem:[#allocation25_spill] sm:$0xff] %v6464_v63  ;;  %v4964_v48 = vpop.eup %4963 }
 0x17d   :  { %v1569_v62 = vmul.f32 1.442695, %v1509_v41  ;;  %v6466_v19 = vpop.f32.mrf.mxu0  ;;  %4693 = vmatmul.mubr.msk.f32.vlgmr.msra.gmra.mxu1 %vm1336_vm2, %v4964_v48  ;;  %v1673_v30 = vsel %vm1336_vm2, %v4964_v48, 0.0 }
 0x17e   :  { %4714 = vmatpush3.msra.mxu1 %v4614_v33  ;;  %v1354_v57 = vpop.xlane.xlu1 %1353  ;;  %1674 = vadd.xlane.f32.xlu0 %v1673_v30 }
 0x17f   :  { %4971 = vpow2.f32 %v1569_v62  ;;  %v1510_v14 = vsub.f32 %v6154_v13, %v1354_v57  ;;  %4715 = vmatprep.subr.mxu1 %v7357_v20  ;;  %v6472_v59 = vpop.f32.mrf.mxu0  ;;  %4695 = vmatprep.mubr.msk.f32.mxu1 %vm5211_vm1, %v7357_v20 }
 0x180   :  { %v6476_v3 = vpop.eup %4965  ;;  %4716 = vmatpush3.msra.mxu1 %v2195_v15 }
 0x181   :  { %v1571_v39 = vmul.f32 1.442695, %v1510_v14  ;;  %4717 = vmatprep.subr.mxu1 %v7357_v20  ;;  %v6479_v1 = vpop.f32.mrf.mxu0  ;;  %4696 = vmatmul.mubr.msk.f32.gmra.mxu1 %vm1336_vm2, %v6476_v3 }
 0x182   :  { %4718 = vmatpush3.msra.mxu1 %v4611_v52  ;;  %v1360_v13 = vpop.xlane.xlu1 %1359  ;;  %v1357_v33 = vpop.xlane.xlu0 %1356  ;;  %4698 = vmatprep.mubr.msk.f32.mxu1 %vm5211_vm1, %v7357_v20 }
 0x183   :  { %4973 = vpow2.f32 %v1571_v39  ;;  %v1512_v41 = vsub.f32 %v6151_v12, %v1360_v13  ;;  %v1511_v48 = vsub.f32 %v6179_v24, %v1357_v33  ;;  %4719 = vmatprep.subr.mxu1 %v7357_v20  ;;  %v6488_v15 = vpop.f32.mrf.mxu0 }
 0x184   :  { %v6490_v62 = vpop.eup %4967  ;;  %4720 = vmatpush3.msra.mxu1 %v6435_v60 }
 0x185   :  { %v1575_v30 = vmul.f32 1.442695, %v1512_v41  ;;  %v1573_v52 = vmul.f32 1.442695, %v1511_v48  ;;  %4721 = vmatprep.subr.mxu1 %v7357_v20  ;;  %v6494_v57 = vpop.f32.mrf.mxu0  ;;  %4699 = vmatmul.mubr.msk.f32.gmra.mxu1 %vm1336_vm2, %v6490_v62 }
 0x186   :  { %4722 = vmatpush3.msra.mxu1 %v6428_v47  ;;  %v1366_v12 = vpop.xlane.xlu1 %1365  ;;  %v1363_v24 = vpop.xlane.xlu0 %1362  ;;  %4701 = vmatprep.mubr.msk.f32.mxu1 %vm5211_vm1, %v7357_v20 }
 0x187   :  { %4975 = vpow2.f32 %v1575_v30  ;;  %v1513_v14 = vsub.f32 %v6173_v22, %v1363_v24  ;;  %4723 = vmatprep.subr.mxu1 %v7357_v20  ;;  %v6503_v60 = vpop.f32.mrf.mxu0  ;;  %v1514_v13 = vsub.f32 %v6176_v23, %v1366_v12 }
 0x188   :  { %v6505_v39 = vpop.eup %4969  ;;  %4977 = vpow2.f32 %v1573_v52  ;;  %4724 = vmatpush3.msra.mxu1 %v6431_v6 }
 0x189   :  { %v1577_v47 = vmul.f32 1.442695, %v1513_v14  ;;  %4725 = vmatprep.subr.mxu1 %v7357_v20  ;;  %v4641_v33 = vpop.f32.mrf.mxu0  ;;  %4702 = vmatmul.mubr.msk.f32.gmra.mxu1 %vm1336_vm2, %v6505_v39  ;;  %v1579_v6 = vmul.f32 1.442695, %v1514_v13 }
 0x18a   :  { %4726 = vmatpush3.msra.mxu1 %v6426_v16  ;;  %v1372_v22 = vpop.xlane.xlu1 %1371  ;;  %v1369_v41 = vpop.xlane.xlu0 %1368  ;;  %4704 = vmatprep.mubr.msk.f32.mxu1 %vm5211_vm1, %v7357_v20 }
 0x18b   :  { %v6515_v48 = vpop.f32.mrf.mxu0  ;;  %4748 = vmatprep.subr.mxu1 %v7357_v20  ;;  %4979 = vpow2.f32 %v1577_v47  ;;  %v1515_v52 = vsub.f32 %v6190_v34, %v1369_v41  ;;  %v1516_v13 = vsub.f32 %v6193_v35, %v1372_v22 }
 0x18c   :  { %v6518_v23 = vpop.eup %4971  ;;  %4981 = vpow2.f32 %v1579_v6 }
 0x18d   :  { %v4644_v30 = vpop.f32.mrf.mxu0  ;;  %4705 = vmatmul.mubr.msk.f32.gmra.mxu1 %vm1336_vm2, %v6518_v23  ;;  %v1581_v47 = vmul.f32 1.442695, %v1515_v52  ;;  %v1583_v35 = vmul.f32 1.442695, %v1516_v13 }
 0x18e   :  { %v1378_v16 = vpop.xlane.xlu1 %1377  ;;  %v1375_v12 = vpop.xlane.xlu0 %1374  ;;  %4707 = vmatprep.mubr.msk.f32.mxu1 %vm5211_vm1, %v7357_v20 }
 0x18f   :  { %v2295_v24 = vpop.f32.mrf.mxu0  ;;  %4983 = vpow2.f32 %v1581_v47  ;;  %v1518_v47 = vsub.f32 %v6206_v45, %v1378_v16 }
 0x190   :  { %v6525_v14 = vpop.eup %4973  ;;  %4985 = vpow2.f32 %v1583_v35 }
 0x191   :  { %v6527_v29 = vpop.f32.mrf.mxu0  ;;  %4708 = vmatmul.mubr.msk.f32.gmra.mxu1 %vm1336_vm2, %v6525_v14  ;;  %v1587_v16 = vmul.f32 1.442695, %v1518_v47 }
 0x192   :  { %7360 = vst [vmem:[#allocation26_spill] sm:$0xff] %v6527_v29  ;;  %v6532_v10 = vpop.xlane.xlu0 %1380  ;;  %v6534_v34 = vpop.xlane.xlu1 %1383  ;;  %4710 = vmatprep.mubr.msk.f32.mxu1 %vm5211_vm1, %v7357_v20 }
 0x193   :  { %v2305_v41 = vpop.f32.mrf.mxu0 }
 0x194   :  { %v4976_v28 = vpop.eup %4975  ;;  %4819 = vmatpush3.msra.mxu0 %v2305_v41  ;;  %v1517_v41 = vsub.f32 %v6203_v44, %v1375_v12  ;;  %v1676_v44 = vsel %vm1336_vm2, %v6476_v3, 0.0 }
 0x195   :  { %v6538_v27 = vpop.eup %4977  ;;  %4820 = vmatprep.subr.mxu0 %v7357_v20  ;;  %v1694_v6 = vsel %vm1336_vm2, %v4976_v28, 0.0  ;;  %v6542_v29 = vpop.f32.mrf.mxu0 }
 0x196   :  { %7361 = vst [vmem:[#allocation27_spill] sm:$0xff] %v6542_v29  ;;  %4711 = vmatmul.mubr.msk.f32.gmra.mxu1 %vm1336_vm2, %v6538_v27  ;;  %v6546_v22 = vpop.xlane.xlu0 %1386  ;;  %v6548_v52 = vpop.xlane.xlu1 %1389  ;;  %1695 = vadd.xlane.f32.xlu1 %v1694_v6  ;;  %v1585_v29 = vmul.f32 1.442695, %v1517_v41 }
 0x197   :  { %4821 = vmatpush3.msra.mxu0 %v4644_v30  ;;  %4727 = vmatprep.mubr.msk.f32.mxu1 %vm5211_vm1, %v7357_v20  ;;  %v6554_v13 = vpop.f32.mrf.mxu0 }
 0x198   :  { %4822 = vmatprep.subr.mxu0 %v7357_v20  ;;  %v4980_v63 = vpop.eup %4979  ;;  %4987 = vpow2.f32 %v1585_v29  ;;  %v1679_v29 = vsel %vm1336_vm2, %v6490_v62, 0.0 }
 0x199   :  { %4823 = vmatpush3.msra.mxu0 %v2295_v24  ;;  %v1697_v12 = vsel %vm1336_vm2, %v4980_v63, 0.0  ;;  %v4982_v45 = vpop.eup %4981  ;;  %4989 = vpow2.f32 %v1587_v16 }
 0x19a   :  { %4728 = vmatmul.mubr.msk.f32.vlgmr.msra.gmra.mxu1 %vm1336_vm2, %v4976_v28  ;;  %4824 = vmatprep.subr.mxu0 %v7357_v20  ;;  %v6559_v6 = vpop.xlane.xlu0 %1392  ;;  %v6563_v30 = vpop.xlane.xlu1 %1395 }
 0x19b   :  { %4749 = vmatpush3.msra.mxu1 %v6459_v43  ;;  %1677 = vadd.xlane.f32.xlu1 %v1676_v44  ;;  %v6569_v28 = vpop.f32.mrf.mxu0  ;;  %v1519_v43 = vsub.f32 %v6213_v54, %v6532_v10  ;;  %v1520_v10 = vsub.f32 %v6216_v55, %v6534_v34  ;;  %v1682_v55 = vsel %vm1336_vm2, %v6505_v39, 0.0  ;;  %v1522_v39 = vsub.f32 %v6226_v2, %v6548_v52 }
 0x19c   :  { %1698 = vadd.xlane.f32.xlu0 %v1697_v12  ;;  %4750 = vmatprep.subr.mxu1 %v7357_v20  ;;  %v1523_v52 = vsub.f32 %v6233_v11, %v6559_v6 }
 0x19d   :  { %4825 = vmatpush3.msra.mxu0 %v4641_v33  ;;  %4751 = vmatpush3.msra.mxu1 %v6451_v46  ;;  %v1700_v33 = vsel %vm1336_vm2, %v4982_v45, 0.0  ;;  %v6587_v54 = vpop.f32.mrf.mxu0  ;;  %v1589_v41 = vmul.f32 1.442695, %v1519_v43 }
 0x19e   :  { %4826 = vmatprep.subr.mxu0 %v7357_v20  ;;  %4730 = vmatprep.mubr.msk.f32.mxu1 %vm5211_vm1, %v7357_v20  ;;  %v1402_v3 = vpop.xlane.xlu1 %1401  ;;  %v6574_v24 = vpop.xlane.xlu0 %1398 }
 0x19f   :  { %4752 = vmatprep.subr.mxu1 %v7357_v20  ;;  %4827 = vmatpush3.msra.mxu0 %v6515_v48  ;;  %v1526_v46 = vsub.f32 %v6240_v21, %v1402_v3  ;;  %v4984_v48 = vpop.eup %4983  ;;  %v6602_v34 = vpop.f32.mrf.mxu0  ;;  %v1685_v3 = vsel %vm1336_vm2, %v6518_v23, 0.0 }
 0x1a0   :  { %4731 = vmatmul.mubr.msk.f32.gmra.mxu1 %vm1336_vm2, %v4980_v63  ;;  %4828 = vmatprep.subr.mxu0 %v7357_v20  ;;  %v4986_v12 = vpop.eup %4985 }
 0x1a1   :  { %4753 = vmatpush3.msra.mxu1 %v6454_v49  ;;  %1701 = vadd.xlane.f32.xlu1 %v1700_v33  ;;  %v1603_v35 = vmul.f32 1.442695, %v1526_v46  ;;  %v1595_v46 = vmul.f32 1.442695, %v1522_v39 }
 0x1a2   :  { %1680 = vadd.xlane.f32.xlu0 %v1679_v29  ;;  %4754 = vmatprep.subr.mxu1 %v7357_v20  ;;  %v1408_v21 = vpop.xlane.xlu1 %1407  ;;  %v1405_v63 = vpop.xlane.xlu0 %1404 }
 0x1a3   :  { %4829 = vmatpush3.msra.mxu0 %v6494_v57  ;;  %4755 = vmatpush3.msra.mxu1 %v6446_v51  ;;  %v1527_v49 = vsub.f32 %v6250_v37, %v1405_v63  ;;  %4991 = vpow2.f32 %v1603_v35  ;;  %v1591_v57 = vmul.f32 1.442695, %v1520_v10  ;;  %v1528_v37 = vsub.f32 %v6253_v38, %v1408_v21  ;;  %v6614_v38 = vpop.f32.mrf.mxu0 }
 0x1a4   :  { %4830 = vmatprep.subr.mxu0 %v7357_v20  ;;  %4733 = vmatprep.mubr.msk.f32.mxu1 %vm5211_vm1, %v7357_v20  ;;  %v1703_v51 = vsel %vm1336_vm2, %v4984_v48, 0.0  ;;  %4993 = vpow2.f32 %v1589_v41  ;;  %v1597_v10 = vmul.f32 1.442695, %v1523_v52 }
 0x1a5   :  { %4756 = vmatprep.subr.mxu1 %v7357_v20  ;;  %4831 = vmatpush3.msra.mxu0 %v6503_v60  ;;  %v1605_v62 = vmul.f32 1.442695, %v1527_v49  ;;  %v1521_v60 = vsub.f32 %v6223_v0, %v6546_v22  ;;  %v1607_v0 = vmul.f32 1.442695, %v1528_v37  ;;  %v4988_v2 = vpop.eup %4987  ;;  %v6633_v43 = vpop.f32.mrf.mxu0  ;;  %v1525_v37 = vsub.f32 %v6256_v40, %v6574_v24 }
 0x1a6   :  { %4734 = vmatmul.mubr.msk.f32.gmra.mxu1 %vm1336_vm2, %v4982_v45  ;;  %1683 = vadd.xlane.f32.xlu1 %v1682_v55  ;;  %v1414_v47 = vpop.xlane.xlu1 %1413  ;;  %v1411_v44 = vpop.xlane.xlu0 %1410  ;;  %v1709_v11 = vsel %vm1336_vm2, %v4988_v2, 0.0 }
 0x1a7   :  { %4757 = vmatpush3.msra.mxu1 %v6449_v8  ;;  %1704 = vadd.xlane.f32.xlu0 %v1703_v51  ;;  %4995 = vpow2.f32 %v1605_v62  ;;  %v1706_v8 = vsel %vm1336_vm2, %v4986_v12, 0.0  ;;  %v1593_v16 = vmul.f32 1.442695, %v1521_v60  ;;  %v4990_v35 = vpop.eup %4989  ;;  %v6649_v21 = vpop.f32.mrf.mxu0  ;;  %v1691_v62 = vsel %vm1336_vm2, %v6538_v27, 0.0 }
 0x1a8   :  { %4758 = vmatprep.subr.mxu1 %v7357_v20  ;;  %4736 = vmatprep.mubr.msk.f32.mxu1 %vm5211_vm1, %v7357_v20  ;;  %4997 = vpow2.f32 %v1591_v57  ;;  %v1712_v41 = vsel %vm1336_vm2, %v4990_v35, 0.0 }
 0x1a9   :  { %4759 = vmatpush3.msra.mxu1 %v6440_v42  ;;  %4888 = vmatprep.subr.mxu0 %v7357_v20  ;;  %v1529_v42 = vsub.f32 %v6263_v50, %v1411_v44  ;;  %4999 = vpow2.f32 %v1607_v0  ;;  %v1688_v50 = vsel %vm1336_vm2, %v6525_v14, 0.0  ;;  %v1524_v14 = vsub.f32 %v6243_v25, %v6563_v30  ;;  %v6665_v51 = vpop.f32.mrf.mxu0 }
 0x1aa   :  { %4760 = vmatprep.subr.mxu1 %v7357_v20  ;;  %4737 = vmatmul.mubr.msk.f32.gmra.mxu1 %vm1336_vm2, %v4984_v48  ;;  %v6622_v22 = vpop.xlane.xlu1 %1419  ;;  %v1417_v45 = vpop.xlane.xlu0 %1416  ;;  %5001 = vpow2.f32 %v1593_v16 }
 0x1ab   :  { %4761 = vmatpush3.msra.mxu1 %v6444_v7  ;;  %1707 = vadd.xlane.f32.xlu1 %v1706_v8  ;;  %v1530_v7 = vsub.f32 %v6266_v53, %v1414_v47  ;;  %v1609_v29 = vmul.f32 1.442695, %v1529_v42  ;;  %5003 = vpow2.f32 %v1595_v46  ;;  %v1531_v48 = vsub.f32 %v6273_v4, %v1417_v45  ;;  %v6680_v8 = vpop.f32.mrf.mxu0 }
 0x1ac   :  { %1686 = vadd.xlane.f32.xlu0 %v1685_v3  ;;  %4739 = vmatprep.mubr.msk.f32.mxu1 %vm5211_vm1, %v7357_v20  ;;  %v1599_v57 = vmul.f32 1.442695, %v1524_v14  ;;  %v1532_v27 = vsub.f32 %v6276_v5, %v6622_v22  ;;  %v1601_v5 = vmul.f32 1.442695, %v1525_v37 }
 0x1ad   :  { %4783 = vmatprep.subr.mxu1 %v7357_v20  ;;  %v1611_v63 = vmul.f32 1.442695, %v1530_v7  ;;  %5005 = vpow2.f32 %v1609_v29  ;;  %v1613_v44 = vmul.f32 1.442695, %v1531_v48 }
 0x1ae   :  { %4740 = vmatmul.mubr.msk.f32.gmra.mxu1 %vm1336_vm2, %v4986_v12  ;;  %v6639_v23 = vpop.xlane.xlu1 %1443  ;;  %v1423_v33 = vpop.xlane.xlu0 %1422  ;;  %5007 = vpow2.f32 %v1597_v10  ;;  %v1615_v22 = vmul.f32 1.442695, %v1532_v27 }
 0x1af   :  { %1689 = vadd.xlane.f32.xlu1 %v1688_v50  ;;  %4742 = vmatprep.mubr.msk.f32.mxu1 %vm5211_vm1, %v7357_v20  ;;  %v1533_v6 = vsub.f32 %v6283_v17, %v1423_v33  ;;  %5009 = vpow2.f32 %v1611_v63  ;;  %v1540_v45 = vsub.f32 %v6286_v18, %v6639_v23  ;;  %v6696_v18 = vpop.f32.mrf.mxu0 }
 0x1b0   :  { %1710 = vadd.xlane.f32.xlu0 %v1709_v11  ;;  %v6645_v53 = vpop.eup %4991 }
 0x1b1   :  { %v1617_v55 = vmul.f32 1.442695, %v1533_v6  ;;  %v4994_v30 = vpop.eup %4993  ;;  %v1736_v4 = vsel %vm1336_vm2, %v6645_v53, 0.0  ;;  %v1631_v7 = vmul.f32 1.442695, %v1540_v45  ;;  %v6715_v11 = vpop.f32.mrf.mxu0 }
 0x1b2   :  { %4743 = vmatmul.mubr.msk.f32.gmra.mxu1 %vm1336_vm2, %v4988_v2  ;;  %v6654_v49 = vpop.xlane.xlu1 %1446  ;;  %v1426_v17 = vpop.xlane.xlu0 %1425  ;;  %v1715_v40 = vsel %vm1336_vm2, %v4994_v30, 0.0 }
 0x1b3   :  { %1713 = vadd.xlane.f32.xlu1 %v1712_v41  ;;  %4745 = vmatprep.mubr.msk.f32.mxu1 %vm5211_vm1, %v7357_v20  ;;  %v1534_v25 = vsub.f32 %v6293_v32, %v1426_v17  ;;  %5011 = vpow2.f32 %v1617_v55  ;;  %v7362_v55 = vld [vmem:[#allocation25_spill] sm:$0xff] }
 0x1b4   :  { %1692 = vadd.xlane.f32.xlu0 %v1691_v62  ;;  %v6667_v47 = vpop.eup %4995  ;;  %5013 = vpow2.f32 %v1599_v57 }
 0x1b5   :  { %v4998_v60 = vpop.eup %4997  ;;  %v1619_v39 = vmul.f32 1.442695, %v1534_v25  ;;  %v1739_v0 = vsel %vm1336_vm2, %v6667_v47, 0.0  ;;  %5015 = vpow2.f32 %v1613_v44 }
 0x1b6   :  { %4746 = vmatmul.mubr.msk.f32.gmra.mxu1 %vm1336_vm2, %v4990_v35  ;;  %v6672_v32 = vpop.xlane.xlu1 %1449  ;;  %v1429_v12 = vpop.xlane.xlu0 %1428  ;;  %v1718_v16 = vsel %vm1336_vm2, %v4998_v60, 0.0 }
 0x1b7   :  { %1737 = vadd.xlane.f32.xlu1 %v1736_v4  ;;  %4762 = vmatprep.mubr.msk.f32.mxu1 %vm5211_vm1, %v7357_v20  ;;  %v1535_v24 = vsub.f32 %v6303_v56, %v1429_v12  ;;  %v6688_v3 = vpop.eup %4999  ;;  %5017 = vpow2.f32 %v1619_v39  ;;  %v7363_v4 = vld [vmem:[#allocation24_spill] sm:$0xff] }
 0x1b8   :  { %1716 = vadd.xlane.f32.xlu0 %v1715_v40  ;;  %v5002_v46 = vpop.eup %5001  ;;  %5019 = vpow2.f32 %v1601_v5  ;;  %v7365_v5 = vld [vmem:[#allocation5_spill] sm:$0xff] }
 0x1b9   :  { %v1621_v2 = vmul.f32 1.442695, %v1535_v24  ;;  %5021 = vpow2.f32 %v1615_v22  ;;  %v5004_v23 = vpop.eup %5003  ;;  %v1721_v35 = vsel %vm1336_vm2, %v5002_v46, 0.0 }
 0x1ba   :  { %4763 = vmatmul.mubr.msk.f32.vlgmr.msra.gmra.mxu1 %vm1336_vm2, %v4994_v30  ;;  %v6686_v42 = vpop.xlane.xlu1 %1452  ;;  %v1432_v56 = vpop.xlane.xlu0 %1431 }
 0x1bb   :  { %4784 = vmatpush3.msra.mxu1 %v6479_v1  ;;  %1719 = vadd.xlane.f32.xlu1 %v1718_v16  ;;  %v1536_v52 = vsub.f32 %v6313_v9, %v1432_v56  ;;  %v1541_v1 = vsub.f32 %v6296_v36, %v6654_v49  ;;  %v1742_v9 = vsel %vm1336_vm2, %v6688_v3, 0.0  ;;  %5023 = vpow2.f32 %v1621_v2  ;;  %v6709_v29 = vpop.eup %5005 }
 0x1bc   :  { %1740 = vadd.xlane.f32.xlu0 %v1739_v0  ;;  %4785 = vmatprep.subr.mxu1 %v7357_v20  ;;  %v5008_v6 = vpop.eup %5007  ;;  %5025 = vpow2.f32 %v1631_v7  ;;  %v1745_v48 = vsel %vm1336_vm2, %v6709_v29, 0.0  ;;  %v1543_v0 = vsub.f32 %v7365_v5, %v6686_v42 }
 0x1bd   :  { %4786 = vmatpush3.msra.mxu1 %v6488_v15  ;;  %4765 = vmatprep.mubr.msk.f32.mxu1 %vm5211_vm1, %v7357_v20  ;;  %v1623_v33 = vmul.f32 1.442695, %v1536_v52  ;;  %v6720_v14 = vpop.eup %5009  ;;  %v1727_v57 = vsel %vm1336_vm2, %v5008_v6, 0.0 }
 0x1be   :  { %4787 = vmatprep.subr.mxu1 %v7357_v20  ;;  %4766 = vmatmul.mubr.msk.f32.gmra.mxu1 %vm1336_vm2, %v4998_v60  ;;  %v6704_v50 = vpop.xlane.xlu1 %1455  ;;  %v1435_v15 = vpop.xlane.xlu0 %1434  ;;  %v7364_v60 = vld [vmem:[#allocation8_spill] sm:$0xff]  ;;  %v1637_v52 = vmul.f32 1.442695, %v1543_v0 }
 0x1bf   :  { %4788 = vmatpush3.msra.mxu1 %v6466_v19  ;;  %1743 = vadd.xlane.f32.xlu1 %v1742_v9  ;;  %v1537_v36 = vsub.f32 %v6323_v31, %v1435_v15  ;;  %v1633_v19 = vmul.f32 1.442695, %v1541_v1  ;;  %v1724_v31 = vsel %vm1336_vm2, %v5004_v23, 0.0  ;;  %5027 = vpow2.f32 %v1623_v33  ;;  %v7366_v9 = vld [vmem:[#allocation6_spill] sm:$0xff] }
 0x1c0   :  { %1722 = vadd.xlane.f32.xlu0 %v1721_v35  ;;  %4789 = vmatprep.subr.mxu1 %v7357_v20  ;;  %v6727_v41 = vpop.eup %5011  ;;  %v1544_v15 = vsub.f32 %v7366_v9, %v6704_v50  ;;  %v7367_v33 = vld [vmem:[#allocation10_spill] sm:$0xff] }
 0x1c1   :  { %4790 = vmatpush3.msra.mxu1 %v6472_v59  ;;  %4768 = vmatprep.mubr.msk.f32.mxu1 %vm5211_vm1, %v7357_v20  ;;  %v1542_v59 = vsub.f32 %v6306_v58, %v6672_v32  ;;  %v1625_v63 = vmul.f32 1.442695, %v1537_v36  ;;  %v6736_v58 = vpop.f32.mrf.mxu0  ;;  %5029 = vpow2.f32 %v1633_v19  ;;  %v1757_v19 = vsel %vm1336_vm2, %v6727_v41, 0.0 }
 0x1c2   :  { %4791 = vmatprep.subr.mxu1 %v7357_v20  ;;  %4769 = vmatmul.mubr.msk.f32.gmra.mxu1 %vm1336_vm2, %v5002_v46  ;;  %v1438_v10 = vpop.xlane.xlu0 %1437  ;;  %v6730_v49 = vpop.xlane.xlu1 %1458 }
 0x1c3   :  { %4792 = vmatpush3.msra.mxu1 %v6461_v26  ;;  %1725 = vadd.xlane.f32.xlu1 %v1724_v31  ;;  %v1538_v17 = vsub.f32 %v6333_v61, %v1438_v10  ;;  %v5014_v26 = vpop.eup %5013  ;;  %v1635_v30 = vmul.f32 1.442695, %v1542_v59  ;;  %5031 = vpow2.f32 %v1625_v63  ;;  %v1748_v61 = vsel %vm1336_vm2, %v6720_v14, 0.0  ;;  %v2375_v44 = vpop.f32.mrf.mxu0  ;;  %v7368_v59 = vld [vmem:[#allocation12_spill] sm:$0xff] }
 0x1c4   :  { %1746 = vadd.xlane.f32.xlu0 %v1745_v48  ;;  %4793 = vmatprep.subr.mxu1 %v7357_v20  ;;  %v6740_v25 = vpop.eup %5015  ;;  %v1730_v22 = vsel %vm1336_vm2, %v5014_v26, 0.0  ;;  %v1639_v31 = vmul.f32 1.442695, %v1544_v15  ;;  %v7369_v48 = vld [vmem:[#allocation7_spill] sm:$0xff] }
 0x1c5   :  { %4794 = vmatpush3.msra.mxu1 %v7362_v55  ;;  %4771 = vmatprep.mubr.msk.f32.mxu1 %vm5211_vm1, %v7357_v20  ;;  %v6748_v37 = vpop.eup %5017  ;;  %v1627_v27 = vmul.f32 1.442695, %v1538_v17  ;;  %5033 = vpow2.f32 %v1635_v30  ;;  %v1751_v45 = vsel %vm1336_vm2, %v6740_v25, 0.0  ;;  %v1545_v17 = vsub.f32 %v7369_v48, %v6730_v49 }
 0x1c6   :  { %4795 = vmatprep.subr.mxu1 %v7357_v20  ;;  %4772 = vmatmul.mubr.msk.f32.gmra.mxu1 %vm1336_vm2, %v5004_v23  ;;  %v1441_v62 = vpop.xlane.xlu0 %1440  ;;  %v5020_v32 = vpop.eup %5019 }
 0x1c7   :  { %4796 = vmatpush3.msra.mxu1 %v7363_v4  ;;  %4833 = vmatmul.mubr.msk.f32.vlgmr.msra.gmra.mxu0 %vm1336_vm2, %v6727_v41  ;;  %v6755_v12 = vpop.xlane.xlu1 %1461  ;;  %v1539_v39 = vsub.f32 %v7364_v60, %v1441_v62  ;;  %v6759_v24 = vpop.eup %5021  ;;  %5035 = vpow2.f32 %v1627_v27  ;;  %v1733_v7 = vsel %vm1336_vm2, %v5020_v32, 0.0  ;;  %v7370_v62 = vld [vmem:[#allocation9_spill] sm:$0xff]  ;;  %v7372_v27 = vld [vmem:[#allocation11_spill] sm:$0xff] }
 0x1c8   :  { %1749 = vadd.xlane.f32.xlu1 %v1748_v61  ;;  %1728 = vadd.xlane.f32.xlu0 %v1727_v57  ;;  %v6770_v16 = vpop.eup %5023  ;;  %v1754_v46 = vsel %vm1336_vm2, %v6759_v24, 0.0  ;;  %v7371_v61 = vld [vmem:[#allocation14_spill] sm:$0xff]  ;;  %v1641_v57 = vmul.f32 1.442695, %v1545_v17 }
 0x1c9   :  { %4774 = vmatprep.mubr.msk.f32.mxu1 %vm5211_vm1, %v7357_v20  ;;  %4835 = vmatprep.mubr.msk.f32.mxu0 %vm5211_vm1, %v7357_v20  ;;  %v1629_v42 = vmul.f32 1.442695, %v1539_v39  ;;  %v6776_v2 = vpop.eup %5025 }
 0x1ca   :  { %4775 = vmatmul.mubr.msk.f32.gmra.mxu1 %vm1336_vm2, %v5008_v6  ;;  %v1465_v40 = vpop.xlane.xlu0 %1464  ;;  %4853 = vmatprep.subr.mxu1 %v7357_v20  ;;  %v1778_v50 = vsel %vm1336_vm2, %v6776_v2, 0.0 }
 0x1cb   :  { %4836 = vmatmul.mubr.msk.f32.gmra.mxu0 %vm1336_vm2, %v6748_v37  ;;  %4777 = vmatprep.mubr.msk.f32.mxu1 %vm5211_vm1, %v7357_v20  ;;  %v6789_v23 = vpop.xlane.xlu1 %1485  ;;  %v1547_v35 = vsub.f32 %v7367_v33, %v1465_v40  ;;  %5037 = vpow2.f32 %v1629_v42 }
 0x1cc   :  { %1731 = vadd.xlane.f32.xlu1 %v1730_v22  ;;  %1752 = vadd.xlane.f32.xlu0 %v1751_v45  ;;  %v6785_v1 = vpop.eup %5027  ;;  %5039 = vpow2.f32 %v1637_v52  ;;  %v7375_v45 = vld [vmem:[#allocation13_spill] sm:$0xff]  ;;  %v7376_v52 = vld [vmem:[#allocation27_spill] sm:$0xff] }
 0x1cd   :  { %4838 = vmatprep.mubr.msk.f32.mxu0 %vm5211_vm1, %v7357_v20  ;;  %4889 = vmatpush3.msra.mxu0 %v2375_v44  ;;  %v1645_v10 = vmul.f32 1.442695, %v1547_v35  ;;  %5041 = vpow2.f32 %v1639_v31  ;;  %v1554_v44 = vsub.f32 %v7372_v27, %v6789_v23  ;;  %v6887_v23 = vpop.f32.mrf.mxu0  ;;  %v7378_v35 = vld [vmem:[#allocation20_spill] sm:$0xff] }
 0x1ce   :  { %4778 = vmatmul.mubr.msk.f32.gmra.mxu1 %vm1336_vm2, %v5014_v26  ;;  %v1468_v56 = vpop.xlane.xlu0 %1467  ;;  %4890 = vmatprep.subr.mxu0 %v7357_v20  ;;  %v6797_v6 = vpop.eup %5029  ;;  %v1760_v26 = vsel %vm1336_vm2, %v6748_v37, 0.0 }
 0x1cf   :  { %4839 = vmatmul.mubr.msk.f32.gmra.mxu0 %vm1336_vm2, %v6770_v16  ;;  %4780 = vmatprep.mubr.msk.f32.mxu1 %vm5211_vm1, %v7357_v20  ;;  %v1548_v63 = vsub.f32 %v7368_v59, %v1468_v56  ;;  %v6815_v41 = vpop.xlane.xlu1 %1488  ;;  %5043 = vpow2.f32 %v1645_v10  ;;  %v1659_v0 = vmul.f32 1.442695, %v1554_v44  ;;  %v6906_v31 = vpop.f32.mrf.mxu0 }
 0x1d0   :  { %1755 = vadd.xlane.f32.xlu1 %v1754_v46  ;;  %1734 = vadd.xlane.f32.xlu0 %v1733_v7 }
 0x1d1   :  { %4841 = vmatprep.mubr.msk.f32.mxu0 %vm5211_vm1, %v7357_v20  ;;  %4891 = vmatpush3.msra.mxu0 %v6696_v18  ;;  %v6807_v18 = vpop.eup %5031  ;;  %v1647_v4 = vmul.f32 1.442695, %v1548_v63 }
 0x1d2   :  { %4781 = vmatmul.mubr.msk.f32.gmra.mxu1 %vm1336_vm2, %v5020_v32  ;;  %v1471_v36 = vpop.xlane.xlu0 %1470  ;;  %4892 = vmatprep.subr.mxu0 %v7357_v20  ;;  %v6827_v49 = vpop.eup %5033  ;;  %v1769_v63 = vsel %vm1336_vm2, %v6807_v18, 0.0 }
 0x1d3   :  { %4842 = vmatmul.mubr.msk.f32.gmra.mxu0 %vm1336_vm2, %v6785_v1  ;;  %4797 = vmatprep.mubr.msk.f32.mxu1 %vm5211_vm1, %v7357_v20  ;;  %v1492_v32 = vpop.xlane.xlu1 %1491  ;;  %5045 = vpow2.f32 %v1647_v4 }
 0x1d4   :  { %1779 = vadd.xlane.f32.xlu1 %v1778_v50  ;;  %1758 = vadd.xlane.f32.xlu0 %v1757_v19  ;;  %v6831_v30 = vpop.eup %5035  ;;  %5047 = vpow2.f32 %v1641_v57 }
 0x1d5   :  { %4844 = vmatprep.mubr.msk.f32.mxu0 %vm5211_vm1, %v7357_v20  ;;  %4893 = vmatpush3.msra.mxu0 %v6715_v11  ;;  %v1781_v11 = vsel %vm1336_vm2, %v6797_v6, 0.0 }
 0x1d6   :  { %4798 = vmatmul.mubr.msk.f32.vlgmr.msra.gmra.mxu1 %vm1336_vm2, %v6645_v53  ;;  %4894 = vmatprep.subr.mxu0 %v7357_v20  ;;  %v1474_v55 = vpop.xlane.xlu0 %1473  ;;  %v1546_v53 = vsub.f32 %v7370_v62, %v6755_v12  ;;  %v1763_v12 = vsel %vm1336_vm2, %v6770_v16, 0.0  ;;  %v1555_v16 = vsub.f32 %v7375_v45, %v6815_v41  ;;  %v7381_v41 = vld [vmem:[#allocation17_spill] sm:$0xff] }
 0x1d7   :  { %4845 = vmatmul.mubr.msk.f32.gmra.mxu0 %vm1336_vm2, %v6807_v18  ;;  %4854 = vmatpush3.msra.mxu1 %v6602_v34  ;;  %v1549_v34 = vsub.f32 %v7371_v61, %v1471_v36  ;;  %v6870_v42 = vpop.xlane.xlu1 %1494  ;;  %v1772_v18 = vsel %vm1336_vm2, %v6831_v30, 0.0  ;;  %v7382_v61 = vld [vmem:[#allocation19_spill] sm:$0xff] }
 0x1d8   :  { %1761 = vadd.xlane.f32.xlu1 %v1760_v26  ;;  %1782 = vadd.xlane.f32.xlu0 %v1781_v11  ;;  %v1643_v37 = vmul.f32 1.442695, %v1546_v53  ;;  %v6855_v5 = vpop.eup %5037  ;;  %v4674_v11 = vpop.f32.mrf.mxu0 }
 0x1d9   :  { %4855 = vmatprep.subr.mxu1 %v7357_v20  ;;  %4800 = vmatprep.mubr.msk.f32.mxu1 %vm5211_vm1, %v7357_v20  ;;  %v1649_v39 = vmul.f32 1.442695, %v1549_v34 }
 0x1da   :  { %4856 = vmatpush3.msra.mxu1 %v6614_v38  ;;  %4847 = vmatprep.mubr.msk.f32.mxu0 %vm5211_vm1, %v7357_v20  ;;  %v1784_v38 = vsel %vm1336_vm2, %v6827_v49, 0.0  ;;  %v1477_v60 = vpop.xlane.xlu0 %1476  ;;  %5049 = vpow2.f32 %v1643_v37  ;;  %v2395_v27 = vpop.f32.mrf.mxu0 }
 0x1db   :  { %4857 = vmatprep.subr.mxu1 %v7357_v20  ;;  %4801 = vmatmul.mubr.msk.f32.gmra.mxu1 %vm1336_vm2, %v6667_v47  ;;  %v7373_v47 = vld [vmem:[#allocation16_spill] sm:$0xff]  ;;  %5051 = vpow2.f32 %v1649_v39  ;;  %v1498_v50 = vpop.xlane.xlu1 %1497 }
 0x1dc   :  { %4848 = vmatmul.mubr.msk.f32.gmra.mxu0 %vm1336_vm2, %v6831_v30  ;;  %4858 = vmatpush3.msra.mxu1 %v6569_v28  ;;  %v1550_v40 = vsub.f32 %v7373_v47, %v1474_v55  ;;  %v6859_v28 = vpop.eup %5039  ;;  %5053 = vpow2.f32 %v1659_v0  ;;  %v1557_v55 = vsub.f32 %v7381_v41, %v6870_v42  ;;  %v1558_v34 = vsub.f32 %v7382_v61, %v1498_v50 }
 0x1dd   :  { %1785 = vadd.xlane.f32.xlu1 %v1784_v38  ;;  %1764 = vadd.xlane.f32.xlu0 %v1763_v12  ;;  %v1787_v46 = vsel %vm1336_vm2, %v6859_v28, 0.0  ;;  %v6882_v7 = vpop.eup %5041 }
 0x1de   :  { %4859 = vmatprep.subr.mxu1 %v7357_v20  ;;  %4895 = vmatpush3.msra.mxu0 %v6665_v51  ;;  %v1651_v22 = vmul.f32 1.442695, %v1550_v40  ;;  %v7374_v51 = vld [vmem:[#allocation18_spill] sm:$0xff]  ;;  %v1480_v56 = vpop.xlane.xlu0 %1479  ;;  %v6889_v33 = vpop.eup %5043  ;;  %v1665_v30 = vmul.f32 1.442695, %v1557_v55 }
 0x1df   :  { %4860 = vmatpush3.msra.mxu1 %v6587_v54  ;;  %4896 = vmatprep.subr.mxu0 %v7357_v20  ;;  %v1551_v54 = vsub.f32 %v7374_v51, %v1477_v60  ;;  %v1552_v36 = vsub.f32 %v7378_v35, %v1480_v56  ;;  %v1501_v53 = vpop.xlane.xlu1 %1500  ;;  %v1667_v38 = vmul.f32 1.442695, %v1558_v34  ;;  %v4677_v60 = vpop.f32.mrf.mxu0  ;;  %v1799_v47 = vsel %vm1336_vm2, %v6889_v33, 0.0 }
 0x1e0   :  { %4803 = vmatprep.mubr.msk.f32.mxu1 %vm5211_vm1, %v7357_v20  ;;  %4850 = vmatprep.mubr.msk.f32.mxu0 %vm5211_vm1, %v7357_v20  ;;  %5055 = vpow2.f32 %v1651_v22  ;;  %v5046_v10 = vpop.eup %5045 }
 0x1e1   :  { %4861 = vmatprep.subr.mxu1 %v7357_v20  ;;  %4897 = vmatpush3.msra.mxu0 %v6680_v8  ;;  %v1766_v8 = vsel %vm1336_vm2, %v6785_v1, 0.0  ;;  %v1653_v15 = vmul.f32 1.442695, %v1551_v54  ;;  %v1661_v1 = vmul.f32 1.442695, %v1555_v16  ;;  %v6911_v48 = vpop.eup %5047  ;;  %v1802_v51 = vsel %vm1336_vm2, %v5046_v10, 0.0  ;;  %v2405_v54 = vpop.f32.mrf.mxu0 }
 0x1e2   :  { %4804 = vmatmul.mubr.msk.f32.gmra.mxu1 %vm1336_vm2, %v6688_v3  ;;  %4851 = vmatmul.mubr.msk.f32.gmra.mxu0 %vm1336_vm2, %v6855_v5  ;;  %v7377_v3 = vld [vmem:[#allocation15_spill] sm:$0xff]  ;;  %v1655_v59 = vmul.f32 1.442695, %v1552_v36  ;;  %v1793_v4 = vsel %vm1336_vm2, %v6911_v48, 0.0 }
 0x1e3   :  { %4862 = vmatpush3.msra.mxu1 %v7376_v52  ;;  %4898 = vmatprep.subr.mxu0 %v7357_v20  ;;  %v1556_v9 = vsub.f32 %v7377_v3, %v1492_v32  ;;  %5057 = vpow2.f32 %v1653_v15  ;;  %v1775_v32 = vsel %vm1336_vm2, %v6855_v5, 0.0  ;;  %v7383_v5 = vld [vmem:[#allocation23_spill] sm:$0xff] }
 0x1e4   :  { %1767 = vadd.xlane.f32.xlu1 %v1766_v8  ;;  %1788 = vadd.xlane.f32.xlu0 %v1787_v46  ;;  %5059 = vpow2.f32 %v1661_v1 }
 0x1e5   :  { %4863 = vmatprep.subr.mxu1 %v7357_v20  ;;  %4899 = vmatpush3.msra.mxu0 %v6633_v43  ;;  %v1483_v43 = vpop.xlane.xlu0 %1482  ;;  %v1663_v19 = vmul.f32 1.442695, %v1556_v9 }
 0x1e6   :  { %4864 = vmatpush3.msra.mxu1 %v6554_v13  ;;  %4900 = vmatprep.subr.mxu0 %v7357_v20  ;;  %v1790_v13 = vsel %vm1336_vm2, %v6882_v7, 0.0 }
 0x1e7   :  { %4806 = vmatprep.mubr.msk.f32.mxu1 %vm5211_vm1, %v7357_v20  ;;  %4865 = vmatprep.subr.mxu1 %v7357_v20  ;;  %v6921_v26 = vpop.eup %5049  ;;  %5061 = vpow2.f32 %v1663_v19 }
 0x1e8   :  { %4901 = vmatpush3.msra.mxu0 %v6649_v21  ;;  %4902 = vmatprep.mubr.msk.f32.mxu0 %vm5211_vm1, %v7357_v20  ;;  %v7379_v21 = vld [vmem:[#allocation26_spill] sm:$0xff]  ;;  %v6928_v62 = vpop.eup %5051  ;;  %5063 = vpow2.f32 %v1655_v59  ;;  %v1796_v37 = vsel %vm1336_vm2, %v6921_v26, 0.0 }
 0x1e9   :  { %4807 = vmatmul.mubr.msk.f32.gmra.mxu1 %vm1336_vm2, %v6709_v29  ;;  %4903 = vmatmul.mubr.msk.f32.vlgmr.msra.gmra.mxu0 %vm1336_vm2, %v6889_v33  ;;  %v7380_v29 = vld [vmem:[#allocation22_spill] sm:$0xff]  ;;  %v6937_v57 = vpop.eup %5053  ;;  %v1805_v8 = vsel %vm1336_vm2, %v6928_v62, 0.0 }
 0x1ea   :  { %4866 = vmatpush3.msra.mxu1 %v7379_v21  ;;  %1791 = vadd.xlane.f32.xlu1 %v1790_v13  ;;  %v1553_v17 = vsub.f32 %v7380_v29, %v1483_v43  ;;  %v1820_v12 = vsel %vm1336_vm2, %v6937_v57, 0.0 }
 0x1eb   :  { %1770 = vadd.xlane.f32.xlu0 %v1769_v63  ;;  %4809 = vmatprep.mubr.msk.f32.mxu1 %vm5211_vm1, %v7357_v20 }
 0x1ec   :  { %4905 = vmatprep.mubr.msk.f32.mxu0 %vm5211_vm1, %v7357_v20  ;;  %4923 = vmatprep.subr.mxu1 %v7357_v20 }
 0x1ed   :  { %4810 = vmatmul.mubr.msk.f32.gmra.mxu1 %vm1336_vm2, %v6720_v14  ;;  %4906 = vmatmul.mubr.msk.f32.gmra.mxu0 %vm1336_vm2, %v5046_v10  ;;  %v1657_v14 = vmul.f32 1.442695, %v1553_v17  ;;  %v5056_v44 = vpop.eup %5055 }
 0x1ee   :  { %1773 = vadd.xlane.f32.xlu1 %v1772_v18  ;;  %4812 = vmatprep.mubr.msk.f32.mxu1 %vm5211_vm1, %v7357_v20 }
 0x1ef   :  { %1794 = vadd.xlane.f32.xlu0 %v1793_v4  ;;  %4908 = vmatprep.mubr.msk.f32.mxu0 %vm5211_vm1, %v7357_v20  ;;  %5065 = vpow2.f32 %v1657_v14 }
 0x1f0   :  { %5067 = vpow2.f32 %v1665_v30  ;;  %v5058_v39 = vpop.eup %5057  ;;  %v7066_v30 = vld [vmem:[%s7314_s4] ss:$0 sm:$0xff] }
 0x1f1   :  { %4813 = vmatmul.mubr.msk.f32.gmra.mxu1 %vm1336_vm2, %v6740_v25  ;;  %4909 = vmatmul.mubr.msk.f32.gmra.mxu0 %vm1336_vm2, %v6928_v62  ;;  %v1504_v25 = vpop.xlane.xlu1 %1503  ;;  %v6960_v40 = vpop.eup %5059  ;;  %5069 = vpow2.f32 %v1667_v38 }
 0x1f2   :  { %1797 = vadd.xlane.f32.xlu1 %v1796_v37  ;;  %4815 = vmatprep.mubr.msk.f32.mxu1 %vm5211_vm1, %v7357_v20  ;;  %v1560_v0 = vsub.f32 %v7383_v5, %v1504_v25  ;;  %v1823_v16 = vsel %vm1336_vm2, %v6960_v40, 0.0 }
 0x1f3   :  { %1776 = vadd.xlane.f32.xlu0 %v1775_v32  ;;  %4911 = vmatprep.mubr.msk.f32.mxu0 %vm5211_vm1, %v7357_v20 }
 0x1f4   :  { %v6970_v45 = vpop.eup %5061  ;;  %v1671_v56 = vmul.f32 1.442695, %v1560_v0 }
 0x1f5   :  { %4816 = vmatmul.mubr.msk.f32.gmra.mxu1 %vm1336_vm2, %v6759_v24  ;;  %4912 = vmatmul.mubr.msk.f32.gmra.mxu0 %vm1336_vm2, %v5056_v44  ;;  %v7384_v24 = vld [vmem:[#allocation21_spill] sm:$0xff]  ;;  %v5064_v42 = vpop.eup %5063 }
 0x1f6   :  { %1821 = vadd.xlane.f32.xlu1 %v1820_v12  ;;  %4867 = vmatprep.mubr.msk.f32.mxu1 %vm5211_vm1, %v7357_v20  ;;  %v1559_v22 = vsub.f32 %v7384_v24, %v1501_v53  ;;  %5071 = vpow2.f32 %v1671_v56  ;;  %v1814_v33 = vsel %vm1336_vm2, %v5064_v42, 0.0 }
 0x1f7   :  { %1800 = vadd.xlane.f32.xlu0 %v1799_v47  ;;  %4914 = vmatprep.mubr.msk.f32.mxu0 %vm5211_vm1, %v7357_v20 }
 0x1f8   :  { %v1669_v52 = vmul.f32 1.442695, %v1559_v22 }
 0x1f9   :  { %4868 = vmatmul.mubr.msk.f32.vlgmr.msra.gmra.mxu1 %vm1336_vm2, %v6776_v2  ;;  %4915 = vmatmul.mubr.msk.f32.gmra.mxu0 %vm1336_vm2, %v5058_v39  ;;  %v1826_v2 = vsel %vm1336_vm2, %v6970_v45, 0.0 }
 0x1fa   :  { %4924 = vmatpush3.msra.mxu1 %v4677_v60  ;;  %1803 = vadd.xlane.f32.xlu1 %v1802_v51  ;;  %5073 = vpow2.f32 %v1669_v52 }
 0x1fb   :  { %1824 = vadd.xlane.f32.xlu0 %v1823_v16  ;;  %4925 = vmatprep.subr.mxu1 %v7357_v20 }
 0x1fc   :  { %4926 = vmatpush3.msra.mxu1 %v2405_v54  ;;  %4870 = vmatprep.mubr.msk.f32.mxu1 %vm5211_vm1, %v7357_v20  ;;  %v5066_v46 = vpop.eup %5065 }
 0x1fd   :  { %4917 = vmatprep.mubr.msk.f32.mxu0 %vm5211_vm1, %v7357_v20  ;;  %4927 = vmatprep.subr.mxu1 %v7357_v20  ;;  %v5068_v3 = vpop.eup %5067 }
 0x1fe   :  { %4871 = vmatmul.mubr.msk.f32.gmra.mxu1 %vm1336_vm2, %v6797_v6  ;;  %4918 = vmatmul.mubr.msk.f32.gmra.mxu0 %vm1336_vm2, %v5064_v42  ;;  %v1808_v6 = vsel %vm1336_vm2, %v5056_v44, 0.0  ;;  %v5070_v9 = vpop.eup %5069  ;;  %v1829_v15 = vsel %vm1336_vm2, %v5068_v3, 0.0 }
 0x1ff   :  { %4928 = vmatpush3.msra.mxu1 %v4674_v11  ;;  %1827 = vadd.xlane.f32.xlu1 %v1826_v2 }
 0x200   :  { %1806 = vadd.xlane.f32.xlu0 %v1805_v8  ;;  %4929 = vmatprep.subr.mxu1 %v7357_v20 }
 0x201   :  { %4930 = vmatpush3.msra.mxu1 %v2395_v27  ;;  %4873 = vmatprep.mubr.msk.f32.mxu1 %vm5211_vm1, %v7357_v20 }
 0x202   :  { %4920 = vmatprep.mubr.msk.f32.mxu0 %vm5211_vm1, %v7357_v20  ;;  %4931 = vmatprep.subr.mxu1 %v7357_v20 }
 0x203   :  { %4874 = vmatmul.mubr.msk.f32.gmra.mxu1 %vm1336_vm2, %v6827_v49  ;;  %4921 = vmatmul.mubr.msk.f32.gmra.mxu0 %vm1336_vm2, %v5066_v46  ;;  %v1832_v49 = vsel %vm1336_vm2, %v5070_v9, 0.0  ;;  %v5072_v1 = vpop.eup %5071 }
 0x204   :  { %4932 = vmatpush3.msra.mxu1 %v6887_v23  ;;  %1809 = vadd.xlane.f32.xlu1 %v1808_v6  ;;  %v1811_v23 = vsel %vm1336_vm2, %v5058_v39, 0.0  ;;  %v1838_v35 = vsel %vm1336_vm2, %v5072_v1, 0.0 }
 0x205   :  { %1830 = vadd.xlane.f32.xlu0 %v1829_v15  ;;  %4933 = vmatprep.subr.mxu1 %v7357_v20 }
 0x206   :  { %4934 = vmatpush3.msra.mxu1 %v6906_v31  ;;  %4876 = vmatprep.mubr.msk.f32.mxu1 %vm5211_vm1, %v7357_v20 }
 0x207   :  { %4935 = vmatprep.subr.mxu1 %v7357_v20  ;;  %4877 = vmatmul.mubr.msk.f32.gmra.mxu1 %vm1336_vm2, %v6859_v28  ;;  %v1817_v28 = vsel %vm1336_vm2, %v5066_v46, 0.0  ;;  %v1675_v50 = vpop.xlane.xlu0 %1674 }
 0x208   :  { %4936 = vmatpush3.msra.mxu1 %v6736_v58  ;;  %1833 = vadd.xlane.f32.xlu1 %v1832_v49  ;;  %v5074_v58 = vpop.eup %5073  ;;  %5075 = vrcp.f32 %v1675_v50 }
 0x209   :  { %1812 = vadd.xlane.f32.xlu0 %v1811_v23  ;;  %4879 = vmatprep.mubr.msk.f32.mxu1 %vm5211_vm1, %v7357_v20  ;;  %v1835_v36 = vsel %vm1336_vm2, %v5074_v58, 0.0 }
 0x20b   :  { %4880 = vmatmul.mubr.msk.f32.gmra.mxu1 %vm1336_vm2, %v6882_v7 }
 0x20c   :  { %1815 = vadd.xlane.f32.xlu1 %v1814_v33  ;;  %4882 = vmatprep.mubr.msk.f32.mxu1 %vm5211_vm1, %v7357_v20 }
 0x20d   :  { %1818 = vadd.xlane.f32.xlu0 %v1817_v28 }
 0x20f   :  { %4883 = vmatmul.mubr.msk.f32.gmra.mxu1 %vm1336_vm2, %v6911_v48 }
 0x210   :  { %1839 = vadd.xlane.f32.xlu1 %v1838_v35  ;;  %4885 = vmatprep.mubr.msk.f32.mxu1 %vm5211_vm1, %v7357_v20 }
 0x211   :  { %1836 = vadd.xlane.f32.xlu0 %v1835_v36 }
 0x213   :  { %4886 = vmatmul.mubr.msk.f32.gmra.mxu1 %vm1336_vm2, %v6921_v26 }
 0x214   :  { %4937 = vmatprep.mubr.msk.f32.mxu1 %vm5211_vm1, %v7357_v20 }
 0x215   :  { %v5076_v59 = vpop.eup %5075 }
 0x216   :  { %v3438_v63 = vmul.f32 %v5076_v59, %v1675_v50 }
 0x217   :  { %4938 = vmatmul.mubr.msk.f32.vlgmr.msra.gmra.mxu1 %vm1336_vm2, %v6937_v57 }
 0x218   :  { %4940 = vmatprep.mubr.msk.f32.mxu1 %vm5211_vm1, %v7357_v20  ;;  %v3494_v41 = vsub.f32 2.0, %v3438_v63 }
 0x21a   :  { %v3550_v4 = vmul.f32 %v5076_v59, %v3494_v41 }
 0x21b   :  { %4941 = vmatmul.mubr.msk.f32.gmra.mxu1 %vm1336_vm2, %v6960_v40 }
 0x21c   :  { %4943 = vmatprep.mubr.msk.f32.mxu1 %vm5211_vm1, %v7357_v20 }
 0x21f   :  { %4944 = vmatmul.mubr.msk.f32.gmra.mxu1 %vm1336_vm2, %v6970_v45  ;;  %v7037_v7 = vpop.xlane.xlu1 %1695 }
 0x220   :  { %4946 = vmatprep.mubr.msk.f32.mxu1 %vm5211_vm1, %v7357_v20 }
 0x223   :  { %4947 = vmatmul.mubr.msk.f32.gmra.mxu1 %vm1336_vm2, %v5068_v3 }
 0x224   :  { %4949 = vmatprep.mubr.msk.f32.mxu1 %vm5211_vm1, %v7357_v20  ;;  %v1678_v43 = vpop.xlane.xlu1 %1677 }
 0x225   :  { %v7044_v19 = vpop.xlane.xlu0 %1698  ;;  %5077 = vrcp.f32 %v1678_v43 }
 0x227   :  { %4950 = vmatmul.mubr.msk.f32.gmra.mxu1 %vm1336_vm2, %v5070_v9 }
 0x228   :  { %4952 = vmatprep.mubr.msk.f32.mxu1 %vm5211_vm1, %v7357_v20 }
 0x22a   :  { %v7049_v13 = vpop.xlane.xlu1 %1701 }
 0x22b   :  { %4953 = vmatmul.mubr.msk.f32.gmra.mxu1 %vm1336_vm2, %v5074_v58  ;;  %v1681_v31 = vpop.xlane.xlu0 %1680 }
 0x22c   :  { %4955 = vmatprep.mubr.msk.f32.mxu1 %vm5211_vm1, %v7357_v20  ;;  %5079 = vrcp.f32 %v1681_v31 }
 0x22f   :  { %4956 = vmatmul.mubr.msk.f32.gmra.mxu1 %vm1336_vm2, %v5072_v1  ;;  %v1684_v10 = vpop.xlane.xlu1 %1683 }
 0x230   :  { %5081 = vrcp.f32 %v1684_v10  ;;  %v7055_v21 = vpop.xlane.xlu0 %1704 }
 0x232   :  { %v5078_v29 = vpop.eup %5077 }
 0x233   :  { %v3439_v55 = vmul.f32 %v5078_v29, %v1678_v43 }
 0x234   :  { %v7057_v48 = vpop.xlane.xlu1 %1707 }
 0x235   :  { %v1687_v17 = vpop.xlane.xlu0 %1686  ;;  %v3495_v11 = vsub.f32 2.0, %v3439_v55 }
 0x236   :  { %5083 = vrcp.f32 %v1687_v17 }
 0x237   :  { %v3551_v25 = vmul.f32 %v5078_v29, %v3495_v11 }
 0x238   :  { %v1690_v26 = vpop.xlane.xlu1 %1689 }
 0x239   :  { %v5080_v18 = vpop.eup %5079  ;;  %5085 = vrcp.f32 %v1690_v26  ;;  %v7059_v20 = vpop.xlane.xlu0 %1710 }
 0x23a   :  { %v3440_v62 = vmul.f32 %v5080_v18, %v1681_v31 }
 0x23c   :  { %v7061_v53 = vpop.xlane.xlu1 %1713  ;;  %v3496_v27 = vsub.f32 2.0, %v3440_v62 }
 0x23d   :  { %v5082_v61 = vpop.eup %5081  ;;  %v1693_v34 = vpop.xlane.xlu0 %1692 }
 0x23e   :  { %v2501_v14 = vpop.f32.mrf.mxu1  ;;  %5087 = vrcp.f32 %v1693_v34  ;;  %v3441_v44 = vmul.f32 %v5082_v61, %v1684_v10  ;;  %v3552_v51 = vmul.f32 %v5080_v18, %v3496_v27 }
 0x23f   :  { %v3606_v57 = vmul.f32 %v3550_v4, %v2501_v14  ;;  %5089 = vrcp.f32 %v7037_v7 }
 0x240   :  { %v4694_v37 = vpop.f32.mrf.mxu1  ;;  %v7068_v32 = vpop.xlane.xlu1 %1737  ;;  %v3497_v5 = vsub.f32 2.0, %v3441_v44  ;;  %5091 = vrcp.f32 %v7044_v19 }
 0x241   :  { %v3669_v38 = vadd.f32 %v7066_v30, %v3606_v57  ;;  %v7072_v12 = vpop.xlane.xlu0 %1716  ;;  %5093 = vrcp.f32 %v7049_v13 }
 0x242   :  { %v2506_v60 = vpop.f32.mrf.mxu1  ;;  %v3553_v46 = vmul.f32 %v5082_v61, %v3497_v5  ;;  %5095 = vrcp.f32 %v7055_v21 }
 0x243   :  { %3725 = vst [vmem:[#allocation2] sm:$0xff] %v3669_v38  ;;  %v3607_v39 = vmul.f32 %v3551_v25, %v2506_v60  ;;  %v5084_v47 = vpop.eup %5083  ;;  %5097 = vrcp.f32 %v7057_v48 }
 0x244   :  { %v4697_v40 = vpop.f32.mrf.mxu1  ;;  %v3442_v0 = vmul.f32 %v5084_v47, %v1687_v17  ;;  %v7074_v24 = vpop.xlane.xlu1 %1719  ;;  %5099 = vrcp.f32 %v7059_v20 }
 0x245   :  { %v3670_v22 = vadd.f32 %v7066_v30, %v3607_v39  ;;  %v7077_v54 = vpop.xlane.xlu0 %1740  ;;  %5101 = vrcp.f32 %v7061_v53 }
 0x246   :  { %v2511_v45 = vpop.f32.mrf.mxu1  ;;  %v5086_v16 = vpop.eup %5085  ;;  %v3498_v52 = vsub.f32 2.0, %v3442_v0  ;;  %5103 = vrcp.f32 %v7072_v12 }
 0x247   :  { %3726 = vst [vmem:[#allocation2 + $0x8] sm:$0xff] %v3670_v22  ;;  %v3608_v42 = vmul.f32 %v3552_v51, %v2511_v45  ;;  %v3443_v3 = vmul.f32 %v5086_v16, %v1690_v26  ;;  %5105 = vrcp.f32 %v7074_v24 }
 0x248   :  { %v4700_v56 = vpop.f32.mrf.mxu1  ;;  %v7080_v2 = vpop.xlane.xlu1 %1743  ;;  %v3554_v28 = vmul.f32 %v5084_v47, %v3498_v52 }
 0x249   :  { %v3671_v8 = vadd.f32 %v7066_v30, %v3608_v42  ;;  %v7083_v6 = vpop.xlane.xlu0 %1722  ;;  %v3499_v58 = vsub.f32 2.0, %v3443_v3 }
 0x24a   :  { %v2516_v9 = vpop.f32.mrf.mxu1  ;;  %5107 = vrcp.f32 %v7083_v6 }
 0x24b   :  { %3727 = vst [vmem:[#allocation2 + $0x10] sm:$0xff] %v3671_v8  ;;  %v3609_v15 = vmul.f32 %v3553_v46, %v2516_v9  ;;  %v5088_v49 = vpop.eup %5087  ;;  %v3555_v55 = vmul.f32 %v5086_v16, %v3499_v58 }
 0x24c   :  { %v4703_v23 = vpop.f32.mrf.mxu1  ;;  %v7085_v33 = vpop.xlane.xlu1 %1725  ;;  %v3444_v35 = vmul.f32 %v5088_v49, %v1693_v34 }
 0x24d   :  { %v3672_v1 = vadd.f32 %v7066_v30, %v3609_v15  ;;  %v7088_v36 = vpop.xlane.xlu0 %1746  ;;  %v5090_v43 = vpop.eup %5089 }
 0x24e   :  { %v2521_v50 = vpop.f32.mrf.mxu1  ;;  %v3445_v63 = vmul.f32 %v5090_v43, %v7037_v7  ;;  %v3500_v29 = vsub.f32 2.0, %v3444_v35  ;;  %v5092_v11 = vpop.eup %5091 }
 0x24f   :  { %3728 = vst [vmem:[#allocation2 + $0x18] sm:$0xff] %v3672_v1  ;;  %v3610_v31 = vmul.f32 %v3554_v28, %v2521_v50  ;;  %v3446_v37 = vmul.f32 %v5092_v11, %v7044_v19  ;;  %v5094_v40 = vpop.eup %5093 }
 0x250   :  { %v4706_v10 = vpop.f32.mrf.mxu1  ;;  %v3501_v4 = vsub.f32 2.0, %v3445_v63  ;;  %v3556_v14 = vmul.f32 %v5088_v49, %v3500_v29  ;;  %v3447_v16 = vmul.f32 %v5094_v40, %v7049_v13  ;;  %v5096_v42 = vpop.eup %5095 }
 0x251   :  { %v3673_v59 = vadd.f32 %v7066_v30, %v3610_v31  ;;  %v7093_v17 = vpop.xlane.xlu1 %1749  ;;  %v7095_v41 = vpop.xlane.xlu0 %1728  ;;  %v3502_v5 = vsub.f32 2.0, %v3446_v37  ;;  %v3448_v9 = vmul.f32 %v5096_v42, %v7055_v21 }
 0x252   :  { %v2526_v26 = vpop.f32.mrf.mxu1  ;;  %v3557_v39 = vmul.f32 %v5090_v43, %v3501_v4  ;;  %v3503_v3 = vsub.f32 2.0, %v3447_v16  ;;  %v5098_v13 = vpop.eup %5097 }
 0x253   :  { %3729 = vst [vmem:[#allocation2 + $0x20] sm:$0xff] %v3673_v59  ;;  %v3611_v18 = vmul.f32 %v3555_v55, %v2526_v26  ;;  %v3558_v56 = vmul.f32 %v5092_v11, %v3502_v5  ;;  %v3504_v1 = vsub.f32 2.0, %v3448_v9  ;;  %v3449_v58 = vmul.f32 %v5098_v13, %v7057_v48  ;;  %v5100_v43 = vpop.eup %5099 }
 0x254   :  { %v4709_v62 = vpop.f32.mrf.mxu1  ;;  %v3559_v28 = vmul.f32 %v5094_v40, %v3503_v3  ;;  %v5102_v29 = vpop.eup %5101  ;;  %v3450_v26 = vmul.f32 %v5100_v43, %v7059_v20 }
 0x255   :  { %v7098_v61 = vpop.xlane.xlu1 %1731  ;;  %v7100_v34 = vpop.xlane.xlu0 %1752  ;;  %v3674_v7 = vadd.f32 %v7066_v30, %v3611_v18  ;;  %v3560_v63 = vmul.f32 %v5096_v42, %v3504_v1  ;;  %v3505_v55 = vsub.f32 2.0, %v3449_v58  ;;  %v3451_v62 = vmul.f32 %v5102_v29, %v7061_v53 }
 0x256   :  { %v2531_v57 = vpop.f32.mrf.mxu1 }
 0x257   :  { %3730 = vst [vmem:[#allocation2 + $0x28] sm:$0xff] %v3674_v7  ;;  %v3612_v27 = vmul.f32 %v3556_v14, %v2531_v57  ;;  %v3506_v57 = vsub.f32 2.0, %v3450_v26  ;;  %v3561_v37 = vmul.f32 %v5098_v13, %v3505_v55 }
 0x258   :  { %v4712_v44 = vpop.f32.mrf.mxu1 }
 0x259   :  { %v7105_v38 = vpop.xlane.xlu1 %1755  ;;  %v7107_v25 = vpop.xlane.xlu0 %1734  ;;  %v3675_v60 = vadd.f32 %v7066_v30, %v3612_v27  ;;  %v3562_v5 = vmul.f32 %v5100_v43, %v3506_v57 }
 0x25a   :  { %v2622_v47 = vpop.f32.mrf.mxu1  ;;  %v5104_v27 = vpop.eup %5103 }
 0x25b   :  { %3731 = vst [vmem:[#allocation2 + $0x30] sm:$0xff] %v3675_v60  ;;  %v3613_v0 = vmul.f32 %v3557_v39, %v2622_v47  ;;  %v3507_v60 = vsub.f32 2.0, %v3451_v62  ;;  %v3452_v53 = vmul.f32 %v5104_v27, %v7072_v12 }
 0x25c   :  { %v4729_v19 = vpop.f32.mrf.mxu1 }
 0x25d   :  { %v7111_v22 = vpop.xlane.xlu1 %1779  ;;  %v7113_v51 = vpop.xlane.xlu0 %1758  ;;  %v3676_v45 = vadd.f32 %v7066_v30, %v3613_v0 }
 0x25e   :  { %5109 = vrcp.f32 %v7113_v51  ;;  %v5106_v0 = vpop.eup %5105 }
 0x25f   :  { %3732 = vst [vmem:[#allocation2 + $0x38] sm:$0xff] %v3676_v45  ;;  %5111 = vrcp.f32 %v7085_v33  ;;  %v3453_v12 = vmul.f32 %v5106_v0, %v7074_v24 }
 0x260   :  { %v2627_v52 = vpop.f32.mrf.mxu1 }
 0x261   :  { %v7118_v8 = vpop.xlane.xlu1 %1761  ;;  %v3614_v46 = vmul.f32 %v3558_v56, %v2627_v52  ;;  %v7121_v15 = vpop.xlane.xlu0 %1782  ;;  %v3563_v56 = vmul.f32 %v5102_v29, %v3507_v60 }
 0x262   :  { %v4732_v49 = vpop.f32.mrf.mxu1  ;;  %5113 = vrcp.f32 %v7118_v8  ;;  %v5108_v52 = vpop.eup %5107 }
 0x263   :  { %v3677_v23 = vadd.f32 %v7066_v30, %v3614_v46  ;;  %5115 = vrcp.f32 %v7095_v41  ;;  %v3508_v46 = vsub.f32 2.0, %v3452_v53  ;;  %v3454_v1 = vmul.f32 %v5108_v52, %v7083_v6 }
 0x265   :  { %3733 = vst [vmem:[#allocation2 + $0x40] sm:$0xff] %v3677_v23  ;;  %v3564_v43 = vmul.f32 %v5104_v27, %v3508_v46  ;;  %v3510_v29 = vsub.f32 2.0, %v3454_v1 }
 0x266   :  { %v7127_v35 = vpop.xlane.xlu1 %1785  ;;  %v2632_v50 = vpop.f32.mrf.mxu1 }
 0x267   :  { %v7129_v21 = vpop.xlane.xlu0 %1764  ;;  %v3615_v31 = vmul.f32 %v3559_v28, %v2632_v50  ;;  %v3509_v50 = vsub.f32 2.0, %v3453_v12 }
 0x268   :  { %v4735_v10 = vpop.f32.mrf.mxu1  ;;  %5117 = vrcp.f32 %v7129_v21 }
 0x269   :  { %v3678_v59 = vadd.f32 %v7066_v30, %v3615_v31  ;;  %5119 = vrcp.f32 %v7098_v61 }
 0x26a   :  { %v2637_v48 = vpop.f32.mrf.mxu1 }
 0x26b   :  { %3734 = vst [vmem:[#allocation2 + $0x48] sm:$0xff] %v3678_v59  ;;  %v3616_v18 = vmul.f32 %v3560_v63, %v2637_v48  ;;  %v5110_v58 = vpop.eup %5109 }
 0x26c   :  { %v4738_v14 = vpop.f32.mrf.mxu1  ;;  %v5112_v31 = vpop.eup %5111  ;;  %v3466_v6 = vmul.f32 %v5110_v58, %v7113_v51 }
 0x26d   :  { %v7134_v11 = vpop.xlane.xlu1 %1767  ;;  %v7138_v4 = vpop.xlane.xlu0 %1788  ;;  %v3679_v7 = vadd.f32 %v7066_v30, %v3616_v18  ;;  %v3455_v48 = vmul.f32 %v5112_v31, %v7085_v33 }
 0x26e   :  { %v2642_v20 = vpop.f32.mrf.mxu1  ;;  %5121 = vrcp.f32 %v7134_v11  ;;  %v3522_v27 = vsub.f32 2.0, %v3466_v6 }
 0x26f   :  { %3735 = vst [vmem:[#allocation2 + $0x50] sm:$0xff] %v3679_v7  ;;  %v3617_v44 = vmul.f32 %v3561_v37, %v2642_v20  ;;  %5123 = vrcp.f32 %v7107_v25  ;;  %v5114_v26 = vpop.eup %5113  ;;  %v3565_v7 = vmul.f32 %v5106_v0, %v3509_v50 }
 0x270   :  { %v4741_v39 = vpop.f32.mrf.mxu1  ;;  %5125 = vrcp.f32 %v7068_v32  ;;  %v5116_v14 = vpop.eup %5115  ;;  %v3467_v51 = vmul.f32 %v5114_v26, %v7118_v8 }
 0x271   :  { %v3680_v40 = vadd.f32 %v7066_v30, %v3617_v44  ;;  %v3566_v44 = vmul.f32 %v5108_v52, %v3510_v29  ;;  %v3511_v39 = vsub.f32 2.0, %v3455_v48  ;;  %v3456_v33 = vmul.f32 %v5116_v14, %v7095_v41 }
 0x272   :  { %v2647_v45 = vpop.f32.mrf.mxu1  ;;  %v3578_v52 = vmul.f32 %v5110_v58, %v3522_v27 }
 0x273   :  { %v7145_v47 = vpop.xlane.xlu1 %1791  ;;  %3736 = vst [vmem:[#allocation2 + $0x58] sm:$0xff] %v3680_v40  ;;  %v3618_v16 = vmul.f32 %v3562_v5, %v2647_v45  ;;  %v3512_v12 = vsub.f32 2.0, %v3456_v33 }
 0x274   :  { %v7148_v19 = vpop.xlane.xlu0 %1770  ;;  %v4744_v42 = vpop.f32.mrf.mxu1 }
 0x275   :  { %v3681_v9 = vadd.f32 %v7066_v30, %v3618_v16  ;;  %5127 = vrcp.f32 %v7148_v19  ;;  %v5118_v60 = vpop.eup %5117  ;;  %v3523_v42 = vsub.f32 2.0, %v3467_v51 }
 0x276   :  { %v2652_v49 = vpop.f32.mrf.mxu1  ;;  %5129 = vrcp.f32 %v7077_v54  ;;  %v5120_v5 = vpop.eup %5119  ;;  %v3468_v8 = vmul.f32 %v5118_v60, %v7129_v21 }
 0x277   :  { %v7153_v3 = vpop.xlane.xlu1 %1773  ;;  %3737 = vst [vmem:[#allocation2 + $0x60] sm:$0xff] %v3681_v9  ;;  %v3619_v13 = vmul.f32 %v3563_v56, %v2652_v49  ;;  %v3457_v41 = vmul.f32 %v5120_v5, %v7098_v61  ;;  %v3567_v49 = vmul.f32 %v5112_v31, %v3511_v39  ;;  %v3579_v29 = vmul.f32 %v5114_v26, %v3523_v42 }
 0x278   :  { %v7156_v23 = vpop.xlane.xlu0 %1794  ;;  %v4747_v28 = vpop.f32.mrf.mxu1  ;;  %5131 = vrcp.f32 %v7153_v3 }
 0x279   :  { %v3682_v24 = vadd.f32 %v7066_v30, %v3619_v13  ;;  %5133 = vrcp.f32 %v7080_v2 }
 0x27a   :  { %v2743_v10 = vpop.f32.mrf.mxu1 }
 0x27b   :  { %v7163_v59 = vpop.xlane.xlu1 %1797  ;;  %3738 = vst [vmem:[#allocation2 + $0x68] sm:$0xff] %v3682_v24  ;;  %v3620_v63 = vmul.f32 %v3564_v43, %v2743_v10  ;;  %v5122_v46 = vpop.eup %5121  ;;  %v3524_v10 = vsub.f32 2.0, %v3468_v8 }
 0x27c   :  { %v4764_v55 = vpop.f32.mrf.mxu1  ;;  %v7168_v18 = vpop.xlane.xlu0 %1776  ;;  %v3469_v61 = vmul.f32 %v5122_v46, %v7134_v11 }
 0x27d   :  { %v3683_v62 = vadd.f32 %v7066_v30, %v3620_v63  ;;  %v5124_v1 = vpop.eup %5123  ;;  %5135 = vrcp.f32 %v7168_v18  ;;  %v3513_v55 = vsub.f32 2.0, %v3457_v41 }
 0x27e   :  { %v2748_v57 = vpop.f32.mrf.mxu1  ;;  %v7187_v43 = vpop.eup %5125  ;;  %v3458_v48 = vmul.f32 %v5124_v1, %v7107_v25  ;;  %v3525_v26 = vsub.f32 2.0, %v3469_v61  ;;  %5137 = vrcp.f32 %v7088_v36 }
 0x27f   :  { %3739 = vst [vmem:[#allocation2 + $0x70] sm:$0xff] %v3683_v62  ;;  %v3621_v37 = vmul.f32 %v3565_v7, %v2748_v57  ;;  %v7175_v53 = vpop.xlane.xlu1 %1821  ;;  %v3568_v57 = vmul.f32 %v5116_v14, %v3512_v12  ;;  %v3459_v11 = vmul.f32 %v7187_v43, %v7068_v32  ;;  %v3569_v8 = vmul.f32 %v5120_v5, %v3513_v55 }
 0x280   :  { %v4767_v20 = vpop.f32.mrf.mxu1  ;;  %v7178_v45 = vpop.xlane.xlu0 %1800  ;;  %v3514_v14 = vsub.f32 2.0, %v3458_v48  ;;  %v3581_v5 = vmul.f32 %v5122_v46, %v3525_v26 }
 0x281   :  { %v3684_v40 = vadd.f32 %v7066_v30, %v3621_v37  ;;  %5139 = vrcp.f32 %v7178_v45  ;;  %v3515_v12 = vsub.f32 2.0, %v3459_v11 }
 0x282   :  { %v2753_v0 = vpop.f32.mrf.mxu1  ;;  %v5128_v6 = vpop.eup %5127  ;;  %5141 = vrcp.f32 %v7093_v17 }
 0x283   :  { %3740 = vst [vmem:[#allocation2 + $0x78] sm:$0xff] %v3684_v40  ;;  %v3622_v16 = vmul.f32 %v3566_v44, %v2753_v0  ;;  %v7185_v24 = vpop.xlane.xlu1 %1803  ;;  %v3470_v39 = vmul.f32 %v5128_v6, %v7148_v19  ;;  %v3580_v40 = vmul.f32 %v5118_v60, %v3524_v10  ;;  %v5130_v0 = vpop.eup %5129  ;;  %v3570_v10 = vmul.f32 %v5124_v1, %v3514_v14 }
 0x284   :  { %v4770_v56 = vpop.f32.mrf.mxu1  ;;  %v7192_v62 = vpop.xlane.xlu0 %1824  ;;  %5143 = vrcp.f32 %v7185_v24  ;;  %v3571_v1 = vmul.f32 %v7187_v43, %v3515_v12 }
 0x285   :  { %v3685_v9 = vadd.f32 %v7066_v30, %v3622_v16  ;;  %v5132_v56 = vpop.eup %5131  ;;  %5145 = vrcp.f32 %v7100_v34 }
 0x286   :  { %v2758_v28 = vpop.f32.mrf.mxu1 }
 0x287   :  { %v2985_v13 = vpop.f32.mrf.mxu0  ;;  %3741 = vst [vmem:[#allocation2 + $0x80] sm:$0xff] %v3685_v9  ;;  %v3623_v21 = vmul.f32 %v3567_v49, %v2758_v28  ;;  %v3526_v49 = vsub.f32 2.0, %v3470_v39 }
 0x288   :  { %v3634_v50 = vmul.f32 %v3578_v52, %v2985_v13  ;;  %v4773_v63 = vpop.f32.mrf.mxu1  ;;  %v7200_v16 = vpop.xlane.xlu1 %1827 }
 0x289   :  { %v4834_v58 = vpop.f32.mrf.mxu0  ;;  %v3686_v7 = vadd.f32 %v7066_v30, %v3623_v21  ;;  %v7204_v41 = vpop.xlane.xlu0 %1806  ;;  %v3471_v21 = vmul.f32 %v5132_v56, %v7153_v3 }
 0x28a   :  { %v3697_v31 = vadd.f32 %v7066_v30, %v3634_v50  ;;  %v2763_v27 = vpop.f32.mrf.mxu1  ;;  %v3460_v50 = vmul.f32 %v5130_v0, %v7077_v54  ;;  %5147 = vrcp.f32 %v7204_v41 }
 0x28b   :  { %v2990_v37 = vpop.f32.mrf.mxu0  ;;  %3742 = vst [vmem:[#allocation2 + $0x88] sm:$0xff] %v3686_v7  ;;  %v3624_v20 = vmul.f32 %v3568_v57, %v2763_v27  ;;  %v3582_v57 = vmul.f32 %v5128_v6, %v3526_v49  ;;  %v3527_v27 = vsub.f32 2.0, %v3471_v21  ;;  %5149 = vrcp.f32 %v7105_v38 }
 0x28c   :  { %3753 = vst [vmem:[#allocation2 + $0xe0] sm:$0xff] %v3697_v31  ;;  %v3635_v51 = vmul.f32 %v3579_v29, %v2990_v37  ;;  %v4776_v33 = vpop.f32.mrf.mxu1  ;;  %v5134_v29 = vpop.eup %5133  ;;  %v3516_v37 = vsub.f32 2.0, %v3460_v50 }
 0x28d   :  { %v4837_v44 = vpop.f32.mrf.mxu0  ;;  %v3687_v42 = vadd.f32 %v7066_v30, %v3624_v20  ;;  %v7212_v55 = vpop.xlane.xlu1 %1809  ;;  %v3461_v39 = vmul.f32 %v5134_v29, %v7080_v2 }
 0x28e   :  { %v3698_v25 = vadd.f32 %v7066_v30, %v3635_v51  ;;  %v2768_v52 = vpop.f32.mrf.mxu1  ;;  %v5136_v46 = vpop.eup %5135  ;;  %5151 = vrcp.f32 %v7212_v55 }
 0x28f   :  { %v2995_v32 = vpop.f32.mrf.mxu0  ;;  %3743 = vst [vmem:[#allocation2 + $0x90] sm:$0xff] %v3687_v42  ;;  %v3625_v60 = vmul.f32 %v3569_v8, %v2768_v52  ;;  %v7218_v51 = vpop.xlane.xlu0 %1830  ;;  %v3572_v8 = vmul.f32 %v5130_v0, %v3516_v37  ;;  %v3517_v12 = vsub.f32 2.0, %v3461_v39  ;;  %5153 = vrcp.f32 %v7111_v22 }
 0x290   :  { %3754 = vst [vmem:[#allocation2 + $0xe8] sm:$0xff] %v3698_v25  ;;  %v3636_v19 = vmul.f32 %v3580_v40, %v2995_v32  ;;  %v4779_v28 = vpop.f32.mrf.mxu1  ;;  %v3472_v25 = vmul.f32 %v5136_v46, %v7168_v18  ;;  %v3583_v32 = vmul.f32 %v5132_v56, %v3527_v27  ;;  %v5138_v52 = vpop.eup %5137 }
 0x291   :  { %v4840_v9 = vpop.f32.mrf.mxu0  ;;  %v3688_v58 = vadd.f32 %v7066_v30, %v3625_v60  ;;  %v7225_v14 = vpop.xlane.xlu1 %1833  ;;  %v3462_v21 = vmul.f32 %v5138_v52, %v7088_v36 }
 0x292   :  { %v3699_v13 = vadd.f32 %v7066_v30, %v3636_v19  ;;  %v2773_v31 = vpop.f32.mrf.mxu1  ;;  %v5140_v19 = vpop.eup %5139  ;;  %v3528_v60 = vsub.f32 2.0, %v3472_v25 }
 0x293   :  { %v3000_v61 = vpop.f32.mrf.mxu0  ;;  %3744 = vst [vmem:[#allocation2 + $0x98] sm:$0xff] %v3688_v58  ;;  %v3626_v48 = vmul.f32 %v3570_v10, %v2773_v31  ;;  %v7229_v9 = vpop.xlane.xlu0 %1812  ;;  %v3480_v58 = vmul.f32 %v5140_v19, %v7178_v45  ;;  %v3573_v31 = vmul.f32 %v5134_v29, %v3517_v12  ;;  %v3518_v36 = vsub.f32 2.0, %v3462_v21 }
 0x294   :  { %3755 = vst [vmem:[#allocation2 + $0xf0] sm:$0xff] %v3699_v13  ;;  %v3637_v63 = vmul.f32 %v3581_v5, %v3000_v61  ;;  %v4782_v3 = vpop.f32.mrf.mxu1  ;;  %v5142_v50 = vpop.eup %5141  ;;  %5155 = vrcp.f32 %v7229_v9 }
 0x295   :  { %v4843_v7 = vpop.f32.mrf.mxu0  ;;  %v3689_v11 = vadd.f32 %v7066_v30, %v3626_v48  ;;  %v5144_v10 = vpop.eup %5143  ;;  %v3463_v3 = vmul.f32 %v5142_v50, %v7093_v17  ;;  %5157 = vrcp.f32 %v7121_v15  ;;  %v3536_v45 = vsub.f32 2.0, %v3480_v58 }
 0x296   :  { %v3700_v54 = vadd.f32 %v7066_v30, %v3637_v63  ;;  %v2864_v44 = vpop.f32.mrf.mxu1  ;;  %v7237_v61 = vpop.xlane.xlu1 %1815  ;;  %v3584_v63 = vmul.f32 %v5136_v46, %v3528_v60  ;;  %v3481_v27 = vmul.f32 %v5144_v10, %v7185_v24  ;;  %v3574_v24 = vmul.f32 %v5138_v52, %v3518_v36 }
 0x297   :  { %v3005_v20 = vpop.f32.mrf.mxu0  ;;  %3745 = vst [vmem:[#allocation2 + $0xa0] sm:$0xff] %v3689_v11  ;;  %v3627_v33 = vmul.f32 %v3571_v1, %v2864_v44  ;;  %5159 = vrcp.f32 %v7237_v61  ;;  %v3519_v44 = vsub.f32 2.0, %v3463_v3  ;;  %v7247_v39 = vpop.xlane.xlu0 %1818 }
 0x298   :  { %3756 = vst [vmem:[#allocation2 + $0xf8] sm:$0xff] %v3700_v54  ;;  %v3638_v26 = vmul.f32 %v3582_v57, %v3005_v20  ;;  %v4799_v40 = vpop.f32.mrf.mxu1  ;;  %v5146_v54 = vpop.eup %5145  ;;  %5161 = vrcp.f32 %v7127_v35 }
 0x299   :  { %v4846_v43 = vpop.f32.mrf.mxu0  ;;  %v3690_v42 = vadd.f32 %v7066_v30, %v3627_v33  ;;  %v5148_v37 = vpop.eup %5147  ;;  %v3464_v17 = vmul.f32 %v5146_v54, %v7100_v34  ;;  %v3537_v33 = vsub.f32 2.0, %v3481_v27  ;;  %5163 = vrcp.f32 %v7247_v39 }
 0x29a   :  { %v3701_v6 = vadd.f32 %v7066_v30, %v3638_v26  ;;  %v3482_v26 = vmul.f32 %v5148_v37, %v7204_v41  ;;  %v5150_v25 = vpop.eup %5149  ;;  %v3592_v43 = vmul.f32 %v5140_v19, %v3536_v45  ;;  %v3575_v60 = vmul.f32 %v5142_v50, %v3519_v44 }
 0x29b   :  { %v2869_v2 = vpop.f32.mrf.mxu1  ;;  %3746 = vst [vmem:[#allocation2 + $0xa8] sm:$0xff] %v3690_v42  ;;  %v3520_v34 = vsub.f32 2.0, %v3464_v17  ;;  %v3465_v41 = vmul.f32 %v5150_v25, %v7105_v38  ;;  %5165 = vrcp.f32 %v7138_v4 }
 0x29c   :  { %3757 = vst [vmem:[#allocation2 + $0x100] sm:$0xff] %v3701_v6  ;;  %v3010_v18 = vpop.f32.mrf.mxu0  ;;  %v3628_v49 = vmul.f32 %v3572_v8, %v2869_v2  ;;  %v5152_v6 = vpop.eup %5151  ;;  %v3538_v2 = vsub.f32 2.0, %v3482_v26  ;;  %5167 = vrcp.f32 %v7145_v47 }
 0x29d   :  { %v3639_v13 = vmul.f32 %v3583_v32, %v3010_v18  ;;  %v4802_v28 = vpop.f32.mrf.mxu1  ;;  %v3483_v52 = vmul.f32 %v5152_v6, %v7212_v55  ;;  %v3521_v58 = vsub.f32 2.0, %v3465_v41  ;;  %v3576_v55 = vmul.f32 %v5146_v54, %v3520_v34 }
 0x29e   :  { %v4849_v5 = vpop.f32.mrf.mxu0  ;;  %v3691_v0 = vadd.f32 %v7066_v30, %v3628_v49  ;;  %v5154_v49 = vpop.eup %5153  ;;  %v3593_v28 = vmul.f32 %v5144_v10, %v3537_v33  ;;  %5169 = vrcp.f32 %v7156_v23 }
 0x29f   :  { %v3702_v56 = vadd.f32 %v7066_v30, %v3639_v13  ;;  %v3473_v50 = vmul.f32 %v5154_v49, %v7111_v22  ;;  %5171 = vrcp.f32 %v7163_v59 }
 0x2a0   :  { %3747 = vst [vmem:[#allocation2 + $0xb0] sm:$0xff] %v3691_v0  ;;  %5173 = vrcp.f32 %v7175_v53 }
 0x2a1   :  { %3758 = vst [vmem:[#allocation2 + $0x108] sm:$0xff] %v3702_v56  ;;  %v5156_v5 = vpop.eup %5155  ;;  %5175 = vrcp.f32 %v7192_v62 }
 0x2a2   :  { %v2874_v48 = vpop.f32.mrf.mxu1  ;;  %v3015_v7 = vpop.f32.mrf.mxu0  ;;  %v3484_v3 = vmul.f32 %v5156_v5, %v7229_v9  ;;  %5177 = vrcp.f32 %v7200_v16 }
 0x2a3   :  { %v3629_v1 = vmul.f32 %v3573_v31, %v2874_v48  ;;  %v3640_v57 = vmul.f32 %v3584_v63, %v3015_v7  ;;  %v3594_v48 = vmul.f32 %v5148_v37, %v3538_v2  ;;  %v3539_v7 = vsub.f32 2.0, %v3483_v52 }
 0x2a4   :  { %v4805_v11 = vpop.f32.mrf.mxu1  ;;  %v4852_v20 = vpop.f32.mrf.mxu0  ;;  %5179 = vrcp.f32 %v7218_v51 }
 0x2a5   :  { %v3692_v29 = vadd.f32 %v7066_v30, %v3629_v1  ;;  %v3703_v46 = vadd.f32 %v7066_v30, %v3640_v57  ;;  %v5158_v57 = vpop.eup %5157  ;;  %v3529_v20 = vsub.f32 2.0, %v3473_v50  ;;  %v3595_v17 = vmul.f32 %v5152_v6, %v3539_v7 }
 0x2a6   :  { %v5160_v27 = vpop.eup %5159  ;;  %v3474_v26 = vmul.f32 %v5158_v57, %v7121_v15  ;;  %5181 = vrcp.f32 %v7225_v14 }
 0x2a7   :  { %3748 = vst [vmem:[#allocation2 + $0xb8] sm:$0xff] %v3692_v29  ;;  %3759 = vst [vmem:[#allocation2 + $0x110] sm:$0xff] %v3703_v46  ;;  %v3577_v29 = vmul.f32 %v5150_v25, %v3521_v58  ;;  %v3540_v46 = vsub.f32 2.0, %v3484_v3  ;;  %v3485_v33 = vmul.f32 %v5160_v27, %v7237_v61  ;;  %v3585_v2 = vmul.f32 %v5154_v49, %v3529_v20 }
 0x2a9   :  { %v2879_v40 = vpop.f32.mrf.mxu1  ;;  %v3227_v42 = vpop.f32.mrf.mxu0  ;;  %v3596_v15 = vmul.f32 %v5156_v5, %v3540_v46 }
 0x2aa   :  { %v3630_v8 = vmul.f32 %v3574_v24, %v2879_v40  ;;  %v3648_v32 = vmul.f32 %v3592_v43, %v3227_v42  ;;  %v5162_v40 = vpop.eup %5161 }
 0x2ab   :  { %v4808_v18 = vpop.f32.mrf.mxu1  ;;  %v4904_v12 = vpop.f32.mrf.mxu0  ;;  %v3475_v61 = vmul.f32 %v5162_v40, %v7127_v35 }
 0x2ac   :  { %v3693_v19 = vadd.f32 %v7066_v30, %v3630_v8  ;;  %v3711_v13 = vadd.f32 %v7066_v30, %v3648_v32  ;;  %v5164_v25 = vpop.eup %5163  ;;  %v3530_v18 = vsub.f32 2.0, %v3474_v26  ;;  %v3541_v12 = vsub.f32 2.0, %v3485_v33 }
 0x2ad   :  { %v2884_v0 = vpop.f32.mrf.mxu1  ;;  %v3232_v56 = vpop.f32.mrf.mxu0 }
 0x2ae   :  { %3749 = vst [vmem:[#allocation2 + $0xc0] sm:$0xff] %v3693_v19  ;;  %3767 = vst [vmem:[#allocation2 + $0x150] sm:$0xff] %v3711_v13  ;;  %v3631_v38 = vmul.f32 %v3575_v60, %v2884_v0  ;;  %v3649_v21 = vmul.f32 %v3593_v28, %v3232_v56  ;;  %v5166_v19 = vpop.eup %5165  ;;  %v3486_v13 = vmul.f32 %v5164_v25, %v7247_v39 }
 0x2af   :  { %v4811_v31 = vpop.f32.mrf.mxu1  ;;  %v4907_v63 = vpop.f32.mrf.mxu0  ;;  %v3476_v35 = vmul.f32 %v5166_v19, %v7138_v4  ;;  %v3597_v58 = vmul.f32 %v5160_v27, %v3541_v12 }
 0x2b0   :  { %v3694_v10 = vadd.f32 %v7066_v30, %v3631_v38  ;;  %v3712_v1 = vadd.f32 %v7066_v30, %v3649_v21  ;;  %v3586_v21 = vmul.f32 %v5158_v57, %v3530_v18  ;;  %v5168_v50 = vpop.eup %5167  ;;  %v3531_v31 = vsub.f32 2.0, %v3475_v61 }
 0x2b1   :  { %v2889_v36 = vpop.f32.mrf.mxu1  ;;  %v3237_v45 = vpop.f32.mrf.mxu0  ;;  %v3542_v63 = vsub.f32 2.0, %v3486_v13 }
 0x2b2   :  { %3750 = vst [vmem:[#allocation2 + $0xc8] sm:$0xff] %v3694_v10  ;;  %3768 = vst [vmem:[#allocation2 + $0x158] sm:$0xff] %v3712_v1  ;;  %v3632_v22 = vmul.f32 %v3576_v55, %v2889_v36  ;;  %v3650_v11 = vmul.f32 %v3594_v48, %v3237_v45  ;;  %v3532_v1 = vsub.f32 2.0, %v3476_v35  ;;  %v3477_v36 = vmul.f32 %v5168_v50, %v7145_v47 }
 0x2b3   :  { %v4814_v54 = vpop.f32.mrf.mxu1  ;;  %v4910_v37 = vpop.f32.mrf.mxu0  ;;  %v3587_v57 = vmul.f32 %v5162_v40, %v3531_v31  ;;  %v3598_v27 = vmul.f32 %v5164_v25, %v3542_v63 }
 0x2b4   :  { %v3695_v9 = vadd.f32 %v7066_v30, %v3632_v22  ;;  %v3713_v44 = vadd.f32 %v7066_v30, %v3650_v11  ;;  %v5170_v22 = vpop.eup %5169 }
 0x2b5   :  { %v2894_v24 = vpop.f32.mrf.mxu1  ;;  %v3242_v43 = vpop.f32.mrf.mxu0  ;;  %v3478_v47 = vmul.f32 %v5170_v22, %v7156_v23 }
 0x2b6   :  { %3751 = vst [vmem:[#allocation2 + $0xd0] sm:$0xff] %v3695_v9  ;;  %3769 = vst [vmem:[#allocation2 + $0x160] sm:$0xff] %v3713_v44  ;;  %v3633_v42 = vmul.f32 %v3577_v29, %v2894_v24  ;;  %v3651_v8 = vmul.f32 %v3595_v17, %v3242_v43  ;;  %v3533_v29 = vsub.f32 2.0, %v3477_v36  ;;  %v3588_v44 = vmul.f32 %v5166_v19, %v3532_v1  ;;  %v5172_v33 = vpop.eup %5171 }
 0x2b7   :  { %v4817_v32 = vpop.f32.mrf.mxu1  ;;  %v4913_v34 = vpop.f32.mrf.mxu0  ;;  %v3534_v25 = vsub.f32 2.0, %v3478_v47 }
 0x2b8   :  { %v3696_v41 = vadd.f32 %v7066_v30, %v3633_v42  ;;  %v3714_v6 = vadd.f32 %v7066_v30, %v3651_v8  ;;  %v3589_v42 = vmul.f32 %v5168_v50, %v3533_v29  ;;  %v5174_v8 = vpop.eup %5173  ;;  %v3479_v32 = vmul.f32 %v5172_v33, %v7163_v59 }
 0x2b9   :  { %v3106_v60 = vpop.f32.mrf.mxu1  ;;  %v3247_v52 = vpop.f32.mrf.mxu0  ;;  %v3590_v61 = vmul.f32 %v5170_v22, %v3534_v25 }
 0x2ba   :  { %3752 = vst [vmem:[#allocation2 + $0xd8] sm:$0xff] %v3696_v41  ;;  %3770 = vst [vmem:[#allocation2 + $0x168] sm:$0xff] %v3714_v6  ;;  %v3641_v28 = vmul.f32 %v3585_v2, %v3106_v60  ;;  %v3652_v0 = vmul.f32 %v3596_v15, %v3247_v52  ;;  %v3487_v6 = vmul.f32 %v5174_v8, %v7175_v53  ;;  %v3535_v15 = vsub.f32 2.0, %v3479_v32  ;;  %v5176_v12 = vpop.eup %5175  ;;  %v1837_v60 = vpop.xlane.xlu0 %1836  ;;  %v7293_v53 = vld [vmem:[%s7314_s4] ss:$0 sm:$0xff]  ;;  %s5212_s4 = smov [#allocation2]  }
 0x2bb   :  { %v4869_v56 = vpop.f32.mrf.mxu1  ;;  %v4916_v38 = vpop.f32.mrf.mxu0  ;;  %5183 = vrcp.f32 %v1837_v60  ;;  %s3786_s28 = sshll.u32 %s5212_s4, 4  ;;  %s3787_s28 = int_to_ptr.vmem [resolvable:$true] %s3786_s28 }
 0x2bc   :  { %v3704_v49 = vadd.f32 %v7066_v30, %v3641_v28  ;;  %v3715_v5 = vadd.f32 %v7066_v30, %v3652_v0  ;;  %v3543_v19 = vsub.f32 2.0, %v3487_v6  ;;  %v3488_v28 = vmul.f32 %v5176_v12, %v7192_v62  ;;  %v1840_v38 = vpop.xlane.xlu1 %1839  ;;  %s5188_s29 = scalar_lea.vmem %s3787_s28, 7168  ;;  %p5193_p1 = scmp.lt.s32.totalorder %s3787_s28, %s3787_s28 }
 0x2bd   :  { %v3591_v56 = vmul.f32 %v5172_v33, %v3535_v15  ;;  %5185 = vrcp.f32 %v1840_v38  ;;  %p5189_p0 = scmp.ne.s32.totalorder %s3787_s28, %s5188_s29  ;;  %p5194_p2 = scmp.lt.s32.totalorder %s5188_s29, %s5188_s29 }
 0x2be   :  { %3760 = vst [vmem:[#allocation2 + $0x118] sm:$0xff] %v3704_v49  ;;  %3771 = vst [vmem:[#allocation2 + $0x170] sm:$0xff] %v3715_v5  ;;  %v3111_v39 = vpop.f32.mrf.mxu1  ;;  %v3252_v55 = vpop.f32.mrf.mxu0 }
 0x2bf   :  { %v3642_v48 = vmul.f32 %v3586_v21, %v3111_v39  ;;  %v3653_v7 = vmul.f32 %v3597_v58, %v3252_v55  ;;  %v3599_v21 = vmul.f32 %v5174_v8, %v3543_v19  ;;  %v3544_v58 = vsub.f32 2.0, %v3488_v28  ;;  %p5195_p3 = por %p5194_p2, %p5193_p1 }
 0x2c0   :  { %v4872_v3 = vpop.f32.mrf.mxu1  ;;  %v4919_v10 = vpop.f32.mrf.mxu0 }
 0x2c1   :  { %v3705_v4 = vadd.f32 %v7066_v30, %v3642_v48  ;;  %v3716_v45 = vadd.f32 %v7066_v30, %v3653_v7  ;;  %v3600_v10 = vmul.f32 %v5176_v12, %v3544_v58  ;;  %p5196_p4 = pnand %p5195_p3, %p5189_p0 }
 0x2c3   :  { %3761 = vst [vmem:[#allocation2 + $0x120] sm:$0xff] %v3705_v4  ;;  %3772 = vst [vmem:[#allocation2 + $0x178] sm:$0xff] %v3716_v45  ;;  %v3116_v11 = vpop.f32.mrf.mxu1  ;;  %v3257_v20 = vpop.f32.mrf.mxu0 }
 0x2c4   :  { %v3643_v54 = vmul.f32 %v3587_v57, %v3116_v11  ;;  %v3654_v37 = vmul.f32 %v3598_v27, %v3257_v20 }
 0x2c5   :  { %v4875_v46 = vpop.f32.mrf.mxu1  ;;  %v4922_v9 = vpop.f32.mrf.mxu0 }
 0x2c6   :  { %v3706_v17 = vadd.f32 %v7066_v30, %v3643_v54  ;;  %v3717_v26 = vadd.f32 %v7066_v30, %v3654_v37 }
 0x2c7   :  { %v3121_v24 = vpop.f32.mrf.mxu1 }
 0x2c8   :  { %3762 = vst [vmem:[#allocation2 + $0x128] sm:$0xff] %v3706_v17  ;;  %3773 = vst [vmem:[#allocation2 + $0x180] sm:$0xff] %v3717_v26  ;;  %v3644_v43 = vmul.f32 %v3588_v44, %v3121_v24 }
 0x2c9   :  { %v4878_v40 = vpop.f32.mrf.mxu1 }
 0x2ca   :  { %v3707_v23 = vadd.f32 %v7066_v30, %v3644_v43 }
 0x2cb   :  { %v3126_v34 = vpop.f32.mrf.mxu1 }
 0x2cc   :  { %3763 = vst [vmem:[#allocation2 + $0x130] sm:$0xff] %v3707_v23  ;;  %v3645_v41 = vmul.f32 %v3589_v42, %v3126_v34 }
 0x2cd   :  { %v4881_v2 = vpop.f32.mrf.mxu1 }
 0x2ce   :  { %v3708_v18 = vadd.f32 %v7066_v30, %v3645_v41  ;;  %v5178_v30 = vpop.eup %5177 }
 0x2cf   :  { %v3131_v52 = vpop.f32.mrf.mxu1  ;;  %v3489_v50 = vmul.f32 %v5178_v30, %v7200_v16  ;;  %v5180_v31 = vpop.eup %5179 }
 0x2d0   :  { %3764 = vst [vmem:[#allocation2 + $0x138] sm:$0xff] %v3708_v18  ;;  %v3646_v59 = vmul.f32 %v3590_v61, %v3131_v52  ;;  %v3490_v7 = vmul.f32 %v5180_v31, %v7218_v51  ;;  %v5182_v1 = vpop.eup %5181 }
 0x2d1   :  { %v4884_v13 = vpop.f32.mrf.mxu1  ;;  %v3545_v48 = vsub.f32 2.0, %v3489_v50  ;;  %v3491_v57 = vmul.f32 %v5182_v1, %v7225_v14  ;;  %v5184_v11 = vpop.eup %5183 }
 0x2d2   :  { %v3709_v0 = vadd.f32 %v7293_v53, %v3646_v59  ;;  %v3546_v16 = vsub.f32 2.0, %v3490_v7  ;;  %v3492_v29 = vmul.f32 %v5184_v11, %v1837_v60  ;;  %v5186_v44 = vpop.eup %5185 }
 0x2d3   :  { %v3136_v49 = vpop.f32.mrf.mxu1  ;;  %v3601_v22 = vmul.f32 %v5178_v30, %v3545_v48  ;;  %v3547_v51 = vsub.f32 2.0, %v3491_v57  ;;  %v3493_v33 = vmul.f32 %v5186_v44, %v1840_v38 }
 0x2d4   :  { %3765 = vst [vmem:[#allocation2 + $0x140] sm:$0xff] %v3709_v0  ;;  %v3647_v5 = vmul.f32 %v3591_v56, %v3136_v49  ;;  %v3602_v9 = vmul.f32 %v5180_v31, %v3546_v16  ;;  %v3548_v14 = vsub.f32 2.0, %v3492_v29 }
 0x2d5   :  { %v4887_v35 = vpop.f32.mrf.mxu1  ;;  %v3603_v43 = vmul.f32 %v5182_v1, %v3547_v51  ;;  %v3549_v25 = vsub.f32 2.0, %v3493_v33 }
 0x2d6   :  { %v3710_v62 = vadd.f32 %v7293_v53, %v3647_v5  ;;  %v3604_v23 = vmul.f32 %v5184_v11, %v3548_v14 }
 0x2d7   :  { %v3348_v63 = vpop.f32.mrf.mxu1  ;;  %v3605_v15 = vmul.f32 %v5186_v44, %v3549_v25 }
 0x2d8   :  { %3766 = vst [vmem:[#allocation2 + $0x148] sm:$0xff] %v3710_v62  ;;  %v3655_v39 = vmul.f32 %v3599_v21, %v3348_v63 }
 0x2d9   :  { %v4939_v55 = vpop.f32.mrf.mxu1 }
 0x2da   :  { %v3718_v3 = vadd.f32 %v7293_v53, %v3655_v39 }
 0x2db   :  { %v3353_v36 = vpop.f32.mrf.mxu1 }
 0x2dc   :  { %3774 = vst [vmem:[#allocation2 + $0x188] sm:$0xff] %v3718_v3  ;;  %v3656_v4 = vmul.f32 %v3600_v10, %v3353_v36 }
 0x2dd   :  { %v4942_v45 = vpop.f32.mrf.mxu1 }
 0x2de   :  { %v3719_v27 = vadd.f32 %v7293_v53, %v3656_v4 }
 0x2df   :  { %v3358_v20 = vpop.f32.mrf.mxu1 }
 0x2e0   :  { %3775 = vst [vmem:[#allocation2 + $0x190] sm:$0xff] %v3719_v27  ;;  %v3657_v54 = vmul.f32 %v3601_v22, %v3358_v20 }
 0x2e1   :  { %v4945_v37 = vpop.f32.mrf.mxu1 }
 0x2e2   :  { %v3720_v46 = vadd.f32 %v7293_v53, %v3657_v54 }
 0x2e3   :  { %v3363_v47 = vpop.f32.mrf.mxu1 }
 0x2e4   :  { %3776 = vst [vmem:[#allocation2 + $0x198] sm:$0xff] %v3720_v46  ;;  %v3658_v17 = vmul.f32 %v3602_v9, %v3363_v47 }
 0x2e5   :  { %v4948_v26 = vpop.f32.mrf.mxu1 }
 0x2e6   :  { %v3721_v24 = vadd.f32 %v7293_v53, %v3658_v17 }
 0x2e7   :  { %v3368_v40 = vpop.f32.mrf.mxu1 }
 0x2e8   :  { %3777 = vst [vmem:[#allocation2 + $0x1a0] sm:$0xff] %v3721_v24  ;;  %v3659_v42 = vmul.f32 %v3603_v43, %v3368_v40 }
 0x2e9   :  { %v4951_v8 = vpop.f32.mrf.mxu1 }
 0x2ea   :  { %v3722_v32 = vadd.f32 %v7293_v53, %v3659_v42 }
 0x2eb   :  { %v3373_v34 = vpop.f32.mrf.mxu1 }
 0x2ec   :  { %3778 = vst [vmem:[#allocation2 + $0x1a8] sm:$0xff] %v3722_v32  ;;  %v3660_v41 = vmul.f32 %v3604_v23, %v3373_v34 }
 0x2ed   :  { %v4954_v6 = vpop.f32.mrf.mxu1 }
 0x2ee   :  { %v3723_v2 = vadd.f32 %v7293_v53, %v3660_v41 }
 0x2ef   :  { %v3378_v18 = vpop.f32.mrf.mxu1 }
 0x2f0   :  { %3779 = vst [vmem:[#allocation2 + $0x1b0] sm:$0xff] %v3723_v2  ;;  %v3661_v61 = vmul.f32 %v3605_v15, %v3378_v18 }
 0x2f1   :  { %v4957_v12 = vpop.f32.mrf.mxu1 }
 0x2f2   :  { %v3724_v60 = vadd.f32 %v7293_v53, %v3661_v61 }
 0x2f4   :  { %3780 = vst [vmem:[#allocation2 + $0x1b8] sm:$0xff] %v3724_v60 }
 0x2f5   :  { %5199 = shalt.err (!%p5196_p4)
}
 0x2f6   :  { %s5213_s30 = smov 128   ;;  %s5214_s7 = smov 8  }
 0x2f7   :  { %3792 = dma.vmem_to_hbm [thread:$0]  %s3787_s28, 7168, %s7316_s6, [#allocation3], %s5213_s30, %s5213_s30, %s5214_s7  }
 0x2f8   :  { %5208 = dma.done.wait [#allocation3], 7168  }
 0x2f9   :  { %5209 = vsyncadd [#allocation3], 4294960128 }
 0x2fa   :  { %3796 = vsyncpa [#allocation3], 1 }

</bundles_post_ra>
